<compile_context>
chip_gen: v6e
topology: v6e:2x2x1
jax: 0.10.0
libtpu: 0.0.40
codegen_flags: <defaults>
</compile_context>

<pallas_src>
from functools import partial

import jax
import jax.numpy as jnp
from jax.experimental import pallas as pl
from jax.experimental.pallas import tpu as pltpu


# ----------------------------------------------------------------------------
# Host-side constant builders
# ----------------------------------------------------------------------------
def interp_matrix(out_size, in_size):
    """Row-stochastic 1-D linear-interp matrix, align_corners=True (needs in_size>=2)."""
    # TODO(synk): degenerate in_size==1 / out_size==1 not handled (PyTorch edge case).
    pos = jnp.arange(out_size, dtype=jnp.float32) * (in_size - 1) / (out_size - 1)
    lo = jnp.clip(jnp.floor(pos).astype(jnp.int32), 0, in_size - 2)
    w = pos - lo.astype(jnp.float32)
    rows = jnp.arange(out_size)
    m = jnp.zeros((out_size, in_size), jnp.float32)
    m = m.at[rows, lo].add(1.0 - w)
    m = m.at[rows, lo + 1].add(w)
    return m


def _toeplitz_from_conv(wconv, kw, kci, Wo, Cout):
    """Build the 3 W-direction Toeplitz slabs (3, K, Wo*Cout) from (3,3,Cin,Cout) weights.

    kw[k], kci[k] give the (width position, input channel) of fused-input column k.
    Slab dy maps a padded input row (ho+dy) to output row ho; the W-direction halo
    (padding=1) is realized by zero entries, so no W padding is needed in the buffer.
    """
    j = jnp.arange(Wo * Cout)
    wo = j // Cout
    co = j % Cout
    dx = kw[:, None] - wo[None, :] + 1                 # (K, J)
    valid = (dx >= 0) & (dx <= 2)
    dxc = jnp.clip(dx, 0, 2)
    vals = wconv[:, dxc, kci[:, None], co[None, :]]    # (3, K, J)
    return jnp.where(valid[None, :, :], vals, 0.0).astype(jnp.bfloat16)


# ----------------------------------------------------------------------------
# Fused decoder-unit kernel
# ----------------------------------------------------------------------------
def _make_decoder_kernel(N, H, W, Cx, Cs, Cout):
    Ho, Wo = 2 * H, 2 * W
    Cin = Cs + Cx
    SKW = Wo * Cs                 # lane offset where the upsampled-x channels start
    FI = Wo * Cin                 # fused conv1 input row width
    FO = Wo * Cout                # fused conv output row width
    RP = N * (Ho + 2)             # flat halo-padded rows (all images stacked)
    ROUT = RP - 2                 # batched conv output rows (incl. 2 garbage rows per gap)
    inv_cnt = 1.0 / float(N * Ho * Wo)
    eps = 1e-5
    has_skip = Cs > 0

    def kernel(*refs):
        if has_skip:
            (x_ref, skip_ref, ah_ref, awk_ref, t1_hbm, t2_hbm, r_ref, rt_ref,
             b1_ref, g1_ref, bt1_ref, b2_ref, g2_ref, bt2_ref,
             o_ref, xin_ref, h1_ref, t1_vm, t2_vm, sem) = refs
        else:
            (x_ref, ah_ref, awk_ref, t1_hbm, t2_hbm, r_ref, rt_ref,
             b1_ref, g1_ref, bt1_ref, b2_ref, g2_ref, bt2_ref,
             o_ref, xin_ref, h1_ref, t1_vm, t2_vm, sem) = refs
            skip_ref = None

        # ---- Kick off weight-slab DMAs; they overlap the upsample stage -------------
        t1_cp = pltpu.make_async_copy(t1_hbm, t1_vm, sem.at[0])
        t2_cp = pltpu.make_async_copy(t2_hbm, t2_vm, sem.at[1])
        t1_cp.start()
        t2_cp.start()

        # ---- Zero ONLY the halo rows (interior rows are fully overwritten) ----------
        for n in range(N):
            b = n * (Ho + 2)
            xin_ref[b:b + 1, :] = jnp.zeros((1, FI), xin_ref.dtype)
            xin_ref[b + Ho + 1:b + Ho + 2, :] = jnp.zeros((1, FI), xin_ref.dtype)
            h1_ref[b:b + 1, :] = jnp.zeros((1, FO), h1_ref.dtype)
            h1_ref[b + Ho + 1:b + Ho + 2, :] = jnp.zeros((1, FO), h1_ref.dtype)

        # ---- Stage 1: bilinear upsample (align_corners=True) + skip concat ----------
        # bf16 operands, f32 accumulation (result is cast to bf16 anyway).
        ah = ah_ref[...]              # (Ho, H)        bf16
        awk = awk_ref[...]            # (W*Cx, Wo*Cx)  bf16 = kron(W-interp, I_Cx)
        for n in range(N):
            b = n * (Ho + 2)
            t = jnp.dot(ah, x_ref[n].astype(jnp.bfloat16),
                        preferred_element_type=jnp.float32)           # (Ho, W*Cx)
            up = jnp.dot(t.astype(jnp.bfloat16), awk,
                         preferred_element_type=jnp.float32)          # (Ho, Wo*Cx)
            if has_skip:
                xin_ref[b + 1:b + 1 + Ho, :SKW] = skip_ref[n].astype(xin_ref.dtype)
                xin_ref[b + 1:b + 1 + Ho, SKW:] = up.astype(xin_ref.dtype)
            else:
                xin_ref[b + 1:b + 1 + Ho, :] = up.astype(xin_ref.dtype)

        # ---- Validity mask for BN stats (inter-image garbage rows excluded) ---------
        row_id = jax.lax.broadcasted_iota(jnp.int32, (ROUT, 1), 0)
        valid = jnp.zeros((ROUT, 1), jnp.bool_)
        for n in range(N):
            lo = n * (Ho + 2)
            valid = jnp.logical_or(valid, (row_id >= lo) & (row_id < lo + Ho))
        mask = valid.astype(jnp.float32)                               # (ROUT, 1)

        def conv_bn_relu(src_ref, t_vm, bias_f, gamma_f, beta_f):
            # 3 batched Toeplitz matmuls: the 256-wide RHS is pushed once per dy for ALL
            # images.  Chained accumulate -> MRB in-place accumulation on v7x.
            acc = jnp.dot(src_ref[0:ROUT, :], t_vm[0],
                          preferred_element_type=jnp.float32)          # (ROUT, FO)
            for dy in (1, 2):
                acc = acc + jnp.dot(src_ref[dy:dy + ROUT, :], t_vm[dy],
                                    preferred_element_type=jnp.float32)
            acc = acc + bias_f
            # Single-pass BN statistics over valid rows only.
            # TODO(synk): at production magnitudes prefer centered/two-pass variance.
            masked = acc * mask
            rs = jnp.sum(masked, axis=0, keepdims=True)                # (1, FO)
            rss = jnp.sum(masked * acc, axis=0, keepdims=True)         # (1, FO)
            sum_c = jnp.dot(rs, r_ref[...], preferred_element_type=jnp.float32)   # (1, Cout)
            sq_c = jnp.dot(rss, r_ref[...], preferred_element_type=jnp.float32)
            mean_c = sum_c * inv_cnt
            var_c = jnp.maximum(sq_c * inv_cnt - mean_c * mean_c, 0.0)  # biased var (PyTorch)
            mean_f = jnp.dot(mean_c, rt_ref[...], preferred_element_type=jnp.float32)
            var_f = jnp.dot(var_c, rt_ref[...], preferred_element_type=jnp.float32)
            scale_f = gamma_f * jax.lax.rsqrt(var_f + eps)
            shift_f = beta_f - mean_f * scale_f
            return jnp.maximum(acc * scale_f + shift_f, 0.0)            # (ROUT, FO) f32

        # ---- Stage 2: conv1 + BN + ReLU -> halo-padded bf16 scratch ------------------
        t1_cp.wait()
        y1 = conv_bn_relu(xin_ref, t1_vm, b1_ref[...], g1_ref[...], bt1_ref[...])
        for n in range(N):
            b = n * (Ho + 2)
            h1_ref[b + 1:b + 1 + Ho, :] = y1[b:b + Ho, :].astype(h1_ref.dtype)

        # ---- Stage 3: conv2 + BN + ReLU -> lane-dense output store -------------------
        t2_cp.wait()
        y2 = conv_bn_relu(h1_ref, t2_vm, b2_ref[...], g2_ref[...], bt2_ref[...])
        for n in range(N):
            b = n * (Ho + 2)
            o_ref[n] = y2[b:b + Ho, :].astype(o_ref.dtype)

    return kernel


_IMAPS = {1: (lambda i: (0,)), 2: (lambda i: (0, 0)),
          3: (lambda i: (0, 0, 0)), 4: (lambda i: (0, 0, 0, 0))}


def _full_spec(shape):
    return pl.BlockSpec(shape, _IMAPS[len(shape)])


def _vmem_limit_bytes(need_bytes):
    """Per-generation VMEM budget: requested usage (with slack), clamped to capacity."""
    try:
        cap = int(pltpu.get_tpu_info().vmem_capacity_bytes)
    except Exception:
        cap = 64 * 1024 * 1024      # conservative (v7x per-core)
    want = max(16 * 1024 * 1024, 2 * int(need_bytes) + (8 << 20))
    return min(want, int(cap * 0.9))


# ----------------------------------------------------------------------------
# Module wrapper
# ----------------------------------------------------------------------------
@partial(jax.jit, static_argnames=("channels_last",))
def trans_unet_decoder_unit(x_nchw, x_skip_nchw, params, channels_last=False):
    N, Cx, H, W = x_nchw.shape
    Ho, Wo = 2 * H, 2 * W
    Cout = params["w1"].shape[-1]
    has_skip = x_skip_nchw is not None
    Cs = x_skip_nchw.shape[1] if has_skip else 0
    Cin = Cs + Cx
    FI, FO, SKW = Wo * Cin, Wo * Cout, Wo * Cs
    RP = N * (Ho + 2)

    # NCHW -> NHWC with (W, C) fused onto the lane axis (reshapes are free, transposes tiny).
    x_f = jnp.transpose(x_nchw, (0, 2, 3, 1)).reshape(N, H, W * Cx)
    inputs = [x_f]
    specs = [_full_spec(x_f.shape)]
    if has_skip:
        skip_f = jnp.transpose(x_skip_nchw, (0, 2, 3, 1)).reshape(N, Ho, Wo * Cs)
        inputs.append(skip_f)
        specs.append(_full_spec(skip_f.shape))

    # Interpolation matrices (bf16 operands for the MXU; accumulation stays f32 in-kernel).
    ah = interp_matrix(Ho, H).astype(jnp.bfloat16)                                   # (Ho, H)
    awk = jnp.kron(interp_matrix(Wo, W).T,
                   jnp.eye(Cx, dtype=jnp.float32)).astype(jnp.bfloat16)              # (W*Cx, Wo*Cx)
    inputs += [ah, awk]
    specs += [_full_spec(ah.shape), _full_spec(awk.shape)]

    # Fused-input column bookkeeping for conv1: skip channels first (torch.cat order).
    if has_skip:
        k_s = jnp.arange(SKW)
        k_u = jnp.arange(Wo * Cx)
        kw1 = jnp.concatenate([k_s // Cs, k_u // Cx])
        kci1 = jnp.concatenate([k_s % Cs, Cs + (k_u % Cx)])
    else:
        k_u = jnp.arange(Wo * Cx)
        kw1, kci1 = k_u // Cx, k_u % Cx
    k2 = jnp.arange(FO)
    kw2, kci2 = k2 // Cout, k2 % Cout

    t1 = _toeplitz_from_conv(params["w1"], kw1, kci1, Wo, Cout)   # (3, FI, FO) bf16
    t2 = _toeplitz_from_conv(params["w2"], kw2, kci2, Wo, Cout)   # (3, FO, FO) bf16
    # Toeplitz slabs stay in HBM (pl.ANY) and are DMA'd manually so they overlap Stage 1.
    inputs += [t1, t2]
    specs += [pl.BlockSpec(memory_space=pl.ANY), pl.BlockSpec(memory_space=pl.ANY)]

    # Channel selector matrices: reduce fused lanes -> per-channel, and broadcast back.
    ch = jnp.arange(FO) % Cout
    r_sel = (ch[:, None] == jnp.arange(Cout)[None, :]).astype(jnp.float32)   # (FO, Cout)
    rt_sel = r_sel.T                                                         # (Cout, FO)

    tile = lambda v: jnp.tile(v.reshape(1, Cout), (1, Wo))                   # (1, FO)
    b1f, g1f, bt1f = tile(params["b1"]), tile(params["g1"]), tile(params["beta1"])
    b2f, g2f, bt2f = tile(params["b2"]), tile(params["g2"]), tile(params["beta2"])

    small = [r_sel, rt_sel, b1f, g1f, bt1f, b2f, g2f, bt2f]
    inputs += small
    specs += [_full_spec(a.shape) for a in small]

    kernel = _make_decoder_kernel(N, H, W, Cx, Cs, Cout)

    # VMEM budget derived from actual buffer sizes (scratch + VMEM-resident I/O).
    nbytes = lambda a: int(a.size) * jnp.dtype(a.dtype).itemsize
    scratch_bytes = RP * (FI + FO) * 2 + nbytes(t1) + nbytes(t2)
    io_bytes = sum(nbytes(a) for a in inputs if a is not t1 and a is not t2) + N * Ho * FO * 4
    vmem_limit = _vmem_limit_bytes(scratch_bytes + io_bytes)

    out = pl.pallas_call(
        kernel,
        out_shape=jax.ShapeDtypeStruct((N, Ho, FO), jnp.float32),
        grid=(1,),
        in_specs=specs,
        out_specs=_full_spec((N, Ho, FO)),
        scratch_shapes=[
            pltpu.VMEM((RP, FI), jnp.bfloat16),    # flat halo-padded fused conv1 input
            pltpu.VMEM((RP, FO), jnp.bfloat16),    # flat halo-padded conv1 output (conv2 input)
            pltpu.VMEM(t1.shape, jnp.bfloat16),    # conv1 Toeplitz slabs (manual DMA target)
            pltpu.VMEM(t2.shape, jnp.bfloat16),    # conv2 Toeplitz slabs (manual DMA target)
            pltpu.SemaphoreType.DMA((2,)),
        ],
        compiler_params=pltpu.CompilerParams(
            # TODO(synk): add a 'parallel' batch/row-block grid axis + two-phase BN to use
            #             the second TensorCore on v7x.
            dimension_semantics=("arbitrary",),
            vmem_limit_bytes=vmem_limit,
        ),
    )(*inputs)

    out_nhwc = out.reshape(N, Ho, Wo, Cout)
    if channels_last:
        # Lane-dense NHWC output: no extra HBM pass; preferred when chaining decoder stages.
        return out_nhwc
    return jnp.transpose(out_nhwc, (0, 3, 1, 2))   # NCHW for PyTorch-module parity


def init_params(key, in_channels, out_channels):
    ks = jax.random.split(key, 8)
    p = {}
    # PyTorch weight layout (Cout, Cin, 3, 3) -> kernel layout (kh, kw, Cin, Cout)
    w1 = 0.1 * jax.random.normal(ks[0], (out_channels, in_channels, 3, 3), jnp.float32)
    w2 = 0.1 * jax.random.normal(ks[1], (out_channels, out_channels, 3, 3), jnp.float32)
    p["w1"] = jnp.transpose(w1, (2, 3, 1, 0))
    p["w2"] = jnp.transpose(w2, (2, 3, 1, 0))
    p["b1"] = 0.1 * jax.random.normal(ks[2], (1, out_channels), jnp.float32)
    p["b2"] = 0.1 * jax.random.normal(ks[3], (1, out_channels), jnp.float32)
    p["g1"] = 1.0 + 0.1 * jax.random.normal(ks[4], (1, out_channels), jnp.float32)
    p["g2"] = 1.0 + 0.1 * jax.random.normal(ks[5], (1, out_channels), jnp.float32)
    p["beta1"] = 0.1 * jax.random.normal(ks[6], (1, out_channels), jnp.float32)
    p["beta2"] = 0.1 * jax.random.normal(ks[7], (1, out_channels), jnp.float32)
    return p


if __name__ == "__main__":
    key = jax.random.PRNGKey(0)
    k_x, k_skip = jax.random.split(key)

    N, C_x, H, W = 2, 4, 16, 16
    C_skip = 4
    in_channels = C_x + C_skip      # channels seen by conv1 (after concat)
    out_channels = 8

    x = jax.random.normal(k_x, (N, C_x, H, W), jnp.float32)
    x_skip = jax.random.normal(k_skip, (N, C_skip, 2 * H, 2 * W), jnp.float32)

    params = init_params(jax.random.PRNGKey(42), in_channels, out_channels)

    out = trans_unet_decoder_unit(x, x_skip, params)
    out = jax.block_until_ready(out)

    assert out.shape == (N, out_channels, 2 * H, 2 * W), out.shape
    assert out.dtype == jnp.float32
    print("KERNEL_OK")
</pallas_src>

<mosaic_0001>
module attributes {stable_mosaic.version = 11 : i64} {
  func.func private @main(%arg0: i32) attributes {dimension_semantics = [#tpu.dimension_semantics<core_parallel>], iteration_bounds = array<i64: 2>, tpu.core_type = #tpu.core_type<sc_scalar_subcore>, window_params = []} {
    return
  }
}

module attributes {stable_mosaic.version = 11 : i64} {
  func.func private @main(%arg0: i32) attributes {dimension_semantics = [#tpu.dimension_semantics<core_parallel>], iteration_bounds = array<i64: 2>, tpu.core_type = #tpu.core_type<sc_scalar_subcore>, window_params = []} {
    return
  }
}

module attributes {stable_mosaic.version = 11 : i64} {
  func.func @kernel(%arg0: i32, %arg1: memref<2x16x64xf32, #tpu.memory_space<vmem>>, %arg2: memref<2x32x128xf32, #tpu.memory_space<vmem>>, %arg3: memref<32x16xbf16, #tpu.memory_space<vmem>>, %arg4: memref<64x128xbf16, #tpu.memory_space<vmem>>, %arg5: memref<3x256x256xbf16, #tpu.memory_space<any>>, %arg6: memref<3x256x256xbf16, #tpu.memory_space<any>>, %arg7: memref<256x8xf32, #tpu.memory_space<vmem>>, %arg8: memref<8x256xf32, #tpu.memory_space<vmem>>, %arg9: memref<1x256xf32, #tpu.memory_space<vmem>>, %arg10: memref<1x256xf32, #tpu.memory_space<vmem>>, %arg11: memref<1x256xf32, #tpu.memory_space<vmem>>, %arg12: memref<1x256xf32, #tpu.memory_space<vmem>>, %arg13: memref<1x256xf32, #tpu.memory_space<vmem>>, %arg14: memref<1x256xf32, #tpu.memory_space<vmem>>, %arg15: memref<2x32x256xf32, #tpu.memory_space<vmem>>, %arg16: memref<68x256xbf16, #tpu.memory_space<vmem>>, %arg17: memref<68x256xbf16, #tpu.memory_space<vmem>>, %arg18: memref<3x256x256xbf16, #tpu.memory_space<vmem>>, %arg19: memref<3x256x256xbf16, #tpu.memory_space<vmem>>, %arg20: memref<2x!tpu.dma_semaphore, #tpu.memory_space<semaphore_mem>>) attributes {dimension_semantics = [#tpu.dimension_semantics<arbitrary>], iteration_bounds = array<i64: 1>, scalar_prefetch = 0 : i64, scratch_operands = 5 : i64, tpu.core_type = #tpu.core_type<tc>, window_params = [{pipeline_mode = #tpu.pipeline_mode<synchronous>, transform_indices = @transform_0, window_bounds = array<i64: 2, 16, 64>}, {pipeline_mode = #tpu.pipeline_mode<synchronous>, transform_indices = @transform_1, window_bounds = array<i64: 2, 32, 128>}, {pipeline_mode = #tpu.pipeline_mode<synchronous>, transform_indices = @transform_2, window_bounds = array<i64: 32, 16>}, {pipeline_mode = #tpu.pipeline_mode<synchronous>, transform_indices = @transform_3, window_bounds = array<i64: 64, 128>}, {}, {}, {pipeline_mode = #tpu.pipeline_mode<synchronous>, transform_indices = @transform_6, window_bounds = array<i64: 256, 8>}, {pipeline_mode = #tpu.pipeline_mode<synchronous>, transform_indices = @transform_7, window_bounds = array<i64: 8, 256>}, {pipeline_mode = #tpu.pipeline_mode<synchronous>, transform_indices = @transform_8, window_bounds = array<i64: 1, 256>}, {pipeline_mode = #tpu.pipeline_mode<synchronous>, transform_indices = @transform_9, window_bounds = array<i64: 1, 256>}, {pipeline_mode = #tpu.pipeline_mode<synchronous>, transform_indices = @transform_10, window_bounds = array<i64: 1, 256>}, {pipeline_mode = #tpu.pipeline_mode<synchronous>, transform_indices = @transform_11, window_bounds = array<i64: 1, 256>}, {pipeline_mode = #tpu.pipeline_mode<synchronous>, transform_indices = @transform_12, window_bounds = array<i64: 1, 256>}, {pipeline_mode = #tpu.pipeline_mode<synchronous>, transform_indices = @transform_13, window_bounds = array<i64: 1, 256>}, {pipeline_mode = #tpu.pipeline_mode<synchronous>, transform_indices = @transform_14, window_bounds = array<i64: 2, 32, 256>}]} {
    %c0_i32 = arith.constant 0 : i32
    %0 = tpu.memref_slice %arg20[%c0_i32] : memref<2x!tpu.dma_semaphore, #tpu.memory_space<semaphore_mem>> -> memref<1x!tpu.dma_semaphore, #tpu.memory_space<semaphore_mem>>
    %1 = tpu.memref_squeeze %0 : memref<1x!tpu.dma_semaphore, #tpu.memory_space<semaphore_mem>> -> memref<!tpu.dma_semaphore, #tpu.memory_space<semaphore_mem>>
    tpu.enqueue_dma source(%arg5 : memref<3x256x256xbf16, #tpu.memory_space<any>>) target(%arg18 : memref<3x256x256xbf16, #tpu.memory_space<vmem>>) target_semaphore(%1 : memref<!tpu.dma_semaphore, #tpu.memory_space<semaphore_mem>>)
    %c1_i32 = arith.constant 1 : i32
    %2 = tpu.memref_slice %arg20[%c1_i32] : memref<2x!tpu.dma_semaphore, #tpu.memory_space<semaphore_mem>> -> memref<1x!tpu.dma_semaphore, #tpu.memory_space<semaphore_mem>>
    %3 = tpu.memref_squeeze %2 : memref<1x!tpu.dma_semaphore, #tpu.memory_space<semaphore_mem>> -> memref<!tpu.dma_semaphore, #tpu.memory_space<semaphore_mem>>
    tpu.enqueue_dma source(%arg6 : memref<3x256x256xbf16, #tpu.memory_space<any>>) target(%arg19 : memref<3x256x256xbf16, #tpu.memory_space<vmem>>) target_semaphore(%3 : memref<!tpu.dma_semaphore, #tpu.memory_space<semaphore_mem>>)
    %cst = arith.constant 0.000000e+00 : bf16
    %4 = vector.broadcast %cst : bf16 to vector<1x256xbf16>
    %c0 = arith.constant 0 : index
    %c0_0 = arith.constant 0 : index
    %5 = vector.load %arg16[%c0, %c0_0] : memref<68x256xbf16, #tpu.memory_space<vmem>>, vector<1x256xbf16>
    tpu.vector_store %arg16[%c0, %c0_0], %4 {strides = array<i32>} : memref<68x256xbf16, #tpu.memory_space<vmem>>, vector<1x256xbf16>,
    %cst_1 = arith.constant 0.000000e+00 : bf16
    %6 = vector.broadcast %cst_1 : bf16 to vector<1x256xbf16>
    %c33 = arith.constant 33 : index
    %c0_2 = arith.constant 0 : index
    %7 = vector.load %arg16[%c33, %c0_2] : memref<68x256xbf16, #tpu.memory_space<vmem>>, vector<1x256xbf16>
    tpu.vector_store %arg16[%c33, %c0_2], %6 {strides = array<i32>} : memref<68x256xbf16, #tpu.memory_space<vmem>>, vector<1x256xbf16>,
    %cst_3 = arith.constant 0.000000e+00 : bf16
    %8 = vector.broadcast %cst_3 : bf16 to vector<1x256xbf16>
    %c0_4 = arith.constant 0 : index
    %c0_5 = arith.constant 0 : index
    %9 = vector.load %arg17[%c0_4, %c0_5] : memref<68x256xbf16, #tpu.memory_space<vmem>>, vector<1x256xbf16>
    tpu.vector_store %arg17[%c0_4, %c0_5], %8 {strides = array<i32>} : memref<68x256xbf16, #tpu.memory_space<vmem>>, vector<1x256xbf16>,
    %cst_6 = arith.constant 0.000000e+00 : bf16
    %10 = vector.broadcast %cst_6 : bf16 to vector<1x256xbf16>
    %c33_7 = arith.constant 33 : index
    %c0_8 = arith.constant 0 : index
    %11 = vector.load %arg17[%c33_7, %c0_8] : memref<68x256xbf16, #tpu.memory_space<vmem>>, vector<1x256xbf16>
    tpu.vector_store %arg17[%c33_7, %c0_8], %10 {strides = array<i32>} : memref<68x256xbf16, #tpu.memory_space<vmem>>, vector<1x256xbf16>,
    %cst_9 = arith.constant 0.000000e+00 : bf16
    %12 = vector.broadcast %cst_9 : bf16 to vector<1x256xbf16>
    %c34 = arith.constant 34 : index
    %c0_10 = arith.constant 0 : index
    %13 = vector.load %arg16[%c34, %c0_10] : memref<68x256xbf16, #tpu.memory_space<vmem>>, vector<1x256xbf16>
    tpu.vector_store %arg16[%c34, %c0_10], %12 {strides = array<i32>} : memref<68x256xbf16, #tpu.memory_space<vmem>>, vector<1x256xbf16>,
    %cst_11 = arith.constant 0.000000e+00 : bf16
    %14 = vector.broadcast %cst_11 : bf16 to vector<1x256xbf16>
    %c67 = arith.constant 67 : index
    %c0_12 = arith.constant 0 : index
    %15 = vector.load %arg16[%c67, %c0_12] : memref<68x256xbf16, #tpu.memory_space<vmem>>, vector<1x256xbf16>
    tpu.vector_store %arg16[%c67, %c0_12], %14 {strides = array<i32>} : memref<68x256xbf16, #tpu.memory_space<vmem>>, vector<1x256xbf16>,
    %cst_13 = arith.constant 0.000000e+00 : bf16
    %16 = vector.broadcast %cst_13 : bf16 to vector<1x256xbf16>
    %c34_14 = arith.constant 34 : index
    %c0_15 = arith.constant 0 : index
    %17 = vector.load %arg17[%c34_14, %c0_15] : memref<68x256xbf16, #tpu.memory_space<vmem>>, vector<1x256xbf16>
    tpu.vector_store %arg17[%c34_14, %c0_15], %16 {strides = array<i32>} : memref<68x256xbf16, #tpu.memory_space<vmem>>, vector<1x256xbf16>,
    %cst_16 = arith.constant 0.000000e+00 : bf16
    %18 = vector.broadcast %cst_16 : bf16 to vector<1x256xbf16>
    %c67_17 = arith.constant 67 : index
    %c0_18 = arith.constant 0 : index
    %19 = vector.load %arg17[%c67_17, %c0_18] : memref<68x256xbf16, #tpu.memory_space<vmem>>, vector<1x256xbf16>
    tpu.vector_store %arg17[%c67_17, %c0_18], %18 {strides = array<i32>} : memref<68x256xbf16, #tpu.memory_space<vmem>>, vector<1x256xbf16>,
    %c0_19 = arith.constant 0 : index
    %c0_20 = arith.constant 0 : index
    %20 = vector.load %arg3[%c0_19, %c0_20] : memref<32x16xbf16, #tpu.memory_space<vmem>>, vector<32x16xbf16>
    %c0_21 = arith.constant 0 : index
    %c0_22 = arith.constant 0 : index
    %21 = vector.load %arg4[%c0_21, %c0_22] : memref<64x128xbf16, #tpu.memory_space<vmem>>, vector<64x128xbf16>
    %c0_23 = arith.constant 0 : index
    %c0_24 = arith.constant 0 : index
    %c0_25 = arith.constant 0 : index
    %22 = vector.load %arg1[%c0_23, %c0_24, %c0_25] : memref<2x16x64xf32, #tpu.memory_space<vmem>>, vector<1x16x64xf32>
    %23 = vector.shape_cast %22 : vector<1x16x64xf32> to vector<16x64xf32>
    %24 = arith.truncf %23 : vector<16x64xf32> to vector<16x64xbf16>
    %cst_26 = arith.constant dense<0.000000e+00> : vector<32x64xf32>
    %25 = tpu.matmul %20, %24, %cst_26 {dimension_numbers = #tpu.dot_dimension_numbers<[1], [0], [0], [1], [0, 0, 1, 1], [], []>} : vector<32x16xbf16>, vector<16x64xbf16>, vector<32x64xf32> -> vector<32x64xf32>
    %26 = arith.truncf %25 : vector<32x64xf32> to vector<32x64xbf16>
    %cst_27 = arith.constant dense<0.000000e+00> : vector<32x128xf32>
    %27 = tpu.matmul %26, %21, %cst_27 {dimension_numbers = #tpu.dot_dimension_numbers<[1], [0], [0], [1], [0, 0, 1, 1], [], []>} : vector<32x64xbf16>, vector<64x128xbf16>, vector<32x128xf32> -> vector<32x128xf32>
    %c0_28 = arith.constant 0 : index
    %c0_29 = arith.constant 0 : index
    %c0_30 = arith.constant 0 : index
    %28 = vector.load %arg2[%c0_28, %c0_29, %c0_30] : memref<2x32x128xf32, #tpu.memory_space<vmem>>, vector<1x32x128xf32>
    %29 = vector.shape_cast %28 : vector<1x32x128xf32> to vector<32x128xf32>
    %30 = arith.truncf %29 : vector<32x128xf32> to vector<32x128xbf16>
    %c1 = arith.constant 1 : index
    %c0_31 = arith.constant 0 : index
    %31 = vector.load %arg16[%c1, %c0_31] : memref<68x256xbf16, #tpu.memory_space<vmem>>, vector<32x128xbf16>
    tpu.vector_store %arg16[%c1, %c0_31], %30 {strides = array<i32>} : memref<68x256xbf16, #tpu.memory_space<vmem>>, vector<32x128xbf16>,
    %32 = arith.truncf %27 : vector<32x128xf32> to vector<32x128xbf16>
    %c1_32 = arith.constant 1 : index
    %c128 = arith.constant 128 : index
    %33 = vector.load %arg16[%c1_32, %c128] : memref<68x256xbf16, #tpu.memory_space<vmem>>, vector<32x128xbf16>
    tpu.vector_store %arg16[%c1_32, %c128], %32 {strides = array<i32>} : memref<68x256xbf16, #tpu.memory_space<vmem>>, vector<32x128xbf16>,
    %c1_33 = arith.constant 1 : index
    %c0_34 = arith.constant 0 : index
    %c0_35 = arith.constant 0 : index
    %34 = vector.load %arg1[%c1_33, %c0_34, %c0_35] : memref<2x16x64xf32, #tpu.memory_space<vmem>>, vector<1x16x64xf32>
    %35 = vector.shape_cast %34 : vector<1x16x64xf32> to vector<16x64xf32>
    %36 = arith.truncf %35 : vector<16x64xf32> to vector<16x64xbf16>
    %cst_36 = arith.constant dense<0.000000e+00> : vector<32x64xf32>
    %37 = tpu.matmul %20, %36, %cst_36 {dimension_numbers = #tpu.dot_dimension_numbers<[1], [0], [0], [1], [0, 0, 1, 1], [], []>} : vector<32x16xbf16>, vector<16x64xbf16>, vector<32x64xf32> -> vector<32x64xf32>
    %38 = arith.truncf %37 : vector<32x64xf32> to vector<32x64xbf16>
    %cst_37 = arith.constant dense<0.000000e+00> : vector<32x128xf32>
    %39 = tpu.matmul %38, %21, %cst_37 {dimension_numbers = #tpu.dot_dimension_numbers<[1], [0], [0], [1], [0, 0, 1, 1], [], []>} : vector<32x64xbf16>, vector<64x128xbf16>, vector<32x128xf32> -> vector<32x128xf32>
    %c1_38 = arith.constant 1 : index
    %c0_39 = arith.constant 0 : index
    %c0_40 = arith.constant 0 : index
    %40 = vector.load %arg2[%c1_38, %c0_39, %c0_40] : memref<2x32x128xf32, #tpu.memory_space<vmem>>, vector<1x32x128xf32>
    %41 = vector.shape_cast %40 : vector<1x32x128xf32> to vector<32x128xf32>
    %42 = arith.truncf %41 : vector<32x128xf32> to vector<32x128xbf16>
    %c35 = arith.constant 35 : index
    %c0_41 = arith.constant 0 : index
    %43 = vector.load %arg16[%c35, %c0_41] : memref<68x256xbf16, #tpu.memory_space<vmem>>, vector<32x128xbf16>
    tpu.vector_store %arg16[%c35, %c0_41], %42 {strides = array<i32>} : memref<68x256xbf16, #tpu.memory_space<vmem>>, vector<32x128xbf16>,
    %44 = arith.truncf %39 : vector<32x128xf32> to vector<32x128xbf16>
    %c35_42 = arith.constant 35 : index
    %c128_43 = arith.constant 128 : index
    %45 = vector.load %arg16[%c35_42, %c128_43] : memref<68x256xbf16, #tpu.memory_space<vmem>>, vector<32x128xbf16>
    tpu.vector_store %arg16[%c35_42, %c128_43], %44 {strides = array<i32>} : memref<68x256xbf16, #tpu.memory_space<vmem>>, vector<32x128xbf16>,
    %46 = tpu.iota {dimensions = array<i32: 0>} : vector<66x1xi32>
    %false = arith.constant false
    %47 = vector.broadcast %false : i1 to vector<66x1xi1>
    %c0_i32_44 = arith.constant 0 : i32
    %48 = vector.broadcast %c0_i32_44 : i32 to vector<66x1xi32>
    %49 = arith.cmpi sge, %46, %48 : vector<66x1xi32>
    %c32_i32 = arith.constant 32 : i32
    %50 = vector.broadcast %c32_i32 : i32 to vector<66x1xi32>
    %51 = arith.cmpi slt, %46, %50 : vector<66x1xi32>
    %52 = arith.andi %49, %51 : vector<66x1xi1>
    %53 = arith.ori %47, %52 : vector<66x1xi1>
    %c34_i32 = arith.constant 34 : i32
    %54 = vector.broadcast %c34_i32 : i32 to vector<66x1xi32>
    %55 = arith.cmpi sge, %46, %54 : vector<66x1xi32>
    %c66_i32 = arith.constant 66 : i32
    %56 = vector.broadcast %c66_i32 : i32 to vector<66x1xi32>
    %57 = arith.cmpi slt, %46, %56 : vector<66x1xi32>
    %58 = arith.andi %55, %57 : vector<66x1xi1>
    %59 = arith.ori %53, %58 : vector<66x1xi1>
    %60 = arith.extui %59 : vector<66x1xi1> to vector<66x1xi32>
    %61 = arith.sitofp %60 : vector<66x1xi32> to vector<66x1xf32>
    %c0_i32_45 = arith.constant 0 : i32
    %62 = tpu.memref_slice %arg20[%c0_i32_45] : memref<2x!tpu.dma_semaphore, #tpu.memory_space<semaphore_mem>> -> memref<1x!tpu.dma_semaphore, #tpu.memory_space<semaphore_mem>>
    %63 = tpu.memref_squeeze %62 : memref<1x!tpu.dma_semaphore, #tpu.memory_space<semaphore_mem>> -> memref<!tpu.dma_semaphore, #tpu.memory_space<semaphore_mem>>
    tpu.wait_dma2 semaphore(%63 : memref<!tpu.dma_semaphore, #tpu.memory_space<semaphore_mem>>) src(%arg5 : memref<3x256x256xbf16, #tpu.memory_space<any>>) dst(%arg18 : memref<3x256x256xbf16, #tpu.memory_space<vmem>>)
    %c0_46 = arith.constant 0 : index
    %c0_47 = arith.constant 0 : index
    %64 = vector.load %arg9[%c0_46, %c0_47] : memref<1x256xf32, #tpu.memory_space<vmem>>, vector<1x256xf32>
    %c0_48 = arith.constant 0 : index
    %c0_49 = arith.constant 0 : index
    %65 = vector.load %arg10[%c0_48, %c0_49] : memref<1x256xf32, #tpu.memory_space<vmem>>, vector<1x256xf32>
    %c0_50 = arith.constant 0 : index
    %c0_51 = arith.constant 0 : index
    %66 = vector.load %arg11[%c0_50, %c0_51] : memref<1x256xf32, #tpu.memory_space<vmem>>, vector<1x256xf32>
    %c0_52 = arith.constant 0 : index
    %c0_53 = arith.constant 0 : index
    %67 = vector.load %arg16[%c0_52, %c0_53] : memref<68x256xbf16, #tpu.memory_space<vmem>>, vector<66x256xbf16>
    %c0_54 = arith.constant 0 : index
    %c0_55 = arith.constant 0 : index
    %c0_56 = arith.constant 0 : index
    %68 = vector.load %arg18[%c0_54, %c0_55, %c0_56] : memref<3x256x256xbf16, #tpu.memory_space<vmem>>, vector<1x256x256xbf16>
    %69 = vector.shape_cast %68 : vector<1x256x256xbf16> to vector<256x256xbf16>
    %cst_57 = arith.constant dense<0.000000e+00> : vector<66x256xf32>
    %70 = tpu.matmul %67, %69, %cst_57 {dimension_numbers = #tpu.dot_dimension_numbers<[1], [0], [0], [1], [0, 0, 1, 1], [], []>} : vector<66x256xbf16>, vector<256x256xbf16>, vector<66x256xf32> -> vector<66x256xf32>
    %c1_58 = arith.constant 1 : index
    %c0_59 = arith.constant 0 : index
    %71 = vector.load %arg16[%c1_58, %c0_59] : memref<68x256xbf16, #tpu.memory_space<vmem>>, vector<66x256xbf16>
    %c1_60 = arith.constant 1 : index
    %c0_61 = arith.constant 0 : index
    %c0_62 = arith.constant 0 : index
    %72 = vector.load %arg18[%c1_60, %c0_61, %c0_62] : memref<3x256x256xbf16, #tpu.memory_space<vmem>>, vector<1x256x256xbf16>
    %73 = vector.shape_cast %72 : vector<1x256x256xbf16> to vector<256x256xbf16>
    %cst_63 = arith.constant dense<0.000000e+00> : vector<66x256xf32>
    %74 = tpu.matmul %71, %73, %cst_63 {dimension_numbers = #tpu.dot_dimension_numbers<[1], [0], [0], [1], [0, 0, 1, 1], [], []>} : vector<66x256xbf16>, vector<256x256xbf16>, vector<66x256xf32> -> vector<66x256xf32>
    %75 = arith.addf %70, %74 : vector<66x256xf32>
    %c2 = arith.constant 2 : index
    %c0_64 = arith.constant 0 : index
    %76 = vector.load %arg16[%c2, %c0_64] : memref<68x256xbf16, #tpu.memory_space<vmem>>, vector<66x256xbf16>
    %c2_65 = arith.constant 2 : index
    %c0_66 = arith.constant 0 : index
    %c0_67 = arith.constant 0 : index
    %77 = vector.load %arg18[%c2_65, %c0_66, %c0_67] : memref<3x256x256xbf16, #tpu.memory_space<vmem>>, vector<1x256x256xbf16>
    %78 = vector.shape_cast %77 : vector<1x256x256xbf16> to vector<256x256xbf16>
    %cst_68 = arith.constant dense<0.000000e+00> : vector<66x256xf32>
    %79 = tpu.matmul %76, %78, %cst_68 {dimension_numbers = #tpu.dot_dimension_numbers<[1], [0], [0], [1], [0, 0, 1, 1], [], []>} : vector<66x256xbf16>, vector<256x256xbf16>, vector<66x256xf32> -> vector<66x256xf32>
    %80 = arith.addf %75, %79 : vector<66x256xf32>
    %81 = vector.broadcast %64 : vector<1x256xf32> to vector<66x256xf32>
    %82 = arith.addf %80, %81 : vector<66x256xf32>
    %83 = vector.broadcast %61 : vector<66x1xf32> to vector<66x256xf32>
    %84 = arith.mulf %82, %83 : vector<66x256xf32>
    %cst_69 = arith.constant dense<0.000000e+00> : vector<256xf32>
    %85 = vector.multi_reduction <add>, %84, %cst_69 [0] : vector<66x256xf32> to vector<256xf32>
    %86 = vector.shape_cast %85 : vector<256xf32> to vector<1x256xf32>
    %87 = arith.mulf %84, %82 : vector<66x256xf32>
    %cst_70 = arith.constant dense<0.000000e+00> : vector<256xf32>
    %88 = vector.multi_reduction <add>, %87, %cst_70 [0] : vector<66x256xf32> to vector<256xf32>
    %89 = vector.shape_cast %88 : vector<256xf32> to vector<1x256xf32>
    %c0_71 = arith.constant 0 : index
    %c0_72 = arith.constant 0 : index
    %90 = vector.load %arg7[%c0_71, %c0_72] : memref<256x8xf32, #tpu.memory_space<vmem>>, vector<256x8xf32>
    %cst_73 = arith.constant dense<0.000000e+00> : vector<1x8xf32>
    %91 = tpu.matmul %86, %90, %cst_73 {dimension_numbers = #tpu.dot_dimension_numbers<[1], [0], [0], [1], [0, 0, 1, 1], [], []>} : vector<1x256xf32>, vector<256x8xf32>, vector<1x8xf32> -> vector<1x8xf32>
    %c0_74 = arith.constant 0 : index
    %c0_75 = arith.constant 0 : index
    %92 = vector.load %arg7[%c0_74, %c0_75] : memref<256x8xf32, #tpu.memory_space<vmem>>, vector<256x8xf32>
    %cst_76 = arith.constant dense<0.000000e+00> : vector<1x8xf32>
    %93 = tpu.matmul %89, %92, %cst_76 {dimension_numbers = #tpu.dot_dimension_numbers<[1], [0], [0], [1], [0, 0, 1, 1], [], []>} : vector<1x256xf32>, vector<256x8xf32>, vector<1x8xf32> -> vector<1x8xf32>
    %cst_77 = arith.constant 4.8828125E-4 : f32
    %94 = vector.broadcast %cst_77 : f32 to vector<1x8xf32>
    %95 = arith.mulf %91, %94 : vector<1x8xf32>
    %cst_78 = arith.constant 4.8828125E-4 : f32
    %96 = vector.broadcast %cst_78 : f32 to vector<1x8xf32>
    %97 = arith.mulf %93, %96 : vector<1x8xf32>
    %98 = arith.mulf %95, %95 : vector<1x8xf32>
    %99 = arith.subf %97, %98 : vector<1x8xf32>
    %cst_79 = arith.constant 0.000000e+00 : f32
    %100 = vector.broadcast %cst_79 : f32 to vector<1x8xf32>
    %101 = arith.maximumf %99, %100 : vector<1x8xf32>
    %c0_80 = arith.constant 0 : index
    %c0_81 = arith.constant 0 : index
    %102 = vector.load %arg8[%c0_80, %c0_81] : memref<8x256xf32, #tpu.memory_space<vmem>>, vector<8x256xf32>
    %cst_82 = arith.constant dense<0.000000e+00> : vector<1x256xf32>
    %103 = tpu.matmul %95, %102, %cst_82 {dimension_numbers = #tpu.dot_dimension_numbers<[1], [0], [0], [1], [0, 0, 1, 1], [], []>} : vector<1x8xf32>, vector<8x256xf32>, vector<1x256xf32> -> vector<1x256xf32>
    %c0_83 = arith.constant 0 : index
    %c0_84 = arith.constant 0 : index
    %104 = vector.load %arg8[%c0_83, %c0_84] : memref<8x256xf32, #tpu.memory_space<vmem>>, vector<8x256xf32>
    %cst_85 = arith.constant dense<0.000000e+00> : vector<1x256xf32>
    %105 = tpu.matmul %101, %104, %cst_85 {dimension_numbers = #tpu.dot_dimension_numbers<[1], [0], [0], [1], [0, 0, 1, 1], [], []>} : vector<1x8xf32>, vector<8x256xf32>, vector<1x256xf32> -> vector<1x256xf32>
    %cst_86 = arith.constant 9.99999974E-6 : f32
    %106 = vector.broadcast %cst_86 : f32 to vector<1x256xf32>
    %107 = arith.addf %105, %106 : vector<1x256xf32>
    %108 = math.rsqrt %107 : vector<1x256xf32>
    %109 = arith.mulf %65, %108 : vector<1x256xf32>
    %110 = arith.mulf %103, %109 : vector<1x256xf32>
    %111 = arith.subf %66, %110 : vector<1x256xf32>
    %112 = vector.broadcast %109 : vector<1x256xf32> to vector<66x256xf32>
    %113 = arith.mulf %82, %112 : vector<66x256xf32>
    %114 = vector.broadcast %111 : vector<1x256xf32> to vector<66x256xf32>
    %115 = arith.addf %113, %114 : vector<66x256xf32>
    %cst_87 = arith.constant 0.000000e+00 : f32
    %116 = vector.broadcast %cst_87 : f32 to vector<66x256xf32>
    %117 = arith.maximumf %115, %116 : vector<66x256xf32>
    %118 = vector.extract_strided_slice %117 {offsets = [0, 0], sizes = [32, 256], strides = [1, 1]} : vector<66x256xf32> to vector<32x256xf32>
    %119 = arith.truncf %118 : vector<32x256xf32> to vector<32x256xbf16>
    %c1_88 = arith.constant 1 : index
    %c0_89 = arith.constant 0 : index
    %120 = vector.load %arg17[%c1_88, %c0_89] : memref<68x256xbf16, #tpu.memory_space<vmem>>, vector<32x256xbf16>
    tpu.vector_store %arg17[%c1_88, %c0_89], %119 {strides = array<i32>} : memref<68x256xbf16, #tpu.memory_space<vmem>>, vector<32x256xbf16>,
    %121 = vector.extract_strided_slice %117 {offsets = [34, 0], sizes = [32, 256], strides = [1, 1]} : vector<66x256xf32> to vector<32x256xf32>
    %122 = arith.truncf %121 : vector<32x256xf32> to vector<32x256xbf16>
    %c35_90 = arith.constant 35 : index
    %c0_91 = arith.constant 0 : index
    %123 = vector.load %arg17[%c35_90, %c0_91] : memref<68x256xbf16, #tpu.memory_space<vmem>>, vector<32x256xbf16>
    tpu.vector_store %arg17[%c35_90, %c0_91], %122 {strides = array<i32>} : memref<68x256xbf16, #tpu.memory_space<vmem>>, vector<32x256xbf16>,
    %c1_i32_92 = arith.constant 1 : i32
    %124 = tpu.memref_slice %arg20[%c1_i32_92] : memref<2x!tpu.dma_semaphore, #tpu.memory_space<semaphore_mem>> -> memref<1x!tpu.dma_semaphore, #tpu.memory_space<semaphore_mem>>
    %125 = tpu.memref_squeeze %124 : memref<1x!tpu.dma_semaphore, #tpu.memory_space<semaphore_mem>> -> memref<!tpu.dma_semaphore, #tpu.memory_space<semaphore_mem>>
    tpu.wait_dma2 semaphore(%125 : memref<!tpu.dma_semaphore, #tpu.memory_space<semaphore_mem>>) src(%arg6 : memref<3x256x256xbf16, #tpu.memory_space<any>>) dst(%arg19 : memref<3x256x256xbf16, #tpu.memory_space<vmem>>)
    %c0_93 = arith.constant 0 : index
    %c0_94 = arith.constant 0 : index
    %126 = vector.load %arg12[%c0_93, %c0_94] : memref<1x256xf32, #tpu.memory_space<vmem>>, vector<1x256xf32>
    %c0_95 = arith.constant 0 : index
    %c0_96 = arith.constant 0 : index
    %127 = vector.load %arg13[%c0_95, %c0_96] : memref<1x256xf32, #tpu.memory_space<vmem>>, vector<1x256xf32>
    %c0_97 = arith.constant 0 : index
    %c0_98 = arith.constant 0 : index
    %128 = vector.load %arg14[%c0_97, %c0_98] : memref<1x256xf32, #tpu.memory_space<vmem>>, vector<1x256xf32>
    %c0_99 = arith.constant 0 : index
    %c0_100 = arith.constant 0 : index
    %129 = vector.load %arg17[%c0_99, %c0_100] : memref<68x256xbf16, #tpu.memory_space<vmem>>, vector<66x256xbf16>
    %c0_101 = arith.constant 0 : index
    %c0_102 = arith.constant 0 : index
    %c0_103 = arith.constant 0 : index
    %130 = vector.load %arg19[%c0_101, %c0_102, %c0_103] : memref<3x256x256xbf16, #tpu.memory_space<vmem>>, vector<1x256x256xbf16>
    %131 = vector.shape_cast %130 : vector<1x256x256xbf16> to vector<256x256xbf16>
    %cst_104 = arith.constant dense<0.000000e+00> : vector<66x256xf32>
    %132 = tpu.matmul %129, %131, %cst_104 {dimension_numbers = #tpu.dot_dimension_numbers<[1], [0], [0], [1], [0, 0, 1, 1], [], []>} : vector<66x256xbf16>, vector<256x256xbf16>, vector<66x256xf32> -> vector<66x256xf32>
    %c1_105 = arith.constant 1 : index
    %c0_106 = arith.constant 0 : index
    %133 = vector.load %arg17[%c1_105, %c0_106] : memref<68x256xbf16, #tpu.memory_space<vmem>>, vector<66x256xbf16>
    %c1_107 = arith.constant 1 : index
    %c0_108 = arith.constant 0 : index
    %c0_109 = arith.constant 0 : index
    %134 = vector.load %arg19[%c1_107, %c0_108, %c0_109] : memref<3x256x256xbf16, #tpu.memory_space<vmem>>, vector<1x256x256xbf16>
    %135 = vector.shape_cast %134 : vector<1x256x256xbf16> to vector<256x256xbf16>
    %cst_110 = arith.constant dense<0.000000e+00> : vector<66x256xf32>
    %136 = tpu.matmul %133, %135, %cst_110 {dimension_numbers = #tpu.dot_dimension_numbers<[1], [0], [0], [1], [0, 0, 1, 1], [], []>} : vector<66x256xbf16>, vector<256x256xbf16>, vector<66x256xf32> -> vector<66x256xf32>
    %137 = arith.addf %132, %136 : vector<66x256xf32>
    %c2_111 = arith.constant 2 : index
    %c0_112 = arith.constant 0 : index
    %138 = vector.load %arg17[%c2_111, %c0_112] : memref<68x256xbf16, #tpu.memory_space<vmem>>, vector<66x256xbf16>
    %c2_113 = arith.constant 2 : index
    %c0_114 = arith.constant 0 : index
    %c0_115 = arith.constant 0 : index
    %139 = vector.load %arg19[%c2_113, %c0_114, %c0_115] : memref<3x256x256xbf16, #tpu.memory_space<vmem>>, vector<1x256x256xbf16>
    %140 = vector.shape_cast %139 : vector<1x256x256xbf16> to vector<256x256xbf16>
    %cst_116 = arith.constant dense<0.000000e+00> : vector<66x256xf32>
    %141 = tpu.matmul %138, %140, %cst_116 {dimension_numbers = #tpu.dot_dimension_numbers<[1], [0], [0], [1], [0, 0, 1, 1], [], []>} : vector<66x256xbf16>, vector<256x256xbf16>, vector<66x256xf32> -> vector<66x256xf32>
    %142 = arith.addf %137, %141 : vector<66x256xf32>
    %143 = vector.broadcast %126 : vector<1x256xf32> to vector<66x256xf32>
    %144 = arith.addf %142, %143 : vector<66x256xf32>
    %145 = vector.broadcast %61 : vector<66x1xf32> to vector<66x256xf32>
    %146 = arith.mulf %144, %145 : vector<66x256xf32>
    %cst_117 = arith.constant dense<0.000000e+00> : vector<256xf32>
    %147 = vector.multi_reduction <add>, %146, %cst_117 [0] : vector<66x256xf32> to vector<256xf32>
    %148 = vector.shape_cast %147 : vector<256xf32> to vector<1x256xf32>
    %149 = arith.mulf %146, %144 : vector<66x256xf32>
    %cst_118 = arith.constant dense<0.000000e+00> : vector<256xf32>
    %150 = vector.multi_reduction <add>, %149, %cst_118 [0] : vector<66x256xf32> to vector<256xf32>
    %151 = vector.shape_cast %150 : vector<256xf32> to vector<1x256xf32>
    %c0_119 = arith.constant 0 : index
    %c0_120 = arith.constant 0 : index
    %152 = vector.load %arg7[%c0_119, %c0_120] : memref<256x8xf32, #tpu.memory_space<vmem>>, vector<256x8xf32>
    %cst_121 = arith.constant dense<0.000000e+00> : vector<1x8xf32>
    %153 = tpu.matmul %148, %152, %cst_121 {dimension_numbers = #tpu.dot_dimension_numbers<[1], [0], [0], [1], [0, 0, 1, 1], [], []>} : vector<1x256xf32>, vector<256x8xf32>, vector<1x8xf32> -> vector<1x8xf32>
    %c0_122 = arith.constant 0 : index
    %c0_123 = arith.constant 0 : index
    %154 = vector.load %arg7[%c0_122, %c0_123] : memref<256x8xf32, #tpu.memory_space<vmem>>, vector<256x8xf32>
    %cst_124 = arith.constant dense<0.000000e+00> : vector<1x8xf32>
    %155 = tpu.matmul %151, %154, %cst_124 {dimension_numbers = #tpu.dot_dimension_numbers<[1], [0], [0], [1], [0, 0, 1, 1], [], []>} : vector<1x256xf32>, vector<256x8xf32>, vector<1x8xf32> -> vector<1x8xf32>
    %cst_125 = arith.constant 4.8828125E-4 : f32
    %156 = vector.broadcast %cst_125 : f32 to vector<1x8xf32>
    %157 = arith.mulf %153, %156 : vector<1x8xf32>
    %cst_126 = arith.constant 4.8828125E-4 : f32
    %158 = vector.broadcast %cst_126 : f32 to vector<1x8xf32>
    %159 = arith.mulf %155, %158 : vector<1x8xf32>
    %160 = arith.mulf %157, %157 : vector<1x8xf32>
    %161 = arith.subf %159, %160 : vector<1x8xf32>
    %cst_127 = arith.constant 0.000000e+00 : f32
    %162 = vector.broadcast %cst_127 : f32 to vector<1x8xf32>
    %163 = arith.maximumf %161, %162 : vector<1x8xf32>
    %c0_128 = arith.constant 0 : index
    %c0_129 = arith.constant 0 : index
    %164 = vector.load %arg8[%c0_128, %c0_129] : memref<8x256xf32, #tpu.memory_space<vmem>>, vector<8x256xf32>
    %cst_130 = arith.constant dense<0.000000e+00> : vector<1x256xf32>
    %165 = tpu.matmul %157, %164, %cst_130 {dimension_numbers = #tpu.dot_dimension_numbers<[1], [0], [0], [1], [0, 0, 1, 1], [], []>} : vector<1x8xf32>, vector<8x256xf32>, vector<1x256xf32> -> vector<1x256xf32>
    %c0_131 = arith.constant 0 : index
    %c0_132 = arith.constant 0 : index
    %166 = vector.load %arg8[%c0_131, %c0_132] : memref<8x256xf32, #tpu.memory_space<vmem>>, vector<8x256xf32>
    %cst_133 = arith.constant dense<0.000000e+00> : vector<1x256xf32>
    %167 = tpu.matmul %163, %166, %cst_133 {dimension_numbers = #tpu.dot_dimension_numbers<[1], [0], [0], [1], [0, 0, 1, 1], [], []>} : vector<1x8xf32>, vector<8x256xf32>, vector<1x256xf32> -> vector<1x256xf32>
    %cst_134 = arith.constant 9.99999974E-6 : f32
    %168 = vector.broadcast %cst_134 : f32 to vector<1x256xf32>
    %169 = arith.addf %167, %168 : vector<1x256xf32>
    %170 = math.rsqrt %169 : vector<1x256xf32>
    %171 = arith.mulf %127, %170 : vector<1x256xf32>
    %172 = arith.mulf %165, %171 : vector<1x256xf32>
    %173 = arith.subf %128, %172 : vector<1x256xf32>
    %174 = vector.broadcast %171 : vector<1x256xf32> to vector<66x256xf32>
    %175 = arith.mulf %144, %174 : vector<66x256xf32>
    %176 = vector.broadcast %173 : vector<1x256xf32> to vector<66x256xf32>
    %177 = arith.addf %175, %176 : vector<66x256xf32>
    %cst_135 = arith.constant 0.000000e+00 : f32
    %178 = vector.broadcast %cst_135 : f32 to vector<66x256xf32>
    %179 = arith.maximumf %177, %178 : vector<66x256xf32>
    %180 = vector.extract_strided_slice %179 {offsets = [0, 0], sizes = [32, 256], strides = [1, 1]} : vector<66x256xf32> to vector<32x256xf32>
    %c0_136 = arith.constant 0 : index
    %c0_137 = arith.constant 0 : index
    %c0_138 = arith.constant 0 : index
    %181 = vector.load %arg15[%c0_136, %c0_137, %c0_138] : memref<2x32x256xf32, #tpu.memory_space<vmem>>, vector<1x32x256xf32>
    %182 = vector.shape_cast %181 : vector<1x32x256xf32> to vector<32x256xf32>
    %183 = vector.shape_cast %180 : vector<32x256xf32> to vector<1x32x256xf32>
    tpu.vector_store %arg15[%c0_136, %c0_137, %c0_138], %183 {strides = array<i32>} : memref<2x32x256xf32, #tpu.memory_space<vmem>>, vector<1x32x256xf32>,
    %184 = vector.extract_strided_slice %179 {offsets = [34, 0], sizes = [32, 256], strides = [1, 1]} : vector<66x256xf32> to vector<32x256xf32>
    %c1_139 = arith.constant 1 : index
    %c0_140 = arith.constant 0 : index
    %c0_141 = arith.constant 0 : index
    %185 = vector.load %arg15[%c1_139, %c0_140, %c0_141] : memref<2x32x256xf32, #tpu.memory_space<vmem>>, vector<1x32x256xf32>
    %186 = vector.shape_cast %185 : vector<1x32x256xf32> to vector<32x256xf32>
    %187 = vector.shape_cast %184 : vector<32x256xf32> to vector<1x32x256xf32>
    tpu.vector_store %arg15[%c1_139, %c0_140, %c0_141], %187 {strides = array<i32>} : memref<2x32x256xf32, #tpu.memory_space<vmem>>, vector<1x32x256xf32>,
    return
  }
  func.func @transform_0(%arg0: i32) -> (i32, i32, i32) {
    %c0_i32 = arith.constant 0 : i32
    %c0_i32_0 = arith.constant 0 : i32
    %c0_i32_1 = arith.constant 0 : i32
    %c0_i32_2 = arith.constant 0 : i32
    return %c0_i32, %c0_i32_0, %c0_i32_1 : i32, i32, i32
  }
  func.func @transform_1(%arg0: i32) -> (i32, i32, i32) {
    %c0_i32 = arith.constant 0 : i32
    %c0_i32_0 = arith.constant 0 : i32
    %c0_i32_1 = arith.constant 0 : i32
    %c0_i32_2 = arith.constant 0 : i32
    return %c0_i32, %c0_i32_0, %c0_i32_1 : i32, i32, i32
  }
  func.func @transform_2(%arg0: i32) -> (i32, i32) {
    %c0_i32 = arith.constant 0 : i32
    %c0_i32_0 = arith.constant 0 : i32
    %c0_i32_1 = arith.constant 0 : i32
    return %c0_i32, %c0_i32_0 : i32, i32
  }
  func.func @transform_3(%arg0: i32) -> (i32, i32) {
    %c0_i32 = arith.constant 0 : i32
    %c0_i32_0 = arith.constant 0 : i32
    %c0_i32_1 = arith.constant 0 : i32
    return %c0_i32, %c0_i32_0 : i32, i32
  }
  func.func @transform_6(%arg0: i32) -> (i32, i32) {
    %c0_i32 = arith.constant 0 : i32
    %c0_i32_0 = arith.constant 0 : i32
    %c0_i32_1 = arith.constant 0 : i32
    return %c0_i32, %c0_i32_0 : i32, i32
  }
  func.func @transform_7(%arg0: i32) -> (i32, i32) {
    %c0_i32 = arith.constant 0 : i32
    %c0_i32_0 = arith.constant 0 : i32
    %c0_i32_1 = arith.constant 0 : i32
    return %c0_i32, %c0_i32_0 : i32, i32
  }
  func.func @transform_8(%arg0: i32) -> (i32, i32) {
    %c0_i32 = arith.constant 0 : i32
    %c0_i32_0 = arith.constant 0 : i32
    %c0_i32_1 = arith.constant 0 : i32
    return %c0_i32, %c0_i32_0 : i32, i32
  }
  func.func @transform_9(%arg0: i32) -> (i32, i32) {
    %c0_i32 = arith.constant 0 : i32
    %c0_i32_0 = arith.constant 0 : i32
    %c0_i32_1 = arith.constant 0 : i32
    return %c0_i32, %c0_i32_0 : i32, i32
  }
  func.func @transform_10(%arg0: i32) -> (i32, i32) {
    %c0_i32 = arith.constant 0 : i32
    %c0_i32_0 = arith.constant 0 : i32
    %c0_i32_1 = arith.constant 0 : i32
    return %c0_i32, %c0_i32_0 : i32, i32
  }
  func.func @transform_11(%arg0: i32) -> (i32, i32) {
    %c0_i32 = arith.constant 0 : i32
    %c0_i32_0 = arith.constant 0 : i32
    %c0_i32_1 = arith.constant 0 : i32
    return %c0_i32, %c0_i32_0 : i32, i32
  }
  func.func @transform_12(%arg0: i32) -> (i32, i32) {
    %c0_i32 = arith.constant 0 : i32
    %c0_i32_0 = arith.constant 0 : i32
    %c0_i32_1 = arith.constant 0 : i32
    return %c0_i32, %c0_i32_0 : i32, i32
  }
  func.func @transform_13(%arg0: i32) -> (i32, i32) {
    %c0_i32 = arith.constant 0 : i32
    %c0_i32_0 = arith.constant 0 : i32
    %c0_i32_1 = arith.constant 0 : i32
    return %c0_i32, %c0_i32_0 : i32, i32
  }
  func.func @transform_14(%arg0: i32) -> (i32, i32, i32) {
    %c0_i32 = arith.constant 0 : i32
    %c0_i32_0 = arith.constant 0 : i32
    %c0_i32_1 = arith.constant 0 : i32
    %c0_i32_2 = arith.constant 0 : i32
    return %c0_i32, %c0_i32_0, %c0_i32_1 : i32, i32, i32
  }
}

</mosaic_0001>

<bundles_post_ra>
// kernel: trans_unet_decoder_unit.1
= control target key start
LH: loop header
LB: loop body
LE: loop exit
PB: predicated region body
PF: predicated region fallthrough
CT: control target
= control target key end

     0   :  { %s7984_s0 = inlined_call_operand.vmem [shape: f32[2,16,64], index: 0, kind: input, shape index: {}]   ;;  %s7985_s1 = inlined_call_operand.vmem [shape: f32[2,32,128], index: 1, kind: input, shape index: {}]   ;;  %s7986_s2 = inlined_call_operand.vmem [shape: bf16[32,16], index: 2, kind: input, shape index: {}]   ;;  %s7987_s3 = inlined_call_operand.vmem [shape: bf16[64,128], index: 3, kind: input, shape index: {}]   ;;  %s7988_s4 = inlined_call_operand.vmem [shape: bf16[3,256,256], index: 4, kind: input, shape index: {}]   ;;  %s7989_s5 = inlined_call_operand.vmem [shape: bf16[3,256,256], index: 5, kind: input, shape index: {}]   ;;  %s7990_s6 = inlined_call_operand.vmem [shape: f32[256,8], index: 6, kind: input, shape index: {}]   ;;  %s7991_s7 = inlined_call_operand.vmem [shape: f32[8,256], index: 7, kind: input, shape index: {}]   ;;  %s7992_s8 = inlined_call_operand.vmem [shape: f32[1,256], index: 8, kind: input, shape index: {}]   ;;  %s7993_s9 = inlined_call_operand.vmem [shape: f32[1,256], index: 9, kind: input, shape index: {}]   ;;  %s7994_s10 = inlined_call_operand.vmem [shape: f32[1,256], index: 10, kind: input, shape index: {}]   ;;  %s7995_s11 = inlined_call_operand.vmem [shape: f32[1,256], index: 11, kind: input, shape index: {}]   ;;  %s7996_s12 = inlined_call_operand.vmem [shape: f32[1,256], index: 12, kind: input, shape index: {}]   ;;  %s7997_s13 = inlined_call_operand.vmem [shape: f32[1,256], index: 13, kind: input, shape index: {}]   ;;  %s7998_s14 = inlined_call_operand.vmem [shape: f32[2,32,256], index: 14, kind: output, shape index: {}]  }
   0x1   :  { %v5280_v0 = vld [vmem:[%s7988_s4] sm:$0xff]  ;;  %v5285_v1 = vld [vmem:[%s7988_s4 + $0x8] sm:$0xff]  ;;  %v5290_v2 = vld [vmem:[%s7988_s4 + $0x10] sm:$0xff] }
   0x2   :  { %v5295_v3 = vld [vmem:[%s7988_s4 + $0x18] sm:$0xff]  ;;  %v5300_v4 = vld [vmem:[%s7988_s4 + $0x20] sm:$0xff]  ;;  %v5305_v5 = vld [vmem:[%s7988_s4 + $0x28] sm:$0xff] }
   0x3   :  { %v5310_v6 = vld [vmem:[%s7988_s4 + $0x30] sm:$0xff]  ;;  %v5315_v7 = vld [vmem:[%s7988_s4 + $0x38] sm:$0xff]  ;;  %v5320_v8 = vld [vmem:[%s7988_s4 + $0x40] sm:$0xff] }
   0x4   :  { %v5325_v9 = vld [vmem:[%s7988_s4 + $0x48] sm:$0xff]  ;;  %v5330_v10 = vld [vmem:[%s7988_s4 + $0x50] sm:$0xff]  ;;  %v5335_v11 = vld [vmem:[%s7988_s4 + $0x58] sm:$0xff] }
   0x5   :  { %v5340_v12 = vld [vmem:[%s7988_s4 + $0x60] sm:$0xff]  ;;  %v5345_v13 = vld [vmem:[%s7988_s4 + $0x68] sm:$0xff]  ;;  %v5350_v14 = vld [vmem:[%s7988_s4 + $0x70] sm:$0xff] }
   0x6   :  { %v5355_v15 = vld [vmem:[%s7988_s4 + $0x78] sm:$0xff]  ;;  %v5360_v16 = vld [vmem:[%s7988_s4 + $0x80] sm:$0xff]  ;;  %v5365_v17 = vld [vmem:[%s7988_s4 + $0x88] sm:$0xff] }
   0x7   :  { %8206 = vst [vmem:[#allocation11_spill] sm:$0xff] %v5360_v16  ;;  %8207 = vst [vmem:[#allocation12_spill] sm:$0xff] %v5365_v17  ;;  %v5370_v18 = vld [vmem:[%s7988_s4 + $0x90] sm:$0xff]  ;;  %v5375_v19 = vld [vmem:[%s7988_s4 + $0x98] sm:$0xff] }
   0x8   :  { %8208 = vst [vmem:[#allocation13_spill] sm:$0xff] %v5370_v18  ;;  %8209 = vst [vmem:[#allocation14_spill] sm:$0xff] %v5375_v19  ;;  %v5380_v20 = vld [vmem:[%s7988_s4 + $0xa0] sm:$0xff]  ;;  %v5385_v21 = vld [vmem:[%s7988_s4 + $0xa8] sm:$0xff] }
   0x9   :  { %8210 = vst [vmem:[#allocation15_spill] sm:$0xff] %v5380_v20  ;;  %8211 = vst [vmem:[#allocation16_spill] sm:$0xff] %v5385_v21  ;;  %v5390_v22 = vld [vmem:[%s7988_s4 + $0xb0] sm:$0xff]  ;;  %v5395_v23 = vld [vmem:[%s7988_s4 + $0xb8] sm:$0xff] }
   0xa   :  { %8212 = vst [vmem:[#allocation17_spill] sm:$0xff] %v5390_v22  ;;  %8213 = vst [vmem:[#allocation18_spill] sm:$0xff] %v5395_v23  ;;  %v5400_v24 = vld [vmem:[%s7988_s4 + $0xc0] sm:$0xff]  ;;  %v5405_v25 = vld [vmem:[%s7988_s4 + $0xc8] sm:$0xff] }
   0xb   :  { %8214 = vst [vmem:[#allocation19_spill] sm:$0xff] %v5400_v24  ;;  %8215 = vst [vmem:[#allocation20_spill] sm:$0xff] %v5405_v25  ;;  %v5410_v26 = vld [vmem:[%s7988_s4 + $0xd0] sm:$0xff]  ;;  %v5415_v27 = vld [vmem:[%s7988_s4 + $0xd8] sm:$0xff] }
   0xc   :  { %8216 = vst [vmem:[#allocation21_spill] sm:$0xff] %v5410_v26  ;;  %8217 = vst [vmem:[#allocation22_spill] sm:$0xff] %v5415_v27  ;;  %v5420_v28 = vld [vmem:[%s7988_s4 + $0xe0] sm:$0xff]  ;;  %v5425_v29 = vld [vmem:[%s7988_s4 + $0xe8] sm:$0xff] }
   0xd   :  { %8218 = vst [vmem:[#allocation23_spill] sm:$0xff] %v5420_v28  ;;  %8219 = vst [vmem:[#allocation24_spill] sm:$0xff] %v5425_v29  ;;  %v5430_v30 = vld [vmem:[%s7988_s4 + $0xf0] sm:$0xff]  ;;  %v5435_v31 = vld [vmem:[%s7988_s4 + $0xf8] sm:$0xff] }
   0xe   :  { %8220 = vst [vmem:[#allocation25_spill] sm:$0xff] %v5430_v30  ;;  %8221 = vst [vmem:[#allocation26_spill] sm:$0xff] %v5435_v31  ;;  %v5440_v32 = vld [vmem:[%s7988_s4 + $0x100] sm:$0xff]  ;;  %v5445_v33 = vld [vmem:[%s7988_s4 + $0x108] sm:$0xff] }
   0xf   :  { %v5450_v34 = vld [vmem:[%s7988_s4 + $0x110] sm:$0xff]  ;;  %v5455_v35 = vld [vmem:[%s7988_s4 + $0x118] sm:$0xff]  ;;  %v5460_v36 = vld [vmem:[%s7988_s4 + $0x120] sm:$0xff] }
  0x10   :  { %v5465_v37 = vld [vmem:[%s7988_s4 + $0x128] sm:$0xff]  ;;  %v5470_v38 = vld [vmem:[%s7988_s4 + $0x130] sm:$0xff]  ;;  %v5475_v39 = vld [vmem:[%s7988_s4 + $0x138] sm:$0xff] }
  0x11   :  { %v5480_v40 = vld [vmem:[%s7988_s4 + $0x140] sm:$0xff]  ;;  %v5485_v41 = vld [vmem:[%s7988_s4 + $0x148] sm:$0xff]  ;;  %v5490_v42 = vld [vmem:[%s7988_s4 + $0x150] sm:$0xff] }
  0x12   :  { %v5495_v43 = vld [vmem:[%s7988_s4 + $0x158] sm:$0xff]  ;;  %v5500_v44 = vld [vmem:[%s7988_s4 + $0x160] sm:$0xff]  ;;  %v5505_v45 = vld [vmem:[%s7988_s4 + $0x168] sm:$0xff] }
  0x13   :  { %v5510_v46 = vld [vmem:[%s7988_s4 + $0x170] sm:$0xff]  ;;  %v5515_v47 = vld [vmem:[%s7988_s4 + $0x178] sm:$0xff]  ;;  %v5520_v48 = vld [vmem:[%s7988_s4 + $0x180] sm:$0xff] }
  0x14   :  { %8222 = vst [vmem:[#allocation27_spill] sm:$0xff] %v5520_v48  ;;  %v5525_v49 = vld [vmem:[%s7988_s4 + $0x188] sm:$0xff]  ;;  %v5530_v50 = vld [vmem:[%s7988_s4 + $0x190] sm:$0xff]  ;;  %v5535_v51 = vld [vmem:[%s7988_s4 + $0x198] sm:$0xff] }
  0x15   :  { %8223 = vst [vmem:[#allocation28_spill] sm:$0xff] %v5525_v49  ;;  %8224 = vst [vmem:[#allocation29_spill] sm:$0xff] %v5530_v50  ;;  %v5540_v52 = vld [vmem:[%s7988_s4 + $0x1a0] sm:$0xff]  ;;  %v5545_v53 = vld [vmem:[%s7988_s4 + $0x1a8] sm:$0xff] }
  0x16   :  { %8225 = vst [vmem:[#allocation30_spill] sm:$0xff] %v5535_v51  ;;  %8226 = vst [vmem:[#allocation31_spill] sm:$0xff] %v5540_v52  ;;  %v5550_v54 = vld [vmem:[%s7988_s4 + $0x1b0] sm:$0xff]  ;;  %v5555_v55 = vld [vmem:[%s7988_s4 + $0x1b8] sm:$0xff] }
  0x17   :  { %8227 = vst [vmem:[#allocation32_spill] sm:$0xff] %v5545_v53  ;;  %8228 = vst [vmem:[#allocation33_spill] sm:$0xff] %v5550_v54  ;;  %v5560_v56 = vld [vmem:[%s7988_s4 + $0x1c0] sm:$0xff]  ;;  %v5565_v57 = vld [vmem:[%s7988_s4 + $0x1c8] sm:$0xff] }
  0x18   :  { %8229 = vst [vmem:[#allocation34_spill] sm:$0xff] %v5555_v55  ;;  %8230 = vst [vmem:[#allocation35_spill] sm:$0xff] %v5560_v56  ;;  %v5570_v58 = vld [vmem:[%s7988_s4 + $0x1d0] sm:$0xff]  ;;  %v5575_v59 = vld [vmem:[%s7988_s4 + $0x1d8] sm:$0xff] }
  0x19   :  { %8231 = vst [vmem:[#allocation36_spill] sm:$0xff] %v5565_v57  ;;  %8232 = vst [vmem:[#allocation37_spill] sm:$0xff] %v5570_v58  ;;  %v5580_v60 = vld [vmem:[%s7988_s4 + $0x1e0] sm:$0xff]  ;;  %v5585_v61 = vld [vmem:[%s7988_s4 + $0x1e8] sm:$0xff] }
  0x1a   :  { %8233 = vst [vmem:[#allocation38_spill] sm:$0xff] %v5575_v59  ;;  %8234 = vst [vmem:[#allocation39_spill] sm:$0xff] %v5580_v60  ;;  %v5590_v62 = vld [vmem:[%s7988_s4 + $0x1f0] sm:$0xff]  ;;  %v5595_v63 = vld [vmem:[%s7988_s4 + $0x1f8] sm:$0xff] }
  0x1b   :  { %8235 = vst [vmem:[#allocation40_spill] sm:$0xff] %v5585_v61  ;;  %8236 = vst [vmem:[#allocation41_spill] sm:$0xff] %v5590_v62  ;;  %v5600_v16 = vld [vmem:[%s7988_s4 + $0x200] sm:$0xff]  ;;  %v5605_v17 = vld [vmem:[%s7988_s4 + $0x208] sm:$0xff] }
  0x1c   :  { %8237 = vst [vmem:[#allocation42_spill] sm:$0xff] %v5595_v63  ;;  %8238 = vst [vmem:[#allocation43_spill] sm:$0xff] %v5600_v16  ;;  %v5610_v48 = vld [vmem:[%s7988_s4 + $0x210] sm:$0xff]  ;;  %v5615_v49 = vld [vmem:[%s7988_s4 + $0x218] sm:$0xff] }
  0x1d   :  { %8239 = vst [vmem:[#allocation44_spill] sm:$0xff] %v5605_v17  ;;  %8240 = vst [vmem:[#allocation45_spill] sm:$0xff] %v5610_v48  ;;  %v5620_v18 = vld [vmem:[%s7988_s4 + $0x220] sm:$0xff]  ;;  %v5625_v16 = vld [vmem:[%s7988_s4 + $0x228] sm:$0xff] }
  0x1e   :  { %8241 = vst [vmem:[#allocation46_spill] sm:$0xff] %v5615_v49  ;;  %8242 = vst [vmem:[#allocation47_spill] sm:$0xff] %v5620_v18  ;;  %v5630_v17 = vld [vmem:[%s7988_s4 + $0x230] sm:$0xff]  ;;  %v5635_v48 = vld [vmem:[%s7988_s4 + $0x238] sm:$0xff] }
  0x1f   :  { %8243 = vst [vmem:[#allocation48_spill] sm:$0xff] %v5625_v16  ;;  %8244 = vst [vmem:[#allocation49_spill] sm:$0xff] %v5630_v17  ;;  %v5640_v49 = vld [vmem:[%s7988_s4 + $0x240] sm:$0xff]  ;;  %v5645_v18 = vld [vmem:[%s7988_s4 + $0x248] sm:$0xff] }
  0x20   :  { %8245 = vst [vmem:[#allocation50_spill] sm:$0xff] %v5635_v48  ;;  %8246 = vst [vmem:[#allocation51_spill] sm:$0xff] %v5640_v49  ;;  %v5650_v16 = vld [vmem:[%s7988_s4 + $0x250] sm:$0xff]  ;;  %v5655_v17 = vld [vmem:[%s7988_s4 + $0x258] sm:$0xff] }
  0x21   :  { %8247 = vst [vmem:[#allocation52_spill] sm:$0xff] %v5645_v18  ;;  %8248 = vst [vmem:[#allocation53_spill] sm:$0xff] %v5650_v16  ;;  %v5660_v48 = vld [vmem:[%s7988_s4 + $0x260] sm:$0xff]  ;;  %v5665_v49 = vld [vmem:[%s7988_s4 + $0x268] sm:$0xff] }
  0x22   :  { %8249 = vst [vmem:[#allocation54_spill] sm:$0xff] %v5655_v17  ;;  %8250 = vst [vmem:[#allocation55_spill] sm:$0xff] %v5660_v48  ;;  %v5670_v18 = vld [vmem:[%s7988_s4 + $0x270] sm:$0xff]  ;;  %v5675_v16 = vld [vmem:[%s7988_s4 + $0x278] sm:$0xff] }
  0x23   :  { %8251 = vst [vmem:[#allocation56_spill] sm:$0xff] %v5665_v49  ;;  %8252 = vst [vmem:[#allocation57_spill] sm:$0xff] %v5670_v18  ;;  %v5680_v17 = vld [vmem:[%s7988_s4 + $0x280] sm:$0xff]  ;;  %v5685_v48 = vld [vmem:[%s7988_s4 + $0x288] sm:$0xff] }
  0x24   :  { %8253 = vst [vmem:[#allocation58_spill] sm:$0xff] %v5675_v16  ;;  %8254 = vst [vmem:[#allocation59_spill] sm:$0xff] %v5680_v17  ;;  %v5690_v49 = vld [vmem:[%s7988_s4 + $0x290] sm:$0xff]  ;;  %v5695_v18 = vld [vmem:[%s7988_s4 + $0x298] sm:$0xff] }
  0x25   :  { %8255 = vst [vmem:[#allocation60_spill] sm:$0xff] %v5685_v48  ;;  %8256 = vst [vmem:[#allocation61_spill] sm:$0xff] %v5690_v49  ;;  %v5700_v16 = vld [vmem:[%s7988_s4 + $0x2a0] sm:$0xff]  ;;  %v5705_v17 = vld [vmem:[%s7988_s4 + $0x2a8] sm:$0xff] }
  0x26   :  { %8257 = vst [vmem:[#allocation62_spill] sm:$0xff] %v5695_v18  ;;  %8258 = vst [vmem:[#allocation63_spill] sm:$0xff] %v5700_v16  ;;  %v5710_v48 = vld [vmem:[%s7988_s4 + $0x2b0] sm:$0xff]  ;;  %v5715_v49 = vld [vmem:[%s7988_s4 + $0x2b8] sm:$0xff] }
  0x27   :  { %8259 = vst [vmem:[#allocation64_spill] sm:$0xff] %v5705_v17  ;;  %8260 = vst [vmem:[#allocation65_spill] sm:$0xff] %v5710_v48  ;;  %v5720_v18 = vld [vmem:[%s7988_s4 + $0x2c0] sm:$0xff]  ;;  %v5725_v16 = vld [vmem:[%s7988_s4 + $0x2c8] sm:$0xff] }
  0x28   :  { %8261 = vst [vmem:[#allocation66_spill] sm:$0xff] %v5715_v49  ;;  %8262 = vst [vmem:[#allocation67_spill] sm:$0xff] %v5720_v18  ;;  %v5730_v17 = vld [vmem:[%s7988_s4 + $0x2d0] sm:$0xff]  ;;  %v5735_v48 = vld [vmem:[%s7988_s4 + $0x2d8] sm:$0xff] }
  0x29   :  { %8263 = vst [vmem:[#allocation68_spill] sm:$0xff] %v5725_v16  ;;  %8264 = vst [vmem:[#allocation69_spill] sm:$0xff] %v5730_v17  ;;  %v5740_v49 = vld [vmem:[%s7988_s4 + $0x2e0] sm:$0xff]  ;;  %v5745_v18 = vld [vmem:[%s7988_s4 + $0x2e8] sm:$0xff] }
  0x2a   :  { %8265 = vst [vmem:[#allocation70_spill] sm:$0xff] %v5735_v48  ;;  %8266 = vst [vmem:[#allocation71_spill] sm:$0xff] %v5740_v49  ;;  %v5750_v16 = vld [vmem:[%s7988_s4 + $0x2f0] sm:$0xff]  ;;  %v5755_v17 = vld [vmem:[%s7988_s4 + $0x2f8] sm:$0xff] }
  0x2b   :  { %8267 = vst [vmem:[#allocation72_spill] sm:$0xff] %v5745_v18  ;;  %8268 = vst [vmem:[#allocation73_spill] sm:$0xff] %v5750_v16 }
  0x2c   :  { %8269 = vst [vmem:[#allocation74_spill] sm:$0xff] %v5755_v17 }
  0x2d   :  { %276 = vsyncadd [#allocation6], 12288  ;;  %v5760_v48 = vld [vmem:[%s7989_s5] sm:$0xff]  ;;  %v5765_v49 = vld [vmem:[%s7989_s5 + $0x8] sm:$0xff] }
  0x2e   :  { %8270 = vst [vmem:[#allocation75_spill] sm:$0xff] %v5760_v48  ;;  %8271 = vst [vmem:[#allocation76_spill] sm:$0xff] %v5765_v49  ;;  %v5770_v18 = vld [vmem:[%s7989_s5 + $0x10] sm:$0xff]  ;;  %v5775_v16 = vld [vmem:[%s7989_s5 + $0x18] sm:$0xff] }
  0x2f   :  { %8272 = vst [vmem:[#allocation77_spill] sm:$0xff] %v5770_v18  ;;  %8273 = vst [vmem:[#allocation78_spill] sm:$0xff] %v5775_v16  ;;  %v5780_v17 = vld [vmem:[%s7989_s5 + $0x20] sm:$0xff]  ;;  %v5785_v48 = vld [vmem:[%s7989_s5 + $0x28] sm:$0xff] }
  0x30   :  { %8274 = vst [vmem:[#allocation79_spill] sm:$0xff] %v5780_v17  ;;  %8275 = vst [vmem:[#allocation80_spill] sm:$0xff] %v5785_v48  ;;  %v5790_v49 = vld [vmem:[%s7989_s5 + $0x30] sm:$0xff]  ;;  %v5795_v18 = vld [vmem:[%s7989_s5 + $0x38] sm:$0xff] }
  0x31   :  { %8276 = vst [vmem:[#allocation81_spill] sm:$0xff] %v5790_v49  ;;  %8277 = vst [vmem:[#allocation82_spill] sm:$0xff] %v5795_v18  ;;  %v5800_v16 = vld [vmem:[%s7989_s5 + $0x40] sm:$0xff]  ;;  %v5805_v17 = vld [vmem:[%s7989_s5 + $0x48] sm:$0xff] }
  0x32   :  { %8278 = vst [vmem:[#allocation83_spill] sm:$0xff] %v5800_v16  ;;  %8279 = vst [vmem:[#allocation84_spill] sm:$0xff] %v5805_v17  ;;  %v5810_v48 = vld [vmem:[%s7989_s5 + $0x50] sm:$0xff]  ;;  %v5815_v49 = vld [vmem:[%s7989_s5 + $0x58] sm:$0xff] }
  0x33   :  { %8280 = vst [vmem:[#allocation85_spill] sm:$0xff] %v5810_v48  ;;  %8281 = vst [vmem:[#allocation86_spill] sm:$0xff] %v5815_v49  ;;  %v5820_v18 = vld [vmem:[%s7989_s5 + $0x60] sm:$0xff]  ;;  %v5825_v16 = vld [vmem:[%s7989_s5 + $0x68] sm:$0xff] }
  0x34   :  { %8282 = vst [vmem:[#allocation87_spill] sm:$0xff] %v5820_v18  ;;  %8283 = vst [vmem:[#allocation88_spill] sm:$0xff] %v5825_v16  ;;  %v5830_v17 = vld [vmem:[%s7989_s5 + $0x70] sm:$0xff]  ;;  %v5835_v48 = vld [vmem:[%s7989_s5 + $0x78] sm:$0xff] }
  0x35   :  { %8284 = vst [vmem:[#allocation89_spill] sm:$0xff] %v5830_v17  ;;  %8285 = vst [vmem:[#allocation90_spill] sm:$0xff] %v5835_v48  ;;  %v5840_v49 = vld [vmem:[%s7989_s5 + $0x80] sm:$0xff]  ;;  %v5845_v18 = vld [vmem:[%s7989_s5 + $0x88] sm:$0xff] }
  0x36   :  { %8286 = vst [vmem:[#allocation91_spill] sm:$0xff] %v5840_v49  ;;  %8287 = vst [vmem:[#allocation92_spill] sm:$0xff] %v5845_v18  ;;  %v5850_v16 = vld [vmem:[%s7989_s5 + $0x90] sm:$0xff]  ;;  %v5855_v17 = vld [vmem:[%s7989_s5 + $0x98] sm:$0xff] }
  0x37   :  { %8288 = vst [vmem:[#allocation93_spill] sm:$0xff] %v5850_v16  ;;  %8289 = vst [vmem:[#allocation94_spill] sm:$0xff] %v5855_v17  ;;  %v5860_v48 = vld [vmem:[%s7989_s5 + $0xa0] sm:$0xff]  ;;  %v5865_v49 = vld [vmem:[%s7989_s5 + $0xa8] sm:$0xff] }
  0x38   :  { %8290 = vst [vmem:[#allocation95_spill] sm:$0xff] %v5860_v48  ;;  %8291 = vst [vmem:[#allocation96_spill] sm:$0xff] %v5865_v49  ;;  %v5870_v18 = vld [vmem:[%s7989_s5 + $0xb0] sm:$0xff]  ;;  %v5875_v16 = vld [vmem:[%s7989_s5 + $0xb8] sm:$0xff] }
  0x39   :  { %8292 = vst [vmem:[#allocation97_spill] sm:$0xff] %v5870_v18  ;;  %8293 = vst [vmem:[#allocation98_spill] sm:$0xff] %v5875_v16  ;;  %v5880_v17 = vld [vmem:[%s7989_s5 + $0xc0] sm:$0xff]  ;;  %v5885_v48 = vld [vmem:[%s7989_s5 + $0xc8] sm:$0xff] }
  0x3a   :  { %8294 = vst [vmem:[#allocation99_spill] sm:$0xff] %v5880_v17  ;;  %8295 = vst [vmem:[#allocation100_spill] sm:$0xff] %v5885_v48  ;;  %v5890_v49 = vld [vmem:[%s7989_s5 + $0xd0] sm:$0xff]  ;;  %v5895_v18 = vld [vmem:[%s7989_s5 + $0xd8] sm:$0xff] }
  0x3b   :  { %8296 = vst [vmem:[#allocation101_spill] sm:$0xff] %v5890_v49  ;;  %8297 = vst [vmem:[#allocation102_spill] sm:$0xff] %v5895_v18  ;;  %v5900_v16 = vld [vmem:[%s7989_s5 + $0xe0] sm:$0xff]  ;;  %v5905_v17 = vld [vmem:[%s7989_s5 + $0xe8] sm:$0xff] }
  0x3c   :  { %8298 = vst [vmem:[#allocation103_spill] sm:$0xff] %v5900_v16  ;;  %8299 = vst [vmem:[#allocation104_spill] sm:$0xff] %v5905_v17  ;;  %v5910_v48 = vld [vmem:[%s7989_s5 + $0xf0] sm:$0xff]  ;;  %v5915_v49 = vld [vmem:[%s7989_s5 + $0xf8] sm:$0xff] }
  0x3d   :  { %8300 = vst [vmem:[#allocation105_spill] sm:$0xff] %v5910_v48  ;;  %8301 = vst [vmem:[#allocation106_spill] sm:$0xff] %v5915_v49  ;;  %v5920_v18 = vld [vmem:[%s7989_s5 + $0x100] sm:$0xff]  ;;  %v5925_v16 = vld [vmem:[%s7989_s5 + $0x108] sm:$0xff] }
  0x3e   :  { %8302 = vst [vmem:[#allocation107_spill] sm:$0xff] %v5920_v18  ;;  %8303 = vst [vmem:[#allocation108_spill] sm:$0xff] %v5925_v16  ;;  %v5930_v17 = vld [vmem:[%s7989_s5 + $0x110] sm:$0xff]  ;;  %v5935_v48 = vld [vmem:[%s7989_s5 + $0x118] sm:$0xff] }
  0x3f   :  { %8304 = vst [vmem:[#allocation109_spill] sm:$0xff] %v5930_v17  ;;  %8305 = vst [vmem:[#allocation110_spill] sm:$0xff] %v5935_v48  ;;  %v5940_v49 = vld [vmem:[%s7989_s5 + $0x120] sm:$0xff]  ;;  %v5945_v18 = vld [vmem:[%s7989_s5 + $0x128] sm:$0xff] }
  0x40   :  { %8306 = vst [vmem:[#allocation111_spill] sm:$0xff] %v5940_v49  ;;  %8307 = vst [vmem:[#allocation112_spill] sm:$0xff] %v5945_v18  ;;  %v5950_v16 = vld [vmem:[%s7989_s5 + $0x130] sm:$0xff]  ;;  %v5955_v17 = vld [vmem:[%s7989_s5 + $0x138] sm:$0xff] }
  0x41   :  { %8308 = vst [vmem:[#allocation113_spill] sm:$0xff] %v5950_v16  ;;  %8309 = vst [vmem:[#allocation114_spill] sm:$0xff] %v5955_v17  ;;  %v5960_v48 = vld [vmem:[%s7989_s5 + $0x140] sm:$0xff]  ;;  %v5965_v49 = vld [vmem:[%s7989_s5 + $0x148] sm:$0xff] }
  0x42   :  { %8310 = vst [vmem:[#allocation115_spill] sm:$0xff] %v5960_v48  ;;  %8311 = vst [vmem:[#allocation116_spill] sm:$0xff] %v5965_v49  ;;  %v5970_v18 = vld [vmem:[%s7989_s5 + $0x150] sm:$0xff]  ;;  %v5975_v16 = vld [vmem:[%s7989_s5 + $0x158] sm:$0xff] }
  0x43   :  { %8312 = vst [vmem:[#allocation117_spill] sm:$0xff] %v5970_v18  ;;  %8313 = vst [vmem:[#allocation118_spill] sm:$0xff] %v5975_v16  ;;  %v5980_v17 = vld [vmem:[%s7989_s5 + $0x160] sm:$0xff]  ;;  %v5985_v48 = vld [vmem:[%s7989_s5 + $0x168] sm:$0xff] }
  0x44   :  { %8314 = vst [vmem:[#allocation119_spill] sm:$0xff] %v5980_v17  ;;  %8315 = vst [vmem:[#allocation120_spill] sm:$0xff] %v5985_v48  ;;  %v5990_v49 = vld [vmem:[%s7989_s5 + $0x170] sm:$0xff]  ;;  %v5995_v18 = vld [vmem:[%s7989_s5 + $0x178] sm:$0xff] }
  0x45   :  { %8316 = vst [vmem:[#allocation121_spill] sm:$0xff] %v5990_v49  ;;  %8317 = vst [vmem:[#allocation122_spill] sm:$0xff] %v5995_v18  ;;  %v6000_v16 = vld [vmem:[%s7989_s5 + $0x180] sm:$0xff]  ;;  %v6005_v17 = vld [vmem:[%s7989_s5 + $0x188] sm:$0xff] }
  0x46   :  { %8318 = vst [vmem:[#allocation123_spill] sm:$0xff] %v6000_v16  ;;  %8319 = vst [vmem:[#allocation124_spill] sm:$0xff] %v6005_v17  ;;  %v6010_v48 = vld [vmem:[%s7989_s5 + $0x190] sm:$0xff]  ;;  %v6015_v49 = vld [vmem:[%s7989_s5 + $0x198] sm:$0xff] }
  0x47   :  { %8320 = vst [vmem:[#allocation125_spill] sm:$0xff] %v6010_v48  ;;  %8321 = vst [vmem:[#allocation126_spill] sm:$0xff] %v6015_v49  ;;  %v6020_v18 = vld [vmem:[%s7989_s5 + $0x1a0] sm:$0xff]  ;;  %v6025_v16 = vld [vmem:[%s7989_s5 + $0x1a8] sm:$0xff] }
  0x48   :  { %8322 = vst [vmem:[#allocation127_spill] sm:$0xff] %v6020_v18  ;;  %8323 = vst [vmem:[#allocation128_spill] sm:$0xff] %v6025_v16  ;;  %v6030_v17 = vld [vmem:[%s7989_s5 + $0x1b0] sm:$0xff]  ;;  %v6035_v48 = vld [vmem:[%s7989_s5 + $0x1b8] sm:$0xff] }
  0x49   :  { %8324 = vst [vmem:[#allocation129_spill] sm:$0xff] %v6030_v17  ;;  %8325 = vst [vmem:[#allocation130_spill] sm:$0xff] %v6035_v48  ;;  %v6040_v49 = vld [vmem:[%s7989_s5 + $0x1c0] sm:$0xff]  ;;  %v6045_v18 = vld [vmem:[%s7989_s5 + $0x1c8] sm:$0xff] }
  0x4a   :  { %8326 = vst [vmem:[#allocation131_spill] sm:$0xff] %v6040_v49  ;;  %8327 = vst [vmem:[#allocation132_spill] sm:$0xff] %v6045_v18  ;;  %v6050_v16 = vld [vmem:[%s7989_s5 + $0x1d0] sm:$0xff]  ;;  %v6055_v17 = vld [vmem:[%s7989_s5 + $0x1d8] sm:$0xff] }
  0x4b   :  { %8328 = vst [vmem:[#allocation133_spill] sm:$0xff] %v6050_v16  ;;  %8329 = vst [vmem:[#allocation134_spill] sm:$0xff] %v6055_v17  ;;  %v6060_v48 = vld [vmem:[%s7989_s5 + $0x1e0] sm:$0xff]  ;;  %v6065_v49 = vld [vmem:[%s7989_s5 + $0x1e8] sm:$0xff] }
  0x4c   :  { %8330 = vst [vmem:[#allocation135_spill] sm:$0xff] %v6060_v48  ;;  %8331 = vst [vmem:[#allocation136_spill] sm:$0xff] %v6065_v49  ;;  %v6070_v18 = vld [vmem:[%s7989_s5 + $0x1f0] sm:$0xff]  ;;  %v6075_v16 = vld [vmem:[%s7989_s5 + $0x1f8] sm:$0xff] }
  0x4d   :  { %8332 = vst [vmem:[#allocation137_spill] sm:$0xff] %v6070_v18  ;;  %8333 = vst [vmem:[#allocation138_spill] sm:$0xff] %v6075_v16  ;;  %v6080_v17 = vld [vmem:[%s7989_s5 + $0x200] sm:$0xff]  ;;  %v6085_v48 = vld [vmem:[%s7989_s5 + $0x208] sm:$0xff] }
  0x4e   :  { %8334 = vst [vmem:[#allocation139_spill] sm:$0xff] %v6080_v17  ;;  %8335 = vst [vmem:[#allocation140_spill] sm:$0xff] %v6085_v48  ;;  %v6090_v49 = vld [vmem:[%s7989_s5 + $0x210] sm:$0xff]  ;;  %v6095_v18 = vld [vmem:[%s7989_s5 + $0x218] sm:$0xff] }
  0x4f   :  { %8336 = vst [vmem:[#allocation141_spill] sm:$0xff] %v6090_v49  ;;  %8337 = vst [vmem:[#allocation142_spill] sm:$0xff] %v6095_v18  ;;  %v6100_v16 = vld [vmem:[%s7989_s5 + $0x220] sm:$0xff]  ;;  %v6105_v17 = vld [vmem:[%s7989_s5 + $0x228] sm:$0xff] }
  0x50   :  { %8338 = vst [vmem:[#allocation143_spill] sm:$0xff] %v6100_v16  ;;  %8339 = vst [vmem:[#allocation144_spill] sm:$0xff] %v6105_v17  ;;  %v6110_v48 = vld [vmem:[%s7989_s5 + $0x230] sm:$0xff]  ;;  %v6115_v49 = vld [vmem:[%s7989_s5 + $0x238] sm:$0xff] }
  0x51   :  { %8340 = vst [vmem:[#allocation145_spill] sm:$0xff] %v6110_v48  ;;  %8341 = vst [vmem:[#allocation146_spill] sm:$0xff] %v6115_v49  ;;  %v6120_v18 = vld [vmem:[%s7989_s5 + $0x240] sm:$0xff]  ;;  %v6125_v16 = vld [vmem:[%s7989_s5 + $0x248] sm:$0xff] }
  0x52   :  { %8342 = vst [vmem:[#allocation147_spill] sm:$0xff] %v6120_v18  ;;  %8343 = vst [vmem:[#allocation148_spill] sm:$0xff] %v6125_v16  ;;  %v6130_v17 = vld [vmem:[%s7989_s5 + $0x250] sm:$0xff]  ;;  %v6135_v48 = vld [vmem:[%s7989_s5 + $0x258] sm:$0xff] }
  0x53   :  { %8344 = vst [vmem:[#allocation149_spill] sm:$0xff] %v6130_v17  ;;  %8345 = vst [vmem:[#allocation150_spill] sm:$0xff] %v6135_v48  ;;  %v6140_v49 = vld [vmem:[%s7989_s5 + $0x260] sm:$0xff]  ;;  %v6145_v18 = vld [vmem:[%s7989_s5 + $0x268] sm:$0xff] }
  0x54   :  { %8346 = vst [vmem:[#allocation151_spill] sm:$0xff] %v6140_v49  ;;  %8347 = vst [vmem:[#allocation152_spill] sm:$0xff] %v6145_v18  ;;  %v6150_v16 = vld [vmem:[%s7989_s5 + $0x270] sm:$0xff]  ;;  %v6155_v17 = vld [vmem:[%s7989_s5 + $0x278] sm:$0xff] }
  0x55   :  { %8348 = vst [vmem:[#allocation153_spill] sm:$0xff] %v6150_v16  ;;  %8349 = vst [vmem:[#allocation154_spill] sm:$0xff] %v6155_v17  ;;  %v6160_v48 = vld [vmem:[%s7989_s5 + $0x280] sm:$0xff]  ;;  %v6165_v49 = vld [vmem:[%s7989_s5 + $0x288] sm:$0xff] }
  0x56   :  { %8350 = vst [vmem:[#allocation155_spill] sm:$0xff] %v6160_v48  ;;  %8351 = vst [vmem:[#allocation156_spill] sm:$0xff] %v6165_v49  ;;  %v6170_v18 = vld [vmem:[%s7989_s5 + $0x290] sm:$0xff]  ;;  %v6175_v16 = vld [vmem:[%s7989_s5 + $0x298] sm:$0xff] }
  0x57   :  { %8352 = vst [vmem:[#allocation157_spill] sm:$0xff] %v6170_v18  ;;  %8353 = vst [vmem:[#allocation158_spill] sm:$0xff] %v6175_v16  ;;  %v6180_v17 = vld [vmem:[%s7989_s5 + $0x2a0] sm:$0xff]  ;;  %v6185_v48 = vld [vmem:[%s7989_s5 + $0x2a8] sm:$0xff] }
  0x58   :  { %8354 = vst [vmem:[#allocation159_spill] sm:$0xff] %v6180_v17  ;;  %8355 = vst [vmem:[#allocation160_spill] sm:$0xff] %v6185_v48  ;;  %v6190_v49 = vld [vmem:[%s7989_s5 + $0x2b0] sm:$0xff]  ;;  %v6195_v18 = vld [vmem:[%s7989_s5 + $0x2b8] sm:$0xff] }
  0x59   :  { %8356 = vst [vmem:[#allocation161_spill] sm:$0xff] %v6190_v49  ;;  %8357 = vst [vmem:[#allocation162_spill] sm:$0xff] %v6195_v18  ;;  %v6200_v16 = vld [vmem:[%s7989_s5 + $0x2c0] sm:$0xff]  ;;  %v6205_v17 = vld [vmem:[%s7989_s5 + $0x2c8] sm:$0xff] }
  0x5a   :  { %8358 = vst [vmem:[#allocation163_spill] sm:$0xff] %v6200_v16  ;;  %8359 = vst [vmem:[#allocation164_spill] sm:$0xff] %v6205_v17  ;;  %v6210_v48 = vld [vmem:[%s7989_s5 + $0x2d0] sm:$0xff]  ;;  %v6215_v49 = vld [vmem:[%s7989_s5 + $0x2d8] sm:$0xff] }
  0x5b   :  { %8360 = vst [vmem:[#allocation165_spill] sm:$0xff] %v6210_v48  ;;  %8361 = vst [vmem:[#allocation166_spill] sm:$0xff] %v6215_v49  ;;  %v6220_v18 = vld [vmem:[%s7989_s5 + $0x2e0] sm:$0xff]  ;;  %v6225_v16 = vld [vmem:[%s7989_s5 + $0x2e8] sm:$0xff] }
  0x5c   :  { %8362 = vst [vmem:[#allocation167_spill] sm:$0xff] %v6220_v18  ;;  %8363 = vst [vmem:[#allocation168_spill] sm:$0xff] %v6225_v16  ;;  %v6230_v17 = vld [vmem:[%s7989_s5 + $0x2f0] sm:$0xff]  ;;  %v6235_v48 = vld [vmem:[%s7989_s5 + $0x2f8] sm:$0xff] }
  0x5d   :  { %8364 = vst [vmem:[#allocation169_spill] sm:$0xff] %v6230_v17  ;;  %8365 = vst [vmem:[#allocation170_spill] sm:$0xff] %v6235_v48 }
  0x5e   :  { %510 = vsyncadd [#allocation6 + $0x1], 12288  ;;  %v571_v49 = vld [vmem:[%s7984_s0] sm:$0xff]  ;;  %v572_v18 = vld [vmem:[%s7984_s0 + $0x8] sm:$0xff]  ;;  %vm584_vm0 = vcmask 130048   ;;  %vm666_vm1 = vcmask 523264  }
  0x5f   :  { %v573_v16 = vpack.c.bf16 %v572_v18, %v571_v49  ;;  %v5148_v17 = vld [vmem:[%s7986_s2] sm:$0xff]   ;;  %v5149_v19 = vld [vmem:[%s7986_s2 + $0x8] sm:$0xff]   ;;  %v4664_v48 = vld [vmem:[%s7984_s0 + $0x10] sm:$0xff]  ;;  %vm511_vm2 = vcmask 1040384   ;;  %vm512_vm3 = vsmask.f32 256 }
  0x60   :  { %5112 = vmatprep.mubr.msk.bf16.mxu0 %vm584_vm0, %v5148_v17  ;;  %v4665_v50 = vld [vmem:[%s7984_s0 + $0x18] sm:$0xff]  ;;  %v5151_v51 = vld [vmem:[%s7987_s3 + $0x10] sm:$0xff]   ;;  %vm514_vm4 = vcmask 1044484   ;;  %vm515_vm5 = vsmask.f32 4352  ;;  %vm6272_vm6 = vmand %vm511_vm2, %vm512_vm3  ;;  %vm780_vm14 = vcmask 1043456  }
  0x61   :  { %5110 = vmatprep.subr.bf16.mxu0 %v573_v16  ;;  %v855_v18 = vpack.c.bf16 %v4665_v50, %v4664_v48  ;;  %v5150_v49 = vld [vmem:[%s7987_s3 + $0x18] sm:$0xff]   ;;  %vm516_vm7 = vmand %vm514_vm4, %vm515_vm5  ;;  %vm521_vm8 = vsmask.f32 7938  ;;  %vm8154_vm9 = vsmask.f32 7954  ;;  %vm535_vm15 = vcmask 1041409  }
  0x62   :  { %5111 = vmatpush3.bf16.msra.mxu0 %v573_v16  ;;  %5116 = vmatprep.subr.bf16.mxu1 %v5150_v49  ;;  %v5152_v16 = vld [vmem:[%s7987_s3 + $0x8] sm:$0xff]   ;;  %vm6278_vm10 = vmor %vm516_vm7, %vm6272_vm6  ;;  %v8371_v25 = vmov 0 }
  0x63   :  { %5128 = vmatprep.subr.bf16.mxu0 %v855_v18  ;;  %5117 = vmatpush3.bf16.msra.mxu1 %v5150_v49  ;;  %vm522_vm11 = vmand %vm511_vm2, %vm521_vm8  ;;  %vm538_vm2 = vcmask 1045509  }
  0x64   :  { %5118 = vmatprep.subr.bf16.mxu1 %v5151_v51  ;;  %vm524_vm12 = vmand %vm514_vm4, %vm8154_vm9  ;;  %vm979_vm9 = vsmask.f32 5392 }
  0x65   :  { %5113 = vmatmul.mubr.msk.bf16.vlgmr.msra.gmra.mxu0 %vm584_vm0, %v5149_v19  ;;  %vm525_vm13 = vmor %vm524_vm12, %vm522_vm11  ;;  %vm545_vm12 = vsmask.f32 7942 }
  0x66   :  { %5129 = vmatpush3.bf16.msra.mxu0 %v855_v18  ;;  %5130 = vmatprep.mubr.msk.bf16.mxu0 %vm584_vm0, %v5148_v17  ;;  %v5153_v17 = vld [vmem:[%s7987_s3] sm:$0xff]   ;;  %vm6302_vm4 = vmand %vm780_vm14, %vm521_vm8  ;;  %vm8153_vm8 = vsmask.f32 5376 }
  0x67   :  { %5134 = vmatprep.subr.bf16.mxu0 %v5150_v49  ;;  %5119 = vmatpush3.bf16.msra.mxu1 %v5151_v51  ;;  %v8372_v25 = vsel %vm6302_vm4, 4294967295, %v8371_v25  ;;  %vm6320_vm11 = vmand %vm538_vm2, %vm8153_vm8  ;;  %vm1025_vm8 = vcmask 1043457  }
  0x68   :  { %5120 = vmatprep.subr.bf16.mxu1 %v5152_v16  ;;  %8373 = vst [vmem:[#allocation172_spill] sm:$0xff] %v8372_v25  ;;  %vm6357_vm14 = vmand %vm535_vm15, %vm545_vm12 }
  0x6b   :  { %5121 = vmatpush3.bf16.msra.mxu1 %v5152_v16 }
  0x6c   :  { %5122 = vmatprep.subr.bf16.mxu1 %v5153_v17 }
  0x6d   :  { %5131 = vmatmul.mubr.msk.bf16.vlgmr.msra.gmra.mxu0 %vm584_vm0, %v5149_v19  ;;  %vm738_vm0 = vsmask.f32 4368 }
  0x6e   :  { %5135 = vmatpush3.bf16.msra.mxu0 %v5150_v49  ;;  %vm6314_vm7 = vmor %vm512_vm3, %vm738_vm0 }
  0x6f   :  { %5136 = vmatprep.subr.bf16.mxu0 %v5151_v51  ;;  %5123 = vmatpush3.bf16.msra.mxu1 %v5153_v17 }
  0x72   :  { %5137 = vmatpush3.bf16.msra.mxu0 %v5151_v51 }
  0x73   :  { %5138 = vmatprep.subr.bf16.mxu0 %v5152_v16 }
  0x76   :  { %5139 = vmatpush3.bf16.msra.mxu0 %v5152_v16 }
  0x77   :  { %5140 = vmatprep.subr.bf16.mxu0 %v5153_v17 }
  0x7a   :  { %5141 = vmatpush3.bf16.msra.mxu0 %v5153_v17 }
 0x125   :  { %v5114_v19 = vpop.f32.mrf.mxu0 }
 0x127   :  { %v625_v48 = vpop.f32.mrf.mxu0 }
 0x129   :  { %v5115_v50 = vpop.f32.mrf.mxu0 }
 0x12a   :  { %v641_v49 = vpack.c.bf16 %v5115_v50, %v5114_v19  ;;  %v518_v19 = vld [vmem:[#allocation2] sm:$0x11] }
 0x12b   :  { %v628_v51 = vpop.f32.mrf.mxu0  ;;  %v722_v50 = vld [vmem:[%s7985_s1] sm:$0xff] }
 0x12c   :  { %v640_v18 = vpack.c.bf16 %v628_v51, %v625_v48  ;;  %v532_v48 = vld [vmem:[#allocation3] sm:$0x11] }
 0x12d   :  { %v5132_v20 = vpop.f32.mrf.mxu0 }
 0x12e   :  { %5124 = vmatprep.mubr.msk.bf16.mxu1 %vm666_vm1, %v640_v18  ;;  %v533_v18 = vsel %vm525_vm13, 0, %v532_v48 }
 0x12f   :  { %5125 = vmatmul.mubr.msk.bf16.vlgmr.msra.gmra.mxu1 %vm666_vm1, %v641_v49  ;;  %v890_v21 = vpop.f32.mrf.mxu0  ;;  %v723_v49 = vld [vmem:[%s7985_s1 + $0x8] sm:$0xff]  ;;  %534 = vst [vmem:[#allocation3] sm:$0x11] %v533_v18 }
 0x131   :  { %v5133_v16 = vpop.f32.mrf.mxu0 }
 0x132   :  { %v906_v22 = vpack.c.bf16 %v5133_v16, %v5132_v20  ;;  %v519_v20 = vsel %vm6278_vm10, 0, %v518_v19  ;;  %v724_v16 = vld [vmem:[%s7985_s1 + $0x10] sm:$0xff]  ;;  %v725_v19 = vld [vmem:[%s7985_s1 + $0x18] sm:$0xff] }
 0x133   :  { %v893_v52 = vpop.f32.mrf.mxu0  ;;  %520 = vst [vmem:[#allocation2] sm:$0x11] %v519_v20  ;;  %v4927_v20 = vpack.c.bf16 %v722_v50, %v722_v50 }
 0x134   :  { %v905_v53 = vpack.c.bf16 %v893_v52, %v890_v21  ;;  %v8368_v21 = vmov 0 }
 0x135   :  { %v8369_v21 = vsel %vm6278_vm10, 4294967295, %v8368_v21  ;;  %v741_v48 = vshrl.u32 %v4927_v20, 16 }
 0x136   :  { %5142 = vmatprep.mubr.msk.bf16.mxu0 %vm666_vm1, %v905_v53  ;;  %8370 = vst [vmem:[#allocation171_spill] sm:$0xff] %v8369_v21  ;;  %v529_v53 = vld [vmem:[#allocation3 + $0x28] sm:$0x11]  ;;  %v744_v21 = vshll.u32 %v4927_v20, 16 }
 0x137   :  { %5143 = vmatmul.mubr.msk.bf16.vlgmr.msra.gmra.mxu0 %vm666_vm1, %v906_v22  ;;  %v526_v22 = vld [vmem:[#allocation2 + $0x20] sm:$0x11]  ;;  %v530_v51 = vsel %vm6278_vm10, 0, %v529_v53  ;;  %v4930_v53 = vpack.c.bf16 %v725_v19, %v725_v19  ;;  %vm536_vm1 = vsmask.f32 1280  ;;  %v743_v50 = vrot.slane %v741_v48, 7 }
 0x138   :  { %v527_v52 = vsel %vm525_vm13, 0, %v526_v22  ;;  %531 = vst [vmem:[#allocation3 + $0x28] sm:$0x11] %v530_v51  ;;  %v4928_v22 = vpack.c.bf16 %v723_v49, %v723_v49  ;;  %vm6308_vm5 = vmand %vm535_vm15, %vm536_vm1  ;;  %v8376_v19 = vmov 0  ;;  %vm547_vm13 = vsmask.f32 7958 }
 0x139   :  { %528 = vst [vmem:[#allocation2 + $0x20] sm:$0x11] %v527_v52  ;;  %v4929_v52 = vpack.c.bf16 %v724_v16, %v724_v16  ;;  %v767_v51 = vshrl.u32 %v4930_v53, 16  ;;  %v770_v18 = vshll.u32 %v4930_v53, 16  ;;  %v8377_v19 = vsel %vm6314_vm7, 4294967295, %v8376_v19  ;;  %vm541_vm3 = vmor %vm6320_vm11, %vm6308_vm5 }
 0x13a   :  { %v749_v23 = vshrl.u32 %v4928_v22, 16  ;;  %v752_v54 = vshll.u32 %v4928_v22, 16  ;;  %v782_v49 = vld [vmem:[#allocation2] sm:$0xf]  ;;  %8378 = vst [vmem:[#allocation173_spill] sm:$0xff] %v8377_v19  ;;  %v746_v48 = vor.u32 %v744_v21, %v743_v50  ;;  %v747_v56 = vrot.slane %v743_v50, 4  ;;  %vm548_vm0 = vmand %vm538_vm2, %vm547_vm13 }
 0x13b   :  { %v758_v55 = vshrl.u32 %v4929_v52, 16  ;;  %v761_v24 = vshll.u32 %v4929_v52, 16  ;;  %v542_v52 = vld [vmem:[#allocation2 + $0x20] sm:$0x22]  ;;  %v769_v53 = vrot.slane %v767_v51, 7  ;;  %v4672_v51 = vld [vmem:[%s7985_s1 + $0x30] sm:$0xff]  ;;  %vm549_vm15 = vmor %vm548_vm0, %vm6357_vm14 }
 0x13c   :  { %v751_v20 = vrot.slane %v749_v23, 7  ;;  %v4670_v23 = vld [vmem:[%s7985_s1 + $0x20] sm:$0xff]  ;;  %v783_v50 = vsel %vm6302_vm4, %v746_v48, %v782_v49  ;;  %vm6372_vm2 = vmand %vm1025_vm8, %vm545_vm12  ;;  %vm1033_vm8 = vcmask 1041408  }
 0x13d   :  { %v760_v22 = vrot.slane %v758_v55, 7  ;;  %v772_v55 = vor.u32 %v770_v18, %v769_v53  ;;  %v774_v21 = vrot.slane %v769_v53, 4  ;;  %v4673_v18 = vld [vmem:[%s7985_s1 + $0x38] sm:$0xff]  ;;  %784 = vst [vmem:[#allocation2] sm:$0xf] %v783_v50  ;;  %v4937_v53 = vpack.c.bf16 %v4672_v51, %v4672_v51  ;;  %vm6382_vm5 = vmor %vm536_vm1, %vm979_vm9 }
 0x13e   :  { %v754_v26 = vor.u32 %v752_v54, %v751_v20  ;;  %v756_v27 = vrot.slane %v751_v20, 4  ;;  %v4671_v54 = vld [vmem:[%s7985_s1 + $0x28] sm:$0xff]  ;;  %vm6394_vm9 = vmand %vm1033_vm8, %vm536_vm1 }
 0x13f   :  { %v763_v58 = vor.u32 %v761_v24, %v760_v22  ;;  %v765_v59 = vrot.slane %v760_v22, 4  ;;  %v543_v24 = vsel %vm541_vm3, 0, %v542_v52  ;;  %v550_v22 = vld [vmem:[#allocation2 + $0x40] sm:$0x22]  ;;  %v1004_v51 = vshll.u32 %v4937_v53, 16 }
 0x140   :  { %v788_v28 = vld [vmem:[#allocation2 + $0x20] sm:$0x1]  ;;  %v755_v49 = vsel %vm6314_vm7, %v747_v56, %v754_v26  ;;  %544 = vst [vmem:[#allocation2 + $0x20] sm:$0x22] %v543_v24  ;;  %v556_v56 = vld [vmem:[#allocation3 + $0x8] sm:$0x22] }
 0x141   :  { %v764_v20 = vsel %vm6314_vm7, %v756_v27, %v763_v58  ;;  %v773_v52 = vsel %vm6314_vm7, %v765_v59, %v772_v55  ;;  %785 = vst [vmem:[#allocation2 + $0x8] sm:$0xf] %v755_v49  ;;  %v789_v48 = vsel %vm6272_vm6, %v774_v21, %v788_v28  ;;  %v553_v27 = vld [vmem:[#allocation3] sm:$0x22]  ;;  %v4935_v58 = vpack.c.bf16 %v4670_v23, %v4670_v23 }
 0x142   :  { %786 = vst [vmem:[#allocation2 + $0x10] sm:$0xf] %v764_v20  ;;  %787 = vst [vmem:[#allocation2 + $0x18] sm:$0xf] %v773_v52  ;;  %v554_v28 = vsel %vm541_vm3, 0, %v553_v27  ;;  %v4936_v59 = vpack.c.bf16 %v4671_v54, %v4671_v54  ;;  %v4938_v55 = vpack.c.bf16 %v4673_v18, %v4673_v18  ;;  %v551_v50 = vsel %vm549_vm15, 0, %v550_v22 }
 0x143   :  { %790 = vst [vmem:[#allocation2 + $0x20] sm:$0x1] %v789_v48  ;;  %555 = vst [vmem:[#allocation3] sm:$0x22] %v554_v28  ;;  %v982_v21 = vshrl.u32 %v4935_v58, 16  ;;  %v985_v23 = vshll.u32 %v4935_v58, 16  ;;  %v1103_v58 = vlaneseq }
 0x144   :  { %v557_v24 = vsel %vm549_vm15, 0, %v556_v56  ;;  %v991_v49 = vshrl.u32 %v4936_v59, 16  ;;  %552 = vst [vmem:[#allocation2 + $0x40] sm:$0x22] %v551_v50  ;;  %v994_v20 = vshll.u32 %v4936_v59, 16  ;;  %v1001_v52 = vshrl.u32 %v4937_v53, 16 }
 0x145   :  { %558 = vst [vmem:[#allocation3 + $0x8] sm:$0x22] %v557_v24  ;;  %v984_v57 = vrot.slane %v982_v21, 6  ;;  %v987_v16 = vrot.slane %v985_v23, 7  ;;  %v1011_v18 = vshrl.u32 %v4938_v55, 16  ;;  %v1014_v48 = vshll.u32 %v4938_v55, 16 }
 0x146   :  { %v993_v54 = vrot.slane %v991_v49, 6  ;;  %v996_v28 = vrot.slane %v994_v20, 7  ;;  %v1003_v29 = vrot.slane %v1001_v52, 6  ;;  %v8383_v22 = vmov 0 }
 0x147   :  { %v988_v26 = vor.u32 %v987_v16, %v984_v57  ;;  %v1027_v27 = vld [vmem:[#allocation2 + $0x20] sm:$0xe]  ;;  %v8384_v22 = vsel %vm6372_vm2, 4294967295, %v8383_v22  ;;  %v1006_v56 = vrot.slane %v1004_v51, 7  ;;  %v1013_v21 = vrot.slane %v1011_v18, 6 }
 0x148   :  { %8385 = vst [vmem:[#allocation174_spill] sm:$0xff] %v8384_v22  ;;  %v1016_v23 = vrot.slane %v1014_v48, 7  ;;  %v997_v50 = vor.u32 %v996_v28, %v993_v54  ;;  %v6378_v55 = vshrl.u32 %v1103_v58, 7  ;;  %v8159_v58 = vmov 0.0  }
 0x149   :  { %v989_v59 = vrot.slane %v988_v26, 4  ;;  %v1028_v53 = vsel %vm6372_vm2, %v988_v26, %v1027_v27  ;;  %v1007_v49 = vor.u32 %v1006_v56, %v1003_v29  ;;  %v8389_v29 = vmov 0 }
 0x14a   :  { %8386 = vst [vmem:[#allocation175_spill] sm:$0xff] %v6378_v55  ;;  %1029 = vst [vmem:[#allocation2 + $0x20] sm:$0xe] %v1028_v53  ;;  %v1017_v57 = vor.u32 %v1016_v23, %v1013_v21  ;;  %v999_v20 = vrot.slane %v997_v50, 4  ;;  %v1108_v52 = vadd.s32 32, %v6378_v55  ;;  %v1112_v54 = vadd.s32 64, %v6378_v55 }
 0x14b   :  { %v998_v16 = vsel %vm6382_vm5, %v989_v59, %v997_v50  ;;  %v1009_v51 = vrot.slane %v1007_v49, 4  ;;  %v1035_v48 = vld [vmem:[#allocation2 + $0x40] sm:$0x3]  ;;  %v8390_v29 = vsel %vm6394_vm9, 4294967295, %v8389_v29 }
 0x14c   :  { %v1019_v18 = vrot.slane %v1017_v57, 4  ;;  %1030 = vst [vmem:[#allocation2 + $0x28] sm:$0xf] %v998_v16  ;;  %v1008_v26 = vsel %vm6382_vm5, %v999_v20, %v1007_v49  ;;  %8391 = vst [vmem:[#allocation176_spill] sm:$0xff] %v8390_v29  ;;  %vm1144_vm11 = vcmp.ge.s32.totalorder %v1108_v52, 34  ;;  %vm1157_vm3 = vcmp.lt.s32.totalorder %v1112_v54, 66 }
 0x14d   :  { %v1018_v27 = vsel %vm6382_vm5, %v1009_v51, %v1017_v57  ;;  %1031 = vst [vmem:[#allocation2 + $0x30] sm:$0xf] %v1008_v26  ;;  %v6403_v56 = vsel %vm1144_vm11, 1.0, %v8159_v58  ;;  %v6406_v21 = vsel %vm1157_vm3, 1.0, %v8159_v58 }
 0x14e   :  { %v1036_v28 = vsel %vm6394_vm9, %v1019_v18, %v1035_v48  ;;  %8392 = vst [vmem:[#allocation177_spill] sm:$0xff] %v6403_v56  ;;  %8393 = vst [vmem:[#allocation178_spill] sm:$0xff] %v6406_v21  ;;  %v843_v56 = vld [vmem:[#allocation2 + $0x4] sm:$0xf] }
 0x14f   :  { %1032 = vst [vmem:[#allocation2 + $0x38] sm:$0xf] %v1018_v27  ;;  %1037 = vst [vmem:[#allocation2 + $0x40] sm:$0x3] %v1036_v28 }
 0x1ef   :  { %v5126_v23 = vpop.f32.mrf.mxu1 }
 0x1f0   :  { %v4933_v59 = vpack.c.bf16 %v5126_v23, %v5126_v23 }
 0x1f1   :  { %v707_v53 = vpop.f32.mrf.mxu1 }
 0x1f2   :  { %v821_v50 = vshrl.u32 %v4933_v59, 16  ;;  %v4931_v49 = vpack.c.bf16 %v707_v53, %v707_v53  ;;  %v824_v26 = vshll.u32 %v4933_v59, 16  ;;  %v849_v53 = vld [vmem:[#allocation2 + $0x24] sm:$0x1] }
 0x1f3   :  { %v5127_v16 = vpop.f32.mrf.mxu1 }
 0x1f4   :  { %v804_v57 = vshrl.u32 %v4931_v49, 16  ;;  %v4934_v20 = vpack.c.bf16 %v5127_v16, %v5127_v16  ;;  %v823_v52 = vrot.slane %v821_v50, 7  ;;  %v807_v18 = vshll.u32 %v4931_v49, 16 }
 0x1f5   :  { %v710_v54 = vpop.f32.mrf.mxu1 }
 0x1f6   :  { %v806_v51 = vrot.slane %v804_v57, 7  ;;  %v830_v48 = vshrl.u32 %v4934_v20, 16  ;;  %v4932_v55 = vpack.c.bf16 %v710_v54, %v710_v54  ;;  %v833_v28 = vshll.u32 %v4934_v20, 16 }
 0x1f7   :  { %v5144_v58 = vpop.f32.mrf.mxu0  ;;  %v826_v23 = vor.u32 %v824_v26, %v823_v52  ;;  %v828_v61 = vrot.slane %v823_v52, 4 }
 0x1f8   :  { %v809_v21 = vor.u32 %v807_v18, %v806_v51  ;;  %v832_v27 = vrot.slane %v830_v48, 7  ;;  %v4941_v60 = vpack.c.bf16 %v5144_v58, %v5144_v58  ;;  %v810_v30 = vrot.slane %v806_v51, 4 }
 0x1f9   :  { %v812_v31 = vshrl.u32 %v4932_v55, 16  ;;  %v947_v62 = vpop.f32.mrf.mxu0  ;;  %v815_v54 = vshll.u32 %v4932_v55, 16 }
 0x1fa   :  { %v844_v50 = vsel %vm6302_vm4, %v809_v21, %v843_v56  ;;  %v835_v16 = vor.u32 %v833_v28, %v832_v27  ;;  %v837_v49 = vrot.slane %v832_v27, 4  ;;  %v1070_v57 = vshrl.u32 %v4941_v60, 16 }
 0x1fb   :  { %845 = vst [vmem:[#allocation2 + $0x4] sm:$0xf] %v844_v50  ;;  %v814_v59 = vrot.slane %v812_v31, 7  ;;  %v1073_v63 = vshll.u32 %v4941_v60, 16  ;;  %v4939_v18 = vpack.c.bf16 %v947_v62, %v947_v62  ;;  %v5145_v48 = vpop.f32.mrf.mxu0 }
 0x1fc   :  { %v836_v58 = vsel %vm6314_vm7, %v828_v61, %v835_v16  ;;  %v850_v20 = vsel %vm6272_vm6, %v837_v49, %v849_v53  ;;  %v1072_v52 = vrot.slane %v1070_v57, 6  ;;  %v4942_v51 = vpack.c.bf16 %v5145_v48, %v5145_v48 }
 0x1fd   :  { %848 = vst [vmem:[#allocation2 + $0x1c] sm:$0xf] %v836_v58  ;;  %851 = vst [vmem:[#allocation2 + $0x24] sm:$0x1] %v850_v20  ;;  %v817_v56 = vor.u32 %v815_v54, %v814_v59  ;;  %v819_v21 = vrot.slane %v814_v59, 4  ;;  %v1075_v26 = vrot.slane %v1073_v63, 7  ;;  %v950_v28 = vpop.f32.mrf.mxu0 }
 0x1fe   :  { %v1051_v27 = vshrl.u32 %v4939_v18, 16  ;;  %v1054_v31 = vshll.u32 %v4939_v18, 16  ;;  %v1080_v55 = vshrl.u32 %v4942_v51, 16  ;;  %v1083_v60 = vshll.u32 %v4942_v51, 16  ;;  %v1094_v59 = vld [vmem:[#allocation2 + $0x24] sm:$0xe] }
 0x1ff   :  { %v4940_v62 = vpack.c.bf16 %v950_v28, %v950_v28  ;;  %v818_v50 = vsel %vm6314_vm7, %v810_v30, %v817_v56  ;;  %v827_v61 = vsel %vm6314_vm7, %v819_v21, %v826_v23  ;;  %v1076_v17 = vor.u32 %v1075_v26, %v1072_v52  ;;  %v1100_v51 = vld [vmem:[#allocation2 + $0x44] sm:$0x3] }
 0x200   :  { %v1053_v53 = vrot.slane %v1051_v27, 6  ;;  %846 = vst [vmem:[#allocation2 + $0xc] sm:$0xf] %v818_v50  ;;  %847 = vst [vmem:[#allocation2 + $0x14] sm:$0xf] %v827_v61  ;;  %v1056_v16 = vrot.slane %v1054_v31, 7  ;;  %v4708_v50 = vcombine.low %v5510_v46, %v5515_v47  ;;  %v4742_v61 = vcombine.low %v5350_v14, %v5355_v15 }
 0x201   :  { %v1082_v49 = vrot.slane %v1080_v55, 6  ;;  %v1085_v57 = vrot.slane %v1083_v60, 7  ;;  %v1060_v63 = vshrl.u32 %v4940_v62, 16  ;;  %v1063_v54 = vshll.u32 %v4940_v62, 16 }
 0x202   :  { %v1078_v18 = vrot.slane %v1076_v17, 4  ;;  %v1057_v48 = vor.u32 %v1056_v16, %v1053_v53  ;;  %v4709_v60 = vcombine.high %v5510_v46, %v5515_v47  ;;  %v4743_v62 = vcombine.high %v5350_v14, %v5355_v15 }
 0x203   :  { %v1086_v58 = vor.u32 %v1085_v57, %v1082_v49  ;;  %v1062_v20 = vrot.slane %v1060_v63, 6  ;;  %v1065_v28 = vrot.slane %v1063_v54, 7 }
 0x204   :  { %v1095_v30 = vsel %vm6372_vm2, %v1057_v48, %v1094_v59  ;;  %v1058_v56 = vrot.slane %v1057_v48, 4 }
 0x205   :  { %v1087_v23 = vsel %vm6382_vm5, %v1078_v18, %v1086_v58  ;;  %v1088_v52 = vrot.slane %v1086_v58, 4  ;;  %1096 = vst [vmem:[#allocation2 + $0x24] sm:$0xe] %v1095_v30  ;;  %v1066_v21 = vor.u32 %v1065_v28, %v1062_v20 }
 0x206   :  { %1099 = vst [vmem:[#allocation2 + $0x3c] sm:$0xf] %v1087_v23 }
 0x207   :  { %v1101_v26 = vsel %vm6394_vm9, %v1088_v52, %v1100_v51  ;;  %v1067_v27 = vsel %vm6382_vm5, %v1058_v56, %v1066_v21  ;;  %v1068_v31 = vrot.slane %v1066_v21, 4 }
 0x208   :  { %1102 = vst [vmem:[#allocation2 + $0x44] sm:$0x3] %v1101_v26  ;;  %1097 = vst [vmem:[#allocation2 + $0x2c] sm:$0xf] %v1067_v27 }
 0x209   :  { %v1077_v55 = vsel %vm6382_vm5, %v1068_v31, %v1076_v17 }
 0x20a   :  { %1098 = vst [vmem:[#allocation2 + $0x34] sm:$0xf] %v1077_v55 }
 0x20b   :  { %5196 = dma.done.wait [#allocation6], 12288 }
 0x20c   :  { %5197 = vsyncadd [#allocation6], 4294955008  ;;  %v4707_v53 = vcombine.high %v5500_v44, %v5505_v45  ;;  %v4741_v24 = vcombine.high %v5340_v12, %v5345_v13  ;;  %1563 = vmatprep.subr.bf16.mxu1 %v4709_v60  ;;  %1819 = vmatprep.subr.bf16.mxu0 %v4743_v62  ;;  %v4706_v17 = vcombine.low %v5500_v44, %v5505_v45  ;;  %vm1314_vm6 = vsmask.f32 7424  ;;  %v8396_v28 = vld [vmem:[#allocation26_spill] sm:$0xff]  ;;  %v8397_v30 = vld [vmem:[#allocation25_spill] sm:$0xff] }
 0x20d   :  { %1564 = vmatpush1.bf16.msra.mxu1 %v4708_v50  ;;  %1820 = vmatpush1.bf16.msra.mxu0 %v4742_v61  ;;  %v4740_v46 = vcombine.low %v5340_v12, %v5345_v13  ;;  %v4705_v14 = vcombine.high %v5490_v42, %v5495_v43  ;;  %v4739_v15 = vcombine.high %v5330_v10, %v5335_v11  ;;  %v8400_v56 = vld [vmem:[#allocation24_spill] sm:$0xff]  ;;  %v8401_v21 = vld [vmem:[#allocation23_spill] sm:$0xff]  ;;  %v8402_v60 = vld [vmem:[#allocation38_spill] sm:$0xff]  ;;  %vm1939_vm1 = vcmask 1046528  }
 0x20e   :  { %1565 = vmatprep.subr.bf16.mxu1 %v4707_v53  ;;  %1821 = vmatprep.subr.bf16.mxu0 %v4741_v24  ;;  %v4704_v47 = vcombine.low %v5490_v42, %v5495_v43  ;;  %v4738_v16 = vcombine.low %v5330_v10, %v5335_v11  ;;  %v4703_v12 = vcombine.high %v5480_v40, %v5485_v41  ;;  %v6464_v42 = vld [vmem:[#allocation2 + $0x14] ss:$8 sps:$4 sm:$0xff]   ;;  %v8403_v62 = vld [vmem:[#allocation37_spill] sm:$0xff]  ;;  %v8404_v61 = vld [vmem:[#allocation22_spill] sm:$0xff]  ;;  %vm2532_vm12 = vcmask 64512  }
 0x20f   :  { %v4737_v13 = vcombine.high %v5320_v8, %v5325_v9  ;;  %v4702_v44 = vcombine.low %v5480_v40, %v5485_v41  ;;  %v4736_v45 = vcombine.low %v5320_v8, %v5325_v9  ;;  %v4701_v10 = vcombine.high %v5470_v38, %v5475_v39  ;;  %v6470_v41 = vld [vmem:[#allocation2] sm:$0xff]  ;;  %v6472_v8 = vld [vmem:[#allocation2 + $0x8] sm:$0xff] }
 0x210   :  { %v4735_v11 = vcombine.high %v5310_v6, %v5315_v7  ;;  %v4700_v43 = vcombine.low %v5470_v38, %v5475_v39  ;;  %v4734_v40 = vcombine.low %v5310_v6, %v5315_v7  ;;  %v4699_v9 = vcombine.high %v5460_v36, %v5465_v37  ;;  %v1243_v55 = vld [vmem:[#allocation2 + $0x40] sm:$0x33] }
 0x211   :  { %1566 = vmatpush1.bf16.msra.mxu1 %v4706_v17  ;;  %1822 = vmatpush1.bf16.msra.mxu0 %v4740_v46  ;;  %v4733_v49 = vcombine.high %v5300_v4, %v5305_v5  ;;  %v4685_v57 = vcombine.high %v6470_v41, %v6472_v8  ;;  %v1335_v38 = vshll.u32 %v6464_v42, 16  ;;  %v4698_v6 = vcombine.low %v5460_v36, %v5465_v37  ;;  %v8405_v53 = vld [vmem:[#allocation21_spill] sm:$0xff] }
 0x212   :  { %1567 = vmatprep.subr.bf16.mxu1 %v4705_v14  ;;  %1823 = vmatprep.subr.bf16.mxu0 %v4739_v15  ;;  %v4732_v7 = vcombine.low %v5300_v4, %v5305_v5  ;;  %v4697_v39 = vcombine.high %v5450_v34, %v5455_v35  ;;  %v4731_v63 = vcombine.high %v5290_v2, %v5295_v3  ;;  %v1900_v46 = vld [vmem:[#allocation2] sm:$0xee]  ;;  %v8406_v15 = vld [vmem:[#allocation36_spill] sm:$0xff]  ;;  %vm2859_vm14 = vcmask 1047556  }
 0x213   :  { %v1328_v59 = vshrl.u32 %v4685_v57, 16  ;;  %v1330_v54 = vshll.u32 %v4685_v57, 16  ;;  %1851 = vmatprep.mubr.bf16.mxu0 %v4685_v57  ;;  %v6489_v48 = vrot.slane %v1335_v38, 1  ;;  %v4696_v36 = vcombine.low %v5450_v34, %v5455_v35  ;;  %v8395_v35 = vld [vmem:[#allocation41_spill] sm:$0xff] }
 0x214   :  { %v4730_v4 = vcombine.low %v5290_v2, %v5295_v3  ;;  %v4695_v5 = vcombine.high %v5440_v32, %v5445_v33  ;;  %v4729_v37 = vcombine.high %v5280_v0, %v5285_v1  ;;  %v4694_v34 = vcombine.low %v5440_v32, %v5445_v33  ;;  %v8394_v3 = vld [vmem:[#allocation42_spill] sm:$0xff] }
 0x215   :  { %1568 = vmatpush1.bf16.msra.mxu1 %v4704_v47  ;;  %1824 = vmatpush1.bf16.msra.mxu0 %v4738_v16  ;;  %v1332_v18 = vrot.slane %v1330_v54, 1  ;;  %v4728_v2 = vcombine.low %v5280_v0, %v5285_v1  ;;  %v4725_v51 = vcombine.high %v8395_v35, %v8394_v3  ;;  %v4759_v23 = vcombine.high %v8397_v30, %v8396_v28  ;;  %v8398_v0 = vld [vmem:[#allocation40_spill] sm:$0xff]  ;;  %v8399_v1 = vld [vmem:[#allocation39_spill] sm:$0xff] }
 0x216   :  { %1569 = vmatprep.subr.bf16.mxu1 %v4703_v12  ;;  %1825 = vmatprep.subr.bf16.mxu0 %v4737_v13  ;;  %v4724_v52 = vcombine.low %v8395_v35, %v8394_v3  ;;  %v4758_v32 = vcombine.low %v8397_v30, %v8396_v28  ;;  %v4723_v33 = vcombine.high %v8399_v1, %v8398_v0  ;;  %v8407_v47 = vld [vmem:[#allocation35_spill] sm:$0xff]  ;;  %v8408_v12 = vld [vmem:[#allocation20_spill] sm:$0xff]  ;;  %vm2946_vm0 = vcmask 1047557  }
 0x217   :  { %v1333_v58 = vor.u32 %v1332_v18, %v1328_v59  ;;  %v4757_v26 = vcombine.high %v8401_v21, %v8400_v56  ;;  %v4722_v27 = vcombine.low %v8399_v1, %v8398_v0  ;;  %v4756_v31 = vcombine.low %v8401_v21, %v8400_v56  ;;  %v8409_v13 = vld [vmem:[#allocation19_spill] sm:$0xff]  ;;  %v8412_v0 = vld [vmem:[#allocation18_spill] sm:$0xff]  ;;  %v8413_v1 = vld [vmem:[#allocation17_spill] sm:$0xff] }
 0x218   :  { %v4721_v50 = vcombine.high %v8403_v62, %v8402_v60  ;;  %v4755_v24 = vcombine.high %v8405_v53, %v8404_v61  ;;  %v4720_v17 = vcombine.low %v8403_v62, %v8402_v60  ;;  %v4754_v14 = vcombine.low %v8405_v53, %v8404_v61  ;;  %v8416_v60 = vld [vmem:[#allocation16_spill] sm:$0xff]  ;;  %v8417_v62 = vld [vmem:[#allocation15_spill] sm:$0xff]  ;;  %vm7175_vm3 = vmand %vm2946_vm0, %vm547_vm13 }
 0x219   :  { %1570 = vmatpush1.bf16.msra.mxu1 %v4702_v44  ;;  %1826 = vmatpush1.bf16.msra.mxu0 %v4736_v45  ;;  %v1338_v20 = vsel %vm1314_vm6, %v1333_v58, %v6489_v48  ;;  %v4719_v16 = vcombine.high %v8407_v47, %v8406_v15  ;;  %v4753_v44 = vcombine.high %v8409_v13, %v8408_v12  ;;  %vm8490_vm15 = vsmask.f32 7954 }
 0x21a   :  { %1571 = vmatprep.subr.bf16.mxu1 %v4701_v10  ;;  %1827 = vmatprep.subr.bf16.mxu0 %v4735_v11  ;;  %v4718_v45 = vcombine.low %v8407_v47, %v8406_v15  ;;  %v6535_v10 = vld [vmem:[#allocation2 + $0x10] ss:$8 sps:$4 sm:$0xff]   ;;  %v6537_v11 = vld [vmem:[#allocation2 + $0x24] ss:$8 sps:$4 sm:$0xff]   ;;  %v6547_v57 = vcombine.high %v1243_v55, %v1243_v55  ;;  %v6549_v38 = vcombine.low %v1243_v55, %v1243_v55  ;;  %vm7165_vm5 = vmand %vm2859_vm14, %vm8490_vm15  ;;  %vm2955_vm13 = vcmask 1045508  }
 0x21b   :  { %1595 = vmatprep.mubr.bf16.mxu1 %v1338_v20  ;;  %v1948_v59 = vrot.slane %v6537_v11, 1  ;;  %v4750_v21 = vcombine.low %v8413_v1, %v8412_v0  ;;  %v4748_v53 = vcombine.low %v8417_v62, %v8416_v60  ;;  %v1323_v47 = vshll.u32 %v6535_v10, 16  ;;  %vm2861_vm11 = vmor %vm7165_vm5, %vm6302_vm4 }
 0x21c   :  { %v1954_v20 = vrot.slane %v6549_v38, 1  ;;  %vm2948_vm4 = vmor %vm7175_vm3, %vm6372_vm2 }
 0x21d   :  { %1572 = vmatpush1.bf16.msra.mxu1 %v4700_v43  ;;  %1828 = vmatpush1.bf16.msra.mxu0 %v4734_v40  ;;  %v6539_v43 = vld [vmem:[#allocation2 + $0x20] ss:$8 sps:$4 sm:$0xff]   ;;  %v4752_v40 = vcombine.low %v8409_v13, %v8408_v12 }
 0x21e   :  { %1573 = vmatprep.subr.bf16.mxu1 %v4699_v9  ;;  %1829 = vmatprep.subr.bf16.mxu0 %v4733_v49  ;;  %v6543_v9 = vld [vmem:[#allocation2 + $0x34] ss:$8 sps:$4 sm:$0xff]   ;;  %v6545_v49 = vld [vmem:[#allocation2 + $0x30] ss:$8 sps:$4 sm:$0xff]   ;;  %v1946_v54 = vrot.slane %v6539_v43, 1 }
 0x21f   :  { %v1952_v18 = vrot.slane %v6543_v9, 1 }
 0x221   :  { %1574 = vmatpush1.bf16.msra.mxu1 %v4698_v6  ;;  %1830 = vmatpush1.bf16.msra.mxu0 %v4732_v7  ;;  %v1944_v6 = vrot.slane %v6464_v42, 1  ;;  %v4760_v7 = vcombine.low %v1900_v46, %v6472_v8 }
 0x222   :  { %1575 = vmatprep.subr.bf16.mxu1 %v4697_v39  ;;  %1831 = vmatprep.subr.bf16.mxu0 %v4731_v63  ;;  %v4761_v39 = vcombine.high %v1900_v46, %v6472_v8  ;;  %v1941_v63 = vrot.slane %v6535_v10, 1  ;;  %v8420_v46 = vld [vmem:[#allocation14_spill] sm:$0xff] }
 0x223   :  { %v6561_v58 = vsel %vm1939_vm1, %v1944_v6, %v1948_v59 }
 0x225   :  { %1576 = vmatpush1.bf16.msra.mxu1 %v4696_v36  ;;  %1832 = vmatpush1.bf16.msra.mxu0 %v4730_v4  ;;  %v1950_v36 = vrot.slane %v6545_v49, 1  ;;  %v1956_v4 = vrot.slane %v6547_v57, 1 }
 0x226   :  { %1577 = vmatprep.subr.bf16.mxu1 %v4695_v5  ;;  %1833 = vmatprep.subr.bf16.mxu0 %v4729_v37  ;;  %v1940_v5 = vrot.slane %v4760_v7, 1  ;;  %v1943_v37 = vrot.slane %v4761_v39, 1  ;;  %v8424_v7 = vld [vmem:[#allocation12_spill] sm:$0xff]  ;;  %v8425_v39 = vld [vmem:[#allocation11_spill] sm:$0xff] }
 0x227   :  { %v6571_v3 = vsel %vm1939_vm1, %v1946_v54, %v1950_v36  ;;  %v6576_v35 = vsel %vm1939_vm1, %v1952_v18, %v1956_v4  ;;  %v6587_v30 = vsel %vm1939_vm1, %v1950_v36, %v1954_v20  ;;  %v4744_v36 = vcombine.low %v8425_v39, %v8424_v7 }
 0x228   :  { %v6582_v28 = vsel %vm1939_vm1, %v1940_v5, %v1941_v63 }
 0x229   :  { %1578 = vmatpush1.bf16.msra.mxu1 %v4694_v34  ;;  %1834 = vmatpush1.bf16.msra.mxu0 %v4728_v2  ;;  %v6565_v34 = vsel %vm1939_vm1, %v1941_v63, %v1946_v54  ;;  %v6568_v2 = vsel %vm1939_vm1, %v1948_v59, %v1952_v18  ;;  %v4745_v63 = vcombine.high %v8425_v39, %v8424_v7  ;;  %v1347_v59 = vshrl.u32 %v6464_v42, 16 }
 0x22a   :  { %1579 = vmatprep.subr.bf16.mxu1 %v4725_v51  ;;  %1835 = vmatprep.subr.bf16.mxu0 %v4759_v23  ;;  %v6579_v51 = vsel %vm1939_vm1, %v1943_v37, %v1944_v6  ;;  %v8410_v23 = vld [vmem:[#allocation34_spill] sm:$0xff]  ;;  %v1351_v54 = vshll.u32 %v6537_v11, 16  ;;  %v1325_v37 = vrot.slane %v1323_v47, 1  ;;  %v1355_v47 = vshrl.u32 %v6539_v43, 16 }
 0x22d   :  { %1580 = vmatpush2.bf16.msra.mxu1 %v4724_v52  ;;  %1836 = vmatpush2.bf16.msra.mxu0 %v4758_v32  ;;  %v8411_v52 = vld [vmem:[#allocation33_spill] sm:$0xff] }
 0x22e   :  { %1581 = vmatprep.subr.bf16.mxu1 %v4723_v33  ;;  %1837 = vmatprep.subr.bf16.mxu0 %v4757_v26  ;;  %v4717_v32 = vcombine.high %v8411_v52, %v8410_v23  ;;  %v4751_v33 = vcombine.high %v8413_v1, %v8412_v0  ;;  %v4716_v56 = vcombine.low %v8411_v52, %v8410_v23  ;;  %v8426_v23 = vld [vmem:[#allocation58_spill] sm:$0xff]  ;;  %v8427_v52 = vld [vmem:[#allocation57_spill] sm:$0xff]  ;;  %v1353_v1 = vrot.slane %v1351_v54, 1 }
 0x22f   :  { %v4684_v26 = vcombine.low %v6470_v41, %v6472_v8  ;;  %v8418_v41 = vld [vmem:[#allocation30_spill] sm:$0xff]  ;;  %v8419_v8 = vld [vmem:[#allocation29_spill] sm:$0xff]  ;;  %v1349_v0 = vor.u32 %v1347_v59, %v6489_v48  ;;  %v1363_v48 = vshrl.u32 %v6537_v11, 16 }
 0x230   :  { %v8435_v59 = vld [vmem:[#allocation49_spill] sm:$0xff] }
 0x231   :  { %1582 = vmatpush2.bf16.msra.mxu1 %v4722_v27  ;;  %1838 = vmatpush2.bf16.msra.mxu0 %v4756_v31  ;;  %v8414_v27 = vld [vmem:[#allocation32_spill] sm:$0xff]  ;;  %v8415_v31 = vld [vmem:[#allocation31_spill] sm:$0xff]  ;;  %v1316_v13 = vshrl.u32 %v4684_v26, 16 }
 0x232   :  { %1583 = vmatprep.subr.bf16.mxu1 %v4721_v50  ;;  %1839 = vmatprep.subr.bf16.mxu0 %v4755_v24  ;;  %v4715_v55 = vcombine.high %v8415_v31, %v8414_v27  ;;  %v4749_v50 = vcombine.high %v8417_v62, %v8416_v60  ;;  %v4714_v61 = vcombine.low %v8415_v31, %v8414_v27  ;;  %v1318_v24 = vshll.u32 %v4684_v26, 16  ;;  %v8428_v31 = vld [vmem:[#allocation56_spill] sm:$0xff] }
 0x233   :  { %v1343_v27 = vshll.u32 %v6539_v43, 16  ;;  %v1354_v62 = vsel %vm1314_vm6, %v1349_v0, %v1353_v1 }
 0x235   :  { %1584 = vmatpush2.bf16.msra.mxu1 %v4720_v17  ;;  %1840 = vmatpush2.bf16.msra.mxu0 %v4754_v14  ;;  %v4713_v17 = vcombine.high %v8419_v8, %v8418_v41  ;;  %v8421_v14 = vld [vmem:[#allocation13_spill] sm:$0xff] }
 0x236   :  { %1585 = vmatprep.subr.bf16.mxu1 %v4719_v16  ;;  %1841 = vmatprep.subr.bf16.mxu0 %v4753_v44  ;;  %v4747_v15 = vcombine.high %v8421_v14, %v8420_v46  ;;  %v4712_v16 = vcombine.low %v8419_v8, %v8418_v41  ;;  %v4746_v12 = vcombine.low %v8421_v14, %v8420_v46  ;;  %v1320_v44 = vrot.slane %v1318_v24, 1  ;;  %v8430_v41 = vld [vmem:[#allocation54_spill] sm:$0xff]  ;;  %v8431_v8 = vld [vmem:[#allocation53_spill] sm:$0xff] }
 0x237   :  { %v1345_v24 = vrot.slane %v1343_v27, 1  ;;  %v1365_v46 = vor.u32 %v1363_v48, %v1353_v1  ;;  %v8438_v27 = vld [vmem:[#allocation46_spill] sm:$0xff] }
 0x238   :  { %v1321_v5 = vor.u32 %v1320_v44, %v1316_v13  ;;  %v8433_v13 = vld [vmem:[#allocation51_spill] sm:$0xff] }
 0x239   :  { %1586 = vmatpush2.bf16.msra.mxu1 %v4718_v45  ;;  %1842 = vmatpush2.bf16.msra.mxu0 %v4752_v40  ;;  %v8422_v45 = vld [vmem:[#allocation28_spill] sm:$0xff]  ;;  %v8423_v40 = vld [vmem:[#allocation27_spill] sm:$0xff]  ;;  %v1357_v7 = vor.u32 %v1355_v47, %v1345_v24 }
 0x23a   :  { %1587 = vmatprep.subr.bf16.mxu1 %v4717_v32  ;;  %1843 = vmatprep.subr.bf16.mxu0 %v4751_v33  ;;  %v4711_v6 = vcombine.high %v8423_v40, %v8422_v45  ;;  %v4710_v18 = vcombine.low %v8423_v40, %v8422_v45  ;;  %v4777_v32 = vcombine.high %v8427_v52, %v8426_v23  ;;  %v1383_v40 = vshll.u32 %v6547_v57, 16  ;;  %v8445_v47 = vld [vmem:[#allocation71_spill] sm:$0xff] }
 0x23b   :  { %v1326_v33 = vsel %vm1314_vm6, %v1321_v5, %v1325_v37 }
 0x23d   :  { %1588 = vmatpush2.bf16.msra.mxu1 %v4716_v56  ;;  %1844 = vmatpush2.bf16.msra.mxu0 %v4750_v21  ;;  %v4776_v56 = vcombine.low %v8427_v52, %v8426_v23  ;;  %v1339_v21 = vshrl.u32 %v6535_v10, 16  ;;  %v1375_v23 = vshll.u32 %v6549_v38, 16  ;;  %v8436_v52 = vld [vmem:[#allocation48_spill] sm:$0xff] }
 0x23e   :  { %1589 = vmatprep.subr.bf16.mxu1 %v4715_v55  ;;  %1845 = vmatprep.subr.bf16.mxu0 %v4749_v50  ;;  %v8429_v55 = vld [vmem:[#allocation55_spill] sm:$0xff]  ;;  %v1367_v50 = vshll.u32 %v6543_v9, 16 }
 0x23f   :  { %v4775_v60 = vcombine.high %v8429_v55, %v8428_v31 }
 0x240   :  { %v1369_v14 = vrot.slane %v1367_v50, 1  ;;  %v8440_v50 = vld [vmem:[#allocation44_spill] sm:$0xff] }
 0x241   :  { %1590 = vmatpush2.bf16.msra.mxu1 %v4714_v61  ;;  %1846 = vmatpush2.bf16.msra.mxu0 %v4748_v53  ;;  %v4774_v61 = vcombine.low %v8429_v55, %v8428_v31  ;;  %v1341_v53 = vor.u32 %v1339_v21, %v1325_v37  ;;  %v1371_v37 = vshrl.u32 %v6545_v49, 16  ;;  %v1390_v21 = vshrl.u32 %v6547_v57, 16  ;;  %v8439_v31 = vld [vmem:[#allocation45_spill] sm:$0xff]  ;;  %v6743_v57 = vld [vmem:[%s7990_s6 + $0xf0] sm:$0xff] }
 0x242   :  { %1591 = vmatprep.subr.bf16.mxu1 %v4713_v17  ;;  %1847 = vmatprep.subr.bf16.mxu0 %v4747_v15  ;;  %v4773_v17 = vcombine.high %v8431_v8, %v8430_v41  ;;  %v4772_v15 = vcombine.low %v8431_v8, %v8430_v41  ;;  %v1370_v45 = vsel %vm1314_vm6, %v1365_v46, %v1369_v14  ;;  %v1387_v41 = vshrl.u32 %v6549_v38, 16  ;;  %v8442_v8 = vld [vmem:[#allocation74_spill] sm:$0xff]  ;;  %v6749_v38 = vld [vmem:[%s7990_s6 + $0x70] sm:$0xff] }
 0x243   :  { %v4765_v55 = vcombine.high %v8439_v31, %v8438_v27 }
 0x245   :  { %1592 = vmatpush2.bf16.msra.mxu1 %v4712_v16  ;;  %1848 = vmatpush2.bf16.msra.mxu0 %v4746_v12  ;;  %v1359_v16 = vshll.u32 %v6545_v49, 16  ;;  %v8432_v12 = vld [vmem:[#allocation52_spill] sm:$0xff] }
 0x246   :  { %1593 = vmatprep.subr.bf16.mxu1 %v4711_v6  ;;  %1849 = vmatprep.subr.bf16.mxu0 %v4745_v63  ;;  %v4771_v44 = vcombine.high %v8433_v13, %v8432_v12  ;;  %v4770_v6 = vcombine.low %v8433_v13, %v8432_v12  ;;  %v8434_v63 = vld [vmem:[#allocation50_spill] sm:$0xff] }
 0x247   :  { %v1361_v39 = vrot.slane %v1359_v16, 1  ;;  %v4769_v54 = vcombine.high %v8435_v59, %v8434_v63  ;;  %v4768_v5 = vcombine.low %v8435_v59, %v8434_v63  ;;  %v8446_v13 = vld [vmem:[#allocation70_spill] sm:$0xff]  ;;  %v8451_v59 = vld [vmem:[#allocation65_spill] sm:$0xff] }
 0x248   :  { %v8450_v63 = vld [vmem:[#allocation66_spill] sm:$0xff] }
 0x249   :  { %1594 = vmatpush2.bf16.msra.mxu1 %v4710_v18  ;;  %1850 = vmatpush2.bf16.msra.mxu0 %v4744_v36  ;;  %v1385_v36 = vrot.slane %v1383_v40, 1  ;;  %v8448_v40 = vld [vmem:[#allocation68_spill] sm:$0xff] }
 0x24a   :  { %2128 = vmatprep.subr.bf16.mxu1 %v4777_v32  ;;  %v8437_v32 = vld [vmem:[#allocation47_spill] sm:$0xff] }
 0x24b   :  { %v4767_v0 = vcombine.high %v8437_v32, %v8436_v52  ;;  %v1392_v48 = vor.u32 %v1390_v21, %v1385_v36  ;;  %v6803_v21 = vld [vmem:[%s7990_s6 + $0xc8] sm:$0xff] }
 0x24c   :  { %1596 = vmatmul.mubr.bf16.vlgmr.msra.gmra.mxu1 %v1326_v33  ;;  %1852 = vmatmul.mubr.bf16.vlgmr.msra.gmra.mxu0 %v4684_v26  ;;  %v1346_v26 = vsel %vm1314_vm6, %v1341_v53, %v1345_v24  ;;  %v1373_v33 = vor.u32 %v1371_v37, %v1361_v39  ;;  %v8454_v37 = vld [vmem:[#allocation62_spill] sm:$0xff] }
 0x24d   :  { %2129 = vmatpush1.bf16.msra.mxu1 %v4776_v56  ;;  %1605 = vmatprep.mubr.bf16.mxu1 %v1354_v62  ;;  %v1377_v56 = vrot.slane %v1375_v23, 1  ;;  %v8455_v23 = vld [vmem:[#allocation61_spill] sm:$0xff] }
 0x24e   :  { %2130 = vmatprep.subr.bf16.mxu1 %v4775_v60  ;;  %1861 = vmatprep.mubr.bf16.mxu0 %v6464_v42  ;;  %v1379_v42 = vshrl.u32 %v6543_v9, 16  ;;  %v1210_v60 = vld [vmem:[#allocation2 + $0x40] sm:$0x11] }
 0x24f   :  { %v1378_v62 = vsel %vm1314_vm6, %v1373_v33, %v1377_v56  ;;  %v4727_v24 = vcombine.high %v1210_v60, %v1210_v60 }
 0x250   :  { %v1381_v18 = vor.u32 %v1379_v42, %v1369_v14  ;;  %v1389_v14 = vor.u32 %v1387_v41, %v1377_v56  ;;  %v6797_v56 = vld [vmem:[%s7990_s6 + $0x50] sm:$0xff]  ;;  %v6874_v41 = vld [vmem:[%s7990_s6 + $0x98] sm:$0xff] }
 0x251   :  { %2131 = vmatpush1.bf16.msra.mxu1 %v4774_v61  ;;  %v8441_v61 = vld [vmem:[#allocation43_spill] sm:$0xff]  ;;  %8459 = vst [vmem:[#allocation41_spill] sm:$0xff] %v6874_v41 }
 0x252   :  { %2132 = vmatprep.subr.bf16.mxu1 %v4773_v17  ;;  %v1386_v1 = vsel %vm1314_vm6, %v1381_v18, %v1385_v36  ;;  %v4763_v53 = vcombine.high %v8441_v61, %v8440_v50  ;;  %v8443_v17 = vld [vmem:[#allocation73_spill] sm:$0xff]  ;;  %v8452_v18 = vld [vmem:[#allocation64_spill] sm:$0xff]  ;;  %v8453_v36 = vld [vmem:[#allocation63_spill] sm:$0xff] }
 0x253   :  { %v4793_v46 = vcombine.high %v8443_v17, %v8442_v8 }
 0x254   :  { %1606 = vmatmul.mubr.bf16.gmra.mxu1 %v1346_v26  ;;  %1862 = vmatmul.mubr.bf16.gmra.mxu0 %v6535_v10  ;;  %v1362_v10 = vsel %vm1314_vm6, %v1357_v7, %v1361_v39  ;;  %v4792_v26 = vcombine.low %v8443_v17, %v8442_v8  ;;  %v6885_v8 = vld [vmem:[%s7990_s6 + $0x90] sm:$0xff] }
 0x255   :  { %2133 = vmatpush1.bf16.msra.mxu1 %v4772_v15  ;;  %1615 = vmatprep.mubr.bf16.mxu1 %v1370_v45  ;;  %v4726_v15 = vcombine.low %v1210_v60, %v1210_v60  ;;  %v6827_v60 = vld [vmem:[%s7990_s6 + $0xb8] sm:$0xff]  ;;  %8461 = vst [vmem:[#allocation25_spill] sm:$0xff] %v6885_v8  ;;  %v6891_v17 = vld [vmem:[%s7990_s6 + $0x10] sm:$0xff] }
 0x256   :  { %2134 = vmatprep.subr.bf16.mxu1 %v4771_v44  ;;  %1871 = vmatprep.mubr.bf16.mxu0 %v6537_v11  ;;  %v4766_v11 = vcombine.low %v8437_v32, %v8436_v52  ;;  %v8447_v44 = vld [vmem:[#allocation69_spill] sm:$0xff]  ;;  %v4781_v52 = vcombine.high %v8455_v23, %v8454_v37  ;;  %v4780_v32 = vcombine.low %v8455_v23, %v8454_v37 }
 0x257   :  { %v4789_v45 = vcombine.high %v8447_v44, %v8446_v13  ;;  %v4788_v42 = vcombine.low %v8447_v44, %v8446_v13  ;;  %8462 = vst [vmem:[#allocation40_spill] sm:$0xff] %v6891_v17 }
 0x259   :  { %2135 = vmatpush1.bf16.msra.mxu1 %v4770_v6  ;;  %v8449_v6 = vld [vmem:[#allocation67_spill] sm:$0xff] }
 0x25a   :  { %2136 = vmatprep.subr.bf16.mxu1 %v4769_v54  ;;  %v4787_v7 = vcombine.high %v8449_v6, %v8448_v40  ;;  %v4786_v39 = vcombine.low %v8449_v6, %v8448_v40  ;;  %v4784_v54 = vcombine.low %v8451_v59, %v8450_v63 }
 0x25c   :  { %1616 = vmatmul.mubr.bf16.gmra.mxu1 %v1362_v10  ;;  %1872 = vmatmul.mubr.bf16.gmra.mxu0 %v6539_v43  ;;  %v4764_v43 = vcombine.low %v8439_v31, %v8438_v27  ;;  %v4782_v10 = vcombine.low %v8453_v36, %v8452_v18  ;;  %v6809_v27 = vld [vmem:[%s7990_s6 + $0x48] sm:$0xff]  ;;  %v6815_v31 = vld [vmem:[%s7990_s6 + $0xc0] sm:$0xff] }
 0x25d   :  { %2137 = vmatpush1.bf16.msra.mxu1 %v4768_v5  ;;  %1625 = vmatprep.mubr.bf16.mxu1 %v1386_v1  ;;  %v4783_v5 = vcombine.high %v8453_v36, %v8452_v18  ;;  %v8457_v1 = vld [vmem:[#allocation59_spill] sm:$0xff] }
 0x25e   :  { %2138 = vmatprep.subr.bf16.mxu1 %v4767_v0  ;;  %1881 = vmatprep.mubr.bf16.mxu0 %v6543_v9  ;;  %v4762_v9 = vcombine.low %v8441_v61, %v8440_v50  ;;  %v8456_v0 = vld [vmem:[#allocation60_spill] sm:$0xff]  ;;  %v6851_v50 = vld [vmem:[%s7990_s6 + $0xa8] sm:$0xff] }
 0x25f   :  { %v4778_v33 = vcombine.low %v8457_v1, %v8456_v0  ;;  %v6857_v61 = vld [vmem:[%s7990_s6 + $0x28] sm:$0xff] }
 0x261   :  { %2139 = vmatpush1.bf16.msra.mxu1 %v4766_v11  ;;  %v4779_v11 = vcombine.high %v8457_v1, %v8456_v0 }
 0x262   :  { %2140 = vmatprep.subr.bf16.mxu1 %v4765_v55  ;;  %v6821_v55 = vld [vmem:[%s7990_s6 + $0x40] sm:$0xff] }
 0x264   :  { %1626 = vmatmul.mubr.bf16.gmra.mxu1 %v1378_v62  ;;  %1882 = vmatmul.mubr.bf16.gmra.mxu0 %v6545_v49  ;;  %v8444_v49 = vld [vmem:[#allocation72_spill] sm:$0xff]  ;;  %v6839_v62 = vld [vmem:[%s7990_s6 + $0xb0] sm:$0xff] }
 0x265   :  { %2141 = vmatpush1.bf16.msra.mxu1 %v4764_v43  ;;  %1635 = vmatprep.mubr.bf16.mxu1 %v1392_v48  ;;  %v4791_v16 = vcombine.high %v8445_v47, %v8444_v49  ;;  %v4790_v12 = vcombine.low %v8445_v47, %v8444_v49  ;;  %v6833_v43 = vld [vmem:[%s7990_s6 + $0x38] sm:$0xff]  ;;  %v6845_v48 = vld [vmem:[%s7990_s6 + $0x30] sm:$0xff] }
 0x266   :  { %2142 = vmatprep.subr.bf16.mxu1 %v4763_v53  ;;  %1891 = vmatprep.mubr.bf16.mxu0 %v4727_v24  ;;  %v6863_v53 = vld [vmem:[%s7990_s6 + $0xa0] sm:$0xff] }
 0x267   :  { %v6869_v24 = vld [vmem:[%s7990_s6 + $0x20] sm:$0xff] }
 0x268   :  { %8458 = vst [vmem:[#allocation42_spill] sm:$0xff] %v6869_v24 }
 0x269   :  { %2143 = vmatpush1.bf16.msra.mxu1 %v4762_v9  ;;  %v6879_v9 = vld [vmem:[%s7990_s6 + $0x18] sm:$0xff] }
 0x26a   :  { %2144 = vmatprep.subr.bf16.mxu1 %v4793_v46  ;;  %8460 = vst [vmem:[#allocation26_spill] sm:$0xff] %v6879_v9  ;;  %v6897_v46 = vld [vmem:[%s7990_s6 + $0x88] sm:$0xff] }
 0x26b   :  { %8463 = vst [vmem:[#allocation39_spill] sm:$0xff] %v6897_v46 }
 0x26c   :  { %1636 = vmatmul.mubr.bf16.gmra.mxu1 %v1389_v14  ;;  %1892 = vmatmul.mubr.bf16.gmra.mxu0 %v4726_v15  ;;  %v6903_v14 = vld [vmem:[%s7990_s6 + $0x8] sm:$0xff]  ;;  %v6909_v15 = vld [vmem:[%s7990_s6 + $0x80] sm:$0xff] }
 0x26d   :  { %2145 = vmatpush2.bf16.msra.mxu1 %v4792_v26  ;;  %2160 = vmatprep.mubr.bf16.mxu1 %v6579_v51  ;;  %v4785_v51 = vcombine.high %v8451_v59, %v8450_v63  ;;  %8464 = vst [vmem:[#allocation24_spill] sm:$0xff] %v6903_v14  ;;  %8465 = vst [vmem:[#allocation23_spill] sm:$0xff] %v6909_v15  ;;  %v6915_v26 = vld [vmem:[%s7990_s6] sm:$0xff] }
 0x26e   :  { %2146 = vmatprep.subr.bf16.mxu1 %v4791_v16  ;;  %8466 = vst [vmem:[#allocation38_spill] sm:$0xff] %v6915_v26 }
 0x271   :  { %2147 = vmatpush2.bf16.msra.mxu1 %v4790_v12 }
 0x272   :  { %2148 = vmatprep.subr.bf16.mxu1 %v4789_v45 }
 0x275   :  { %2149 = vmatpush2.bf16.msra.mxu1 %v4788_v42 }
 0x276   :  { %2150 = vmatprep.subr.bf16.mxu1 %v4787_v7 }
 0x279   :  { %2151 = vmatpush2.bf16.msra.mxu1 %v4786_v39 }
 0x27a   :  { %2152 = vmatprep.subr.bf16.mxu1 %v4785_v51 }
 0x27d   :  { %2153 = vmatpush2.bf16.msra.mxu1 %v4784_v54 }
 0x27e   :  { %2154 = vmatprep.subr.bf16.mxu1 %v4783_v5 }
 0x281   :  { %2155 = vmatpush2.bf16.msra.mxu1 %v4782_v10 }
 0x282   :  { %2156 = vmatprep.subr.bf16.mxu1 %v4781_v52 }
 0x285   :  { %2157 = vmatpush2.bf16.msra.mxu1 %v4780_v32 }
 0x286   :  { %2158 = vmatprep.subr.bf16.mxu1 %v4779_v11 }
 0x289   :  { %2159 = vmatpush2.bf16.msra.mxu1 %v4778_v33 }
 0x28c   :  { %2161 = vmatmul.mubr.bf16.vlgmr.msra.gmra.mxu1 %v6582_v28  ;;  %v6785_v28 = vld [vmem:[%s7990_s6 + $0x58] sm:$0xff] }
 0x28d   :  { %2170 = vmatprep.mubr.bf16.mxu1 %v6561_v58  ;;  %v6731_v58 = vld [vmem:[%s7990_s6 + $0xf8] sm:$0xff] }
 0x28e   :  { %4970 = vmatprep.subr.mxu0 %v6731_v58 }
 0x294   :  { %2171 = vmatmul.mubr.bf16.gmra.mxu1 %v6565_v34  ;;  %v6737_v34 = vld [vmem:[%s7990_s6 + $0x78] sm:$0xff] }
 0x295   :  { %2180 = vmatprep.mubr.bf16.mxu1 %v6568_v2  ;;  %4971 = vmatpush3.msra.mxu0 %v6737_v34  ;;  %v6767_v2 = vld [vmem:[%s7990_s6 + $0xe0] sm:$0xff] }
 0x296   :  { %4972 = vmatprep.subr.mxu0 %v6743_v57 }
 0x297   :  { %4973 = vmatpush3.msra.mxu0 %v6749_v38 }
 0x29c   :  { %2181 = vmatmul.mubr.bf16.gmra.mxu1 %v6571_v3  ;;  %v6773_v3 = vld [vmem:[%s7990_s6 + $0x60] sm:$0xff] }
 0x29d   :  { %2190 = vmatprep.mubr.bf16.mxu1 %v6576_v35  ;;  %v6779_v35 = vld [vmem:[%s7990_s6 + $0xd8] sm:$0xff] }
 0x2a4   :  { %2191 = vmatmul.mubr.bf16.gmra.mxu1 %v6587_v30  ;;  %v6791_v30 = vld [vmem:[%s7990_s6 + $0xd0] sm:$0xff] }
 0x2a5   :  { %2200 = vmatprep.mubr.bf16.mxu1 %v1956_v4  ;;  %v6755_v4 = vld [vmem:[%s7990_s6 + $0xe8] sm:$0xff] }
 0x2a6   :  { %4974 = vmatprep.subr.mxu0 %v6755_v4 }
 0x2ac   :  { %2201 = vmatmul.mubr.bf16.gmra.mxu1 %v1954_v20  ;;  %v6761_v20 = vld [vmem:[%s7990_s6 + $0x68] sm:$0xff] }
 0x2ad   :  { %4975 = vmatpush3.msra.mxu0 %v6761_v20 }
 0x2ae   :  { %4976 = vmatprep.subr.mxu0 %v6767_v2 }
 0x2af   :  { %4977 = vmatpush3.msra.mxu0 %v6773_v3 }
 0x2b0   :  { %4978 = vmatprep.subr.mxu0 %v6779_v35 }
 0x2b1   :  { %4979 = vmatpush3.msra.mxu0 %v6785_v28 }
 0x2b2   :  { %4980 = vmatprep.subr.mxu0 %v6791_v30 }
 0x2b3   :  { %4981 = vmatpush3.msra.mxu0 %v6797_v56 }
 0x2b4   :  { %4982 = vmatprep.subr.mxu0 %v6803_v21 }
 0x2b5   :  { %4983 = vmatpush3.msra.mxu0 %v6809_v27 }
 0x2b6   :  { %4984 = vmatprep.subr.mxu0 %v6815_v31 }
 0x2b7   :  { %4985 = vmatpush3.msra.mxu0 %v6821_v55 }
 0x2b8   :  { %4986 = vmatprep.subr.mxu0 %v6827_v60 }
 0x2b9   :  { %4987 = vmatpush3.msra.mxu0 %v6833_v43 }
 0x2ba   :  { %4988 = vmatprep.subr.mxu0 %v6839_v62 }
 0x2bb   :  { %4989 = vmatpush3.msra.mxu0 %v6845_v48 }
 0x2bc   :  { %4990 = vmatprep.subr.mxu0 %v6851_v50 }
 0x2bd   :  { %4991 = vmatpush3.msra.mxu0 %v6857_v61 }
 0x2be   :  { %4992 = vmatprep.subr.mxu0 %v6863_v53 }
 0x2bf   :  { %4993 = vmatpush3.msra.mxu0 %v6869_v24 }
 0x2c0   :  { %4994 = vmatprep.subr.mxu0 %v6874_v41 }
 0x2c1   :  { %4995 = vmatpush3.msra.mxu0 %v6879_v9 }
 0x2c2   :  { %4996 = vmatprep.subr.mxu0 %v6885_v8 }
 0x2c3   :  { %4997 = vmatpush3.msra.mxu0 %v6891_v17 }
 0x2c4   :  { %4998 = vmatprep.subr.mxu0 %v6897_v46 }
 0x2c5   :  { %4999 = vmatpush3.msra.mxu0 %v6903_v14 }
 0x2c6   :  { %5000 = vmatprep.subr.mxu0 %v6909_v15 }
 0x2c7   :  { %5001 = vmatpush3.msra.mxu0 %v6915_v26 }
 0x2c8   :  { %5005 = vmatprep.subr.mxu0 %v6731_v58 }
 0x30c   :  { %v1597_v49 = vpop.f32.mrf.mxu1  ;;  %v1853_v47 = vpop.f32.mrf.mxu0 }
 0x30d   :  { %v6921_v16 = vadd.f32 %v1853_v47, %v1597_v49 }
 0x30e   :  { %v1599_v12 = vpop.f32.mrf.mxu1  ;;  %v1855_v13 = vpop.f32.mrf.mxu0 }
 0x30f   :  { %v6923_v44 = vadd.f32 %v1855_v13, %v1599_v12 }
 0x310   :  { %v1601_v45 = vpop.f32.mrf.mxu1  ;;  %v1857_v42 = vpop.f32.mrf.mxu0 }
 0x311   :  { %v6925_v40 = vadd.f32 %v1857_v42, %v1601_v45 }
 0x312   :  { %v1603_v6 = vpop.f32.mrf.mxu1  ;;  %v1859_v7 = vpop.f32.mrf.mxu0 }
 0x313   :  { %v1860_v39 = vadd.f32 %v1859_v7, %v1603_v6 }
 0x314   :  { %v1607_v63 = vpop.f32.mrf.mxu1  ;;  %v1863_v59 = vpop.f32.mrf.mxu0 }
 0x315   :  { %v6927_v51 = vadd.f32 %v1863_v59, %v1607_v63 }
 0x316   :  { %v1609_v54 = vpop.f32.mrf.mxu1  ;;  %v1865_v18 = vpop.f32.mrf.mxu0 }
 0x317   :  { %v1866_v36 = vadd.f32 %v1865_v18, %v1609_v54 }
 0x318   :  { %v1611_v5 = vpop.f32.mrf.mxu1  ;;  %v1867_v10 = vpop.f32.mrf.mxu0 }
 0x319   :  { %v6929_v37 = vadd.f32 %v1867_v10, %v1611_v5 }
 0x31a   :  { %v1613_v23 = vpop.f32.mrf.mxu1  ;;  %v1869_v52 = vpop.f32.mrf.mxu0 }
 0x31b   :  { %v1870_v32 = vadd.f32 %v1869_v52, %v1613_v23 }
 0x31c   :  { %v1617_v0 = vpop.f32.mrf.mxu1  ;;  %v1873_v1 = vpop.f32.mrf.mxu0 }
 0x31d   :  { %v1874_v11 = vadd.f32 %v1873_v1, %v1617_v0 }
 0x31e   :  { %v1619_v33 = vpop.f32.mrf.mxu1  ;;  %v1875_v58 = vpop.f32.mrf.mxu0 }
 0x31f   :  { %v1876_v49 = vadd.f32 %v1875_v58, %v1619_v33 }
 0x320   :  { %v1621_v47 = vpop.f32.mrf.mxu1  ;;  %v1877_v12 = vpop.f32.mrf.mxu0 }
 0x321   :  { %v6931_v13 = vadd.f32 %v1877_v12, %v1621_v47 }
 0x322   :  { %v1623_v45 = vpop.f32.mrf.mxu1  ;;  %v1879_v42 = vpop.f32.mrf.mxu0 }
 0x323   :  { %v6933_v6 = vadd.f32 %v1879_v42, %v1623_v45 }
 0x324   :  { %v1627_v7 = vpop.f32.mrf.mxu1  ;;  %v1883_v63 = vpop.f32.mrf.mxu0 }
 0x325   :  { %v6935_v59 = vadd.f32 %v1883_v63, %v1627_v7 }
 0x326   :  { %v1629_v54 = vpop.f32.mrf.mxu1  ;;  %v1885_v18 = vpop.f32.mrf.mxu0 }
 0x327   :  { %v6937_v5 = vadd.f32 %v1885_v18, %v1629_v54 }
 0x328   :  { %v1631_v10 = vpop.f32.mrf.mxu1  ;;  %v1887_v23 = vpop.f32.mrf.mxu0 }
 0x329   :  { %v6939_v52 = vadd.f32 %v1887_v23, %v1631_v10 }
 0x32a   :  { %v1633_v0 = vpop.f32.mrf.mxu1  ;;  %v1889_v1 = vpop.f32.mrf.mxu0 }
 0x32b   :  { %v6941_v33 = vadd.f32 %v1889_v1, %v1633_v0  ;;  %v8467_v1 = vld [vmem:[#allocation175_spill] sm:$0xff] }
 0x32c   :  { %v1637_v58 = vpop.f32.mrf.mxu1  ;;  %v1893_v47 = vpop.f32.mrf.mxu0  ;;  %v6950_v26 = vsub.s32 1, %v8467_v1 }
 0x32d   :  { %v6943_v12 = vadd.f32 %v1893_v47, %v1637_v58  ;;  %v6953_v47 = vsub.s32 0, %v8467_v1 }
 0x32e   :  { %v6945_v45 = vpop.f32.mrf.mxu1  ;;  %v6947_v42 = vpop.f32.mrf.mxu0  ;;  %8468 = vst [vmem:[#allocation37_spill] sm:$0xff] %v6950_v26 }
 0x330   :  { %v1641_v7 = vpop.f32.mrf.mxu1  ;;  %v1897_v63 = vpop.f32.mrf.mxu0 }
 0x331   :  { %v1199_v7 = vld [vmem:[%s7992_s8] sm:$0x3] }
 0x332   :  { %v1642_v54 = vpop.f32.mrf.mxu1  ;;  %v1898_v18 = vpop.f32.mrf.mxu0  ;;  %v6960_v15 = vrot.slane %v1199_v7, %v6950_v26  ;;  %v2231_v1 = vrot.slane %v1199_v7, %v6953_v47 }
 0x34c   :  { %v2162_v29 = vpop.f32.mrf.mxu1 }
 0x34d   :  { %v2209_v8 = vadd.f32 %v2162_v29, %v6921_v16 }
 0x34e   :  { %v2164_v22 = vpop.f32.mrf.mxu1 }
 0x34f   :  { %v2210_v18 = vadd.f32 %v2164_v22, %v6923_v44 }
 0x350   :  { %v2166_v10 = vpop.f32.mrf.mxu1 }
 0x351   :  { %v2211_v14 = vadd.f32 %v2166_v10, %v6925_v40  ;;  %v6970_v44 = vadd.f32 %v6960_v15, %v2210_v18  ;;  %v6981_v40 = vadd.f32 %v2231_v1, %v2209_v8  ;;  %v8470_v8 = vld [vmem:[#allocation177_spill] sm:$0xff] }
 0x352   :  { %v2168_v23 = vpop.f32.mrf.mxu1 }
 0x353   :  { %v2212_v63 = vadd.f32 %v2168_v23, %v1860_v39  ;;  %v6972_v26 = vadd.f32 %v2231_v1, %v2211_v14 }
 0x354   :  { %v2172_v19 = vpop.f32.mrf.mxu1 }
 0x355   :  { %v2213_v9 = vadd.f32 %v2172_v19, %v6927_v51  ;;  %v6967_v24 = vadd.f32 %v6960_v15, %v2212_v63 }
 0x356   :  { %v2174_v25 = vpop.f32.mrf.mxu1 }
 0x357   :  { %v2214_v46 = vadd.f32 %v2174_v25, %v1866_v36  ;;  %8469 = vst [vmem:[#allocation22_spill] sm:$0xff] %v6967_v24  ;;  %v6983_v51 = vadd.f32 %v2231_v1, %v2213_v9  ;;  %v2308_v36 = vmul.f32 %v6967_v24, %v6967_v24  ;;  %v2290_v9 = vadd.f32 %v6967_v24, %v6970_v44 }
 0x358   :  { %v2176_v0 = vpop.f32.mrf.mxu1 }
 0x359   :  { %v2215_v25 = vadd.f32 %v2176_v0, %v6929_v37  ;;  %v6976_v29 = vadd.f32 %v6960_v15, %v2214_v46  ;;  %v2306_v46 = vmul.f32 %v6970_v44, %v6970_v44 }
 0x35a   :  { %v2178_v58 = vpop.f32.mrf.mxu1 }
 0x35b   :  { %v2216_v39 = vadd.f32 %v2178_v58, %v1870_v32  ;;  %v2274_v32 = vadd.f32 %v6972_v26, %v6981_v40  ;;  %v2291_v18 = vadd.f32 %v2290_v9, %v6976_v29 }
 0x35c   :  { %v2182_v54 = vpop.f32.mrf.mxu1 }
 0x35d   :  { %v2217_v41 = vadd.f32 %v2182_v54, %v1874_v11  ;;  %v6990_v14 = vadd.f32 %v6960_v15, %v2216_v39  ;;  %v6996_v11 = vadd.f32 %v2231_v1, %v2215_v25  ;;  %v2275_v58 = vadd.f32 %v2274_v32, %v6983_v51 }
 0x35e   :  { %v2184_v17 = vpop.f32.mrf.mxu1  ;;  %v2338_v54 = vadd.f32 %v2308_v36, %v2306_v46 }
 0x35f   :  { %v2218_v23 = vadd.f32 %v2184_v17, %v1876_v49  ;;  %v6985_v17 = vadd.f32 %v2231_v1, %v2217_v41  ;;  %v2310_v41 = vmul.f32 %v6976_v29, %v6976_v29  ;;  %v2312_v39 = vmul.f32 %v6990_v14, %v6990_v14 }
 0x360   :  { %v2186_v22 = vpop.f32.mrf.mxu1  ;;  %v2292_v24 = vadd.f32 %v2291_v18, %v6990_v14 }
 0x361   :  { %v6979_v16 = vadd.f32 %v6960_v15, %v2218_v23  ;;  %v7008_v7 = vmul.f32 %v8470_v8, %v6985_v17  ;;  %v2219_v63 = vadd.f32 %v2186_v22, %v6931_v13  ;;  %v2339_v32 = vadd.f32 %v2338_v54, %v2310_v41 }
 0x362   :  { %v2188_v19 = vpop.f32.mrf.mxu1  ;;  %v1896_v41 = vadd.f32 %v6947_v42, %v6945_v45 }
 0x363   :  { %v2265_v49 = vmul.f32 %v8470_v8, %v6979_v16  ;;  %v2220_v10 = vadd.f32 %v2188_v19, %v6933_v6  ;;  %v2276_v6 = vadd.f32 %v2275_v58, %v6996_v11  ;;  %v7022_v36 = vadd.f32 %v2231_v1, %v2219_v63 }
 0x364   :  { %v2192_v37 = vpop.f32.mrf.mxu1 }
 0x365   :  { %v2221_v19 = vadd.f32 %v2192_v37, %v6935_v59  ;;  %v2314_v8 = vmul.f32 %v2265_v49, %v6979_v16  ;;  %v7020_v13 = vadd.f32 %v6960_v15, %v2220_v10  ;;  %v2277_v46 = vadd.f32 %v2276_v6, %v7008_v7 }
 0x366   :  { %v2194_v0 = vpop.f32.mrf.mxu1  ;;  %v2293_v58 = vadd.f32 %v2292_v24, %v2265_v49 }
 0x367   :  { %v2222_v23 = vadd.f32 %v2194_v0, %v6937_v5  ;;  %v2340_v0 = vadd.f32 %v2339_v32, %v2312_v39  ;;  %v7032_v10 = vadd.f32 %v2231_v1, %v2221_v19  ;;  %v2316_v63 = vmul.f32 %v7020_v13, %v7020_v13 }
 0x368   :  { %v2196_v25 = vpop.f32.mrf.mxu1  ;;  %v2278_v24 = vadd.f32 %v2277_v46, %v7022_v36 }
 0x369   :  { %v2223_v5 = vadd.f32 %v2196_v25, %v6939_v52  ;;  %v7028_v59 = vadd.f32 %v6960_v15, %v2222_v23  ;;  %v2341_v54 = vadd.f32 %v2340_v0, %v2314_v8  ;;  %v2294_v23 = vadd.f32 %v2293_v58, %v7020_v13 }
 0x36a   :  { %v2198_v22 = vpop.f32.mrf.mxu1  ;;  %v2279_v25 = vadd.f32 %v2278_v24, %v7032_v10 }
 0x36b   :  { %v2224_v9 = vadd.f32 %v2198_v22, %v6941_v33  ;;  %v7041_v49 = vadd.f32 %v2231_v1, %v2223_v5  ;;  %v2318_v45 = vmul.f32 %v7028_v59, %v7028_v59  ;;  %v2295_v19 = vadd.f32 %v2294_v23, %v7028_v59  ;;  %v8473_v22 = vld [vmem:[#allocation178_spill] sm:$0xff] }
 0x36c   :  { %v2202_v37 = vpop.f32.mrf.mxu1 }
 0x36d   :  { %v7037_v18 = vadd.f32 %v6960_v15, %v2224_v9  ;;  %v2225_v52 = vadd.f32 %v2202_v37, %v6943_v12  ;;  %v2342_v12 = vadd.f32 %v2341_v54, %v2316_v63  ;;  %v2280_v9 = vadd.f32 %v2279_v25, %v7041_v49 }
 0x36e   :  { %v2204_v33 = vpop.f32.mrf.mxu1  ;;  %v2309_v25 = vmul.f32 %v6983_v51, %v6983_v51 }
 0x36f   :  { %8471 = vst [vmem:[#allocation21_spill] sm:$0xff] %v7037_v18  ;;  %v2226_v39 = vadd.f32 %v2204_v33, %v1896_v41  ;;  %v7046_v42 = vadd.f32 %v2231_v1, %v2225_v52  ;;  %v2320_v32 = vmul.f32 %v7037_v18, %v7037_v18  ;;  %v2343_v0 = vadd.f32 %v2342_v12, %v2318_v45 }
 0x370   :  { %v2206_v8 = vpop.f32.mrf.mxu1  ;;  %v2296_v58 = vadd.f32 %v2295_v19, %v7037_v18  ;;  %v2307_v33 = vmul.f32 %v6972_v26, %v6972_v26  ;;  %v2305_v45 = vmul.f32 %v6981_v40, %v6981_v40 }
 0x371   :  { %v7050_v6 = vadd.f32 %v6960_v15, %v2226_v39  ;;  %v2272_v46 = vmul.f32 %v8473_v22, %v7046_v42  ;;  %v2344_v63 = vadd.f32 %v2343_v0, %v2320_v32  ;;  %v2311_v32 = vmul.f32 %v6996_v11, %v6996_v11 }
 0x372   :  { %v2207_v5 = vpop.f32.mrf.mxu1 }
 0x373   :  { %8472 = vst [vmem:[#allocation36_spill] sm:$0xff] %v7050_v6  ;;  %v2273_v1 = vmul.f32 %v8473_v22, %v7050_v6  ;;  %v2282_v15 = vsel %vm1033_vm8, %v2272_v46, 0.0 }
 0x374   :  { %v2283_v37 = vadd.f32 %v2282_v15, %v2280_v9  ;;  %v2323_v9 = vadd.f32 %v2307_v33, %v2305_v45  ;;  %v2315_v33 = vmul.f32 %v7022_v36, %v7022_v36 }
 0x375   :  { %v2297_v41 = vsel %vm1033_vm8, %v2273_v1, 0.0  ;;  %v2322_v54 = vmul.f32 %v2273_v1, %v7050_v6 }
 0x376   :  { %v2298_v52 = vadd.f32 %v2297_v41, %v2296_v58  ;;  %v2284_v24 = vrot.slane %v2283_v37, 4  ;;  %v2324_v15 = vadd.f32 %v2323_v9, %v2309_v25  ;;  %v2313_v41 = vmul.f32 %v7008_v7, %v6985_v17 }
 0x377   :  { %v2345_v39 = vsel %vm1033_vm8, %v2322_v54, 0.0  ;;  %v2321_v25 = vmul.f32 %v2272_v46, %v7046_v42 }
 0x378   :  { %v2346_v23 = vadd.f32 %v2345_v39, %v2344_v63  ;;  %v2299_v8 = vrot.slane %v2298_v52, 4  ;;  %v2285_v12 = vadd.f32 %v2284_v24, %v2283_v37  ;;  %v2325_v22 = vadd.f32 %v2324_v15, %v2311_v32 }
 0x37a   :  { %v2300_v19 = vadd.f32 %v2299_v8, %v2298_v52  ;;  %v2347_v5 = vrot.slane %v2346_v23, 4  ;;  %v2286_v1 = vrot.slane %v2285_v12, 2  ;;  %v2326_v52 = vadd.f32 %v2325_v22, %v2313_v41 }
 0x37c   :  { %v2301_v0 = vrot.slane %v2300_v19, 2  ;;  %v2348_v58 = vadd.f32 %v2347_v5, %v2346_v23  ;;  %v2287_v54 = vadd.f32 %v2286_v1, %v2285_v12  ;;  %v2317_v23 = vmul.f32 %v7032_v10, %v7032_v10 }
 0x37d   :  { %v2327_v12 = vadd.f32 %v2326_v52, %v2315_v33  ;;  %v5201_v33 = vmov 1966171168  }
 0x37e   :  { %v2302_v63 = vadd.f32 %v2301_v0, %v2300_v19  ;;  %v2349_v39 = vrot.slane %v2348_v58, 2  ;;  %v2288_v6 = vrot.slane %v2287_v54, 1  ;;  %v2319_v19 = vmul.f32 %v7041_v49, %v7041_v49 }
 0x37f   :  { %v2328_v22 = vadd.f32 %v2327_v12, %v2317_v23 }
 0x380   :  { %v2303_v18 = vrot.slane %v2302_v63, 1  ;;  %v2350_v37 = vadd.f32 %v2349_v39, %v2348_v58  ;;  %v2289_v45 = vadd.f32 %v2288_v6, %v2287_v54 }
 0x381   :  { %v2329_v6 = vadd.f32 %v2328_v22, %v2319_v19  ;;  %v1200_v22 = vld [vmem:[%s7993_s9] sm:$0x3] }
 0x382   :  { %v2304_v24 = vadd.f32 %v2303_v18, %v2302_v63  ;;  %v2351_v8 = vrot.slane %v2350_v37, 1  ;;  %v2330_v18 = vsel %vm1033_vm8, %v2321_v25, 0.0 }
 0x383   :  { %v2331_v46 = vadd.f32 %v2330_v18, %v2329_v6 }
 0x384   :  { %2449 = vmatprep.mubr.f32.mxu0 %v2304_v24  ;;  %v2352_v7 = vadd.f32 %v2351_v8, %v2350_v37  ;;  %v2687_v24 = vunpack.c.l.s4 %v5201_v33 }
 0x385   :  { %2450 = vmatmul.mubr.f32.vlgmr.msra.gmra.mxu0 %v2289_v45  ;;  %v8484_v45 = vld [vmem:[#allocation175_spill] sm:$0xff] }
 0x386   :  { %5006 = vmatpush3.msra.mxu0 %v6737_v34  ;;  %2519 = vmatprep.mubr.f32.mxu0 %v2352_v7  ;;  %v2332_v34 = vrot.slane %v2331_v46, 4  ;;  %v2688_v8 = vunpack.c.0.s8 %v2687_v24 }
 0x387   :  { %5007 = vmatprep.subr.mxu0 %v6743_v57 }
 0x388   :  { %5008 = vmatpush3.msra.mxu0 %v6749_v38  ;;  %v2333_v57 = vadd.f32 %v2332_v34, %v2331_v46  ;;  %v7125_v25 = vsub.s32 %v2688_v8, %v8484_v45  ;;  %v8486_v34 = vld [vmem:[#allocation37_spill] sm:$0xff] }
 0x389   :  { %5009 = vmatprep.subr.mxu0 %v6755_v4 }
 0x38a   :  { %5010 = vmatpush3.msra.mxu0 %v6761_v20  ;;  %v2334_v38 = vrot.slane %v2333_v57, 2  ;;  %v8474_v20 = vld [vmem:[#allocation42_spill] sm:$0xff]  ;;  %8485 = vst [vmem:[#allocation35_spill] sm:$0xff] %v7125_v25 }
 0x38b   :  { %5011 = vmatprep.subr.mxu0 %v6767_v2  ;;  %v8475_v2 = vld [vmem:[#allocation41_spill] sm:$0xff] }
 0x38c   :  { %5012 = vmatpush3.msra.mxu0 %v6773_v3  ;;  %v2335_v4 = vadd.f32 %v2334_v38, %v2333_v57  ;;  %v8476_v3 = vld [vmem:[#allocation26_spill] sm:$0xff] }
 0x38d   :  { %5013 = vmatprep.subr.mxu0 %v6779_v35  ;;  %v8477_v35 = vld [vmem:[#allocation25_spill] sm:$0xff] }
 0x38e   :  { %5014 = vmatpush3.msra.mxu0 %v6785_v28  ;;  %v2336_v28 = vrot.slane %v2335_v4, 1 }
 0x38f   :  { %5015 = vmatprep.subr.mxu0 %v6791_v30  ;;  %v8478_v30 = vld [vmem:[#allocation40_spill] sm:$0xff] }
 0x390   :  { %5016 = vmatpush3.msra.mxu0 %v6797_v56  ;;  %v8479_v56 = vld [vmem:[#allocation39_spill] sm:$0xff] }
 0x391   :  { %5017 = vmatprep.subr.mxu0 %v6803_v21  ;;  %v8480_v21 = vld [vmem:[#allocation24_spill] sm:$0xff] }
 0x392   :  { %5018 = vmatpush3.msra.mxu0 %v6809_v27  ;;  %v8481_v27 = vld [vmem:[#allocation23_spill] sm:$0xff] }
 0x393   :  { %5019 = vmatprep.subr.mxu0 %v6815_v31  ;;  %v2337_v31 = vadd.f32 %v2336_v28, %v2335_v4 }
 0x394   :  { %5020 = vmatpush3.msra.mxu0 %v6821_v55  ;;  %v8482_v55 = vld [vmem:[#allocation38_spill] sm:$0xff] }
 0x395   :  { %5021 = vmatprep.subr.mxu0 %v6827_v60  ;;  %v8483_v60 = vmov 0.0  }
 0x396   :  { %5022 = vmatpush3.msra.mxu0 %v6833_v43  ;;  %v2531_v43 = vld [vmem:[%s7991_s7 + $0x8] sm:$0xff] }
 0x397   :  { %5023 = vmatprep.subr.mxu0 %v6839_v62  ;;  %v2530_v62 = vld [vmem:[%s7991_s7] sm:$0xff] }
 0x398   :  { %5024 = vmatpush3.msra.mxu0 %v6845_v48 }
 0x399   :  { %5025 = vmatprep.subr.mxu0 %v6851_v50 }
 0x39a   :  { %5026 = vmatpush3.msra.mxu0 %v6857_v61 }
 0x39b   :  { %5027 = vmatprep.subr.mxu0 %v6863_v53 }
 0x39c   :  { %5028 = vmatpush3.msra.mxu0 %v8474_v20 }
 0x39d   :  { %5029 = vmatprep.subr.mxu0 %v8475_v2 }
 0x39e   :  { %5030 = vmatpush3.msra.mxu0 %v8476_v3  ;;  %v1201_v3 = vld [vmem:[%s7994_s10] sm:$0x3] }
 0x39f   :  { %5031 = vmatprep.subr.mxu0 %v8477_v35 }
 0x3a0   :  { %5032 = vmatpush3.msra.mxu0 %v8478_v30 }
 0x3a1   :  { %5033 = vmatprep.subr.mxu0 %v8479_v56 }
 0x3a2   :  { %5034 = vmatpush3.msra.mxu0 %v8480_v21  ;;  %v8487_v21 = vld [vmem:[#allocation22_spill] sm:$0xff] }
 0x3a3   :  { %5035 = vmatprep.subr.mxu0 %v8481_v27 }
 0x3a4   :  { %5036 = vmatpush3.msra.mxu0 %v8482_v55 }
 0x3a5   :  { %2520 = vmatmul.mubr.f32.vlgmr.msra.gmra.mxu0 %v2337_v31  ;;  %2566 = vmatprep.subr.mxu0 %v2531_v43 }
 0x3a6   :  { %2600 = vmatprep.mubr.f32.mxu0 %v8483_v60  ;;  %2567 = vmatpush1.msra.mxu0 %v2530_v62 }
 0x3a7   :  { %2640 = vmatprep.subr.mxu0 %v2531_v43 }
 0x445   :  { %v5002_v48 = vpop.f32.mrf.mxu0 }
 0x447   :  { %v5003_v50 = vpop.f32.mrf.mxu0 }
 0x448   :  { %v5004_v61 = vadd.f32 %v5003_v50, %v5002_v48 }
 0x44a   :  { %v2525_v53 = vmul.f32 0.00048828125, %v5004_v61 }
 0x44c   :  { %4794 = vmatmul.mubr.msk.f32.vlgmr.msra.gmra.mxu0 %vm2532_vm12, %v2525_v53  ;;  %v2527_v1 = vmul.f32 %v2525_v53, %v2525_v53 }
 0x44d   :  { %2641 = vmatpush1.msra.mxu0 %v2530_v62  ;;  %2674 = vmatprep.mubr.f32.mxu0 %v8483_v60 }
 0x465   :  { %v5037_v5 = vpop.f32.mrf.mxu0 }
 0x467   :  { %v5038_v9 = vpop.f32.mrf.mxu0 }
 0x468   :  { %v5039_v32 = vadd.f32 %v5038_v9, %v5037_v5  ;;  %v8488_v5 = vld [vmem:[#allocation21_spill] sm:$0xff]  ;;  %v8489_v9 = vld [vmem:[#allocation36_spill] sm:$0xff] }
 0x46a   :  { %v2526_v0 = vmul.f32 0.00048828125, %v5039_v32 }
 0x46c   :  { %v2528_v58 = vsub.f32 %v2526_v0, %v2527_v1 }
 0x46e   :  { %v2529_v15 = vmax.f32 %v2528_v58, 0.0 }
 0x470   :  { %4795 = vmatmul.mubr.msk.f32.vlgmr.msra.gmra.mxu0 %vm2532_vm12, %v2529_v15 }
 0x50c   :  { %v2602_v41 = vpop.f32.mrf.mxu0 }
 0x50e   :  { %v2604_v54 = vpop.f32.mrf.mxu0 }
 0x530   :  { %v2676_v63 = vpop.f32.mrf.mxu0 }
 0x531   :  { %v2677_v39 = vadd.f32 1e-05, %v2676_v63 }
 0x532   :  { %v2678_v37 = vpop.f32.mrf.mxu0 }
 0x533   :  { %v2679_v52 = vadd.f32 1e-05, %v2678_v37  ;;  %5171 = vrsqrt.f32 %v2677_v39 }
 0x535   :  { %5173 = vrsqrt.f32 %v2679_v52 }
 0x540   :  { %v5172_v23 = vpop.eup %5171 }
 0x542   :  { %v5174_v7 = vpop.eup %5173 }
 0x543   :  { %v2685_v12 = vcombine.low %v5172_v23, %v5174_v7 }
 0x545   :  { %v2692_v19 = vrot.slane %v2685_v12, %v7125_v25 }
 0x547   :  { %v2699_v18 = vrot.slane %v2692_v19, %v7125_v25 }
 0x549   :  { %v2701_v6 = vmul.f32 %v2699_v18, %v1200_v22 }
 0x54b   :  { %v2706_v46 = vrot.slane %v2701_v6, %v6953_v47  ;;  %v2710_v57 = vrot.slane %v2701_v6, %v8486_v34 }
 0x54d   :  { %v2713_v38 = vmul.f32 %v2706_v46, %v2602_v41  ;;  %v2714_v4 = vmul.f32 %v2710_v57, %v2604_v54  ;;  %v2734_v28 = vmul.f32 %v2706_v46, %v6981_v40  ;;  %v2735_v30 = vmul.f32 %v2710_v57, %v6970_v44 }
 0x54e   :  { %v2736_v56 = vmul.f32 %v2706_v46, %v6972_v26  ;;  %v2737_v27 = vmul.f32 %v2710_v57, %v8487_v21  ;;  %v2738_v31 = vmul.f32 %v2706_v46, %v6983_v51  ;;  %v2739_v43 = vmul.f32 %v2710_v57, %v6976_v29 }
 0x54f   :  { %v2717_v20 = vcombine.low %v2713_v38, %v2714_v4  ;;  %v2740_v62 = vmul.f32 %v2706_v46, %v6996_v11  ;;  %v2741_v48 = vmul.f32 %v2710_v57, %v6990_v14  ;;  %v2742_v50 = vmul.f32 %v2706_v46, %v6985_v17 }
 0x550   :  { %v2743_v61 = vmul.f32 %v2710_v57, %v6979_v16  ;;  %v2744_v40 = vmul.f32 %v2706_v46, %v7022_v36  ;;  %v2745_v44 = vmul.f32 %v2710_v57, %v7020_v13  ;;  %v2746_v26 = vmul.f32 %v2706_v46, %v7032_v10 }
 0x551   :  { %v2724_v2 = vrot.slane %v2717_v20, %v7125_v25  ;;  %v2747_v53 = vmul.f32 %v2710_v57, %v7028_v59  ;;  %v2748_v11 = vmul.f32 %v2706_v46, %v7041_v49  ;;  %v2749_v14 = vmul.f32 %v2710_v57, %v8488_v5 }
 0x552   :  { %v2750_v17 = vmul.f32 %v2706_v46, %v7046_v42  ;;  %v2751_v16 = vmul.f32 %v2710_v57, %v8489_v9 }
 0x553   :  { %v2731_v35 = vrot.slane %v2724_v2, %v7125_v25 }
 0x555   :  { %v2733_v55 = vsub.f32 %v1201_v3, %v2731_v35 }
 0x557   :  { %v2756_v51 = vrot.slane %v2733_v55, %v6953_v47  ;;  %v2760_v29 = vrot.slane %v2733_v55, %v8486_v34 }
 0x559   :  { %v2763_v32 = vadd.f32 %v2756_v51, %v2734_v28  ;;  %v2764_v36 = vadd.f32 %v2760_v29, %v2735_v30  ;;  %v2765_v1 = vadd.f32 %v2756_v51, %v2736_v56  ;;  %v2766_v13 = vadd.f32 %v2760_v29, %v2737_v27 }
 0x55a   :  { %v2767_v10 = vadd.f32 %v2756_v51, %v2738_v31  ;;  %v2768_v0 = vadd.f32 %v2760_v29, %v2739_v43  ;;  %v2769_v59 = vadd.f32 %v2756_v51, %v2740_v62  ;;  %v2770_v58 = vadd.f32 %v2760_v29, %v2741_v48 }
 0x55b   :  { %v2771_v15 = vadd.f32 %v2756_v51, %v2742_v50  ;;  %v2772_v41 = vadd.f32 %v2760_v29, %v2743_v61  ;;  %v2773_v54 = vadd.f32 %v2756_v51, %v2744_v40  ;;  %v2774_v63 = vadd.f32 %v2760_v29, %v2745_v44 }
 0x55c   :  { %v2775_v49 = vadd.f32 %v2756_v51, %v2746_v26  ;;  %v2776_v39 = vadd.f32 %v2760_v29, %v2747_v53  ;;  %v2777_v37 = vadd.f32 %v2756_v51, %v2748_v11  ;;  %v2778_v52 = vadd.f32 %v2760_v29, %v2749_v14 }
 0x55d   :  { %v2779_v42 = vadd.f32 %v2756_v51, %v2750_v17  ;;  %v2780_v33 = vadd.f32 %v2760_v29, %v2751_v16  ;;  %v2781_v24 = vmax.f32 %v2763_v32, 0.0  ;;  %v2782_v8 = vmax.f32 %v2764_v36, 0.0  ;;  %v2862_v32 = vld [vmem:[#allocation3 + $0x28] sm:$0xff] }
 0x55e   :  { %v2783_v23 = vmax.f32 %v2765_v1, 0.0  ;;  %v2784_v45 = vmax.f32 %v2766_v13, 0.0  ;;  %v2785_v7 = vmax.f32 %v2767_v10, 0.0  ;;  %v2786_v12 = vmax.f32 %v2768_v0, 0.0 }
 0x55f   :  { %v2787_v19 = vmax.f32 %v2769_v59, 0.0  ;;  %v2788_v22 = vmax.f32 %v2770_v58, 0.0  ;;  %v2789_v18 = vmax.f32 %v2771_v15, 0.0  ;;  %v2790_v6 = vmax.f32 %v2772_v41, 0.0  ;;  %v2868_v58 = vld [vmem:[#allocation3] sm:$0x11] }
 0x560   :  { %v2791_v46 = vmax.f32 %v2773_v54, 0.0  ;;  %v2792_v57 = vmax.f32 %v2774_v63, 0.0  ;;  %v2793_v38 = vmax.f32 %v2775_v49, 0.0  ;;  %v2794_v4 = vmax.f32 %v2776_v39, 0.0 }
 0x561   :  { %v2795_v20 = vmax.f32 %v2777_v37, 0.0  ;;  %v2796_v2 = vmax.f32 %v2778_v52, 0.0  ;;  %v2797_v3 = vmax.f32 %v2779_v42, 0.0  ;;  %v2798_v35 = vmax.f32 %v2780_v33, 0.0 }
 0x562   :  { %v4943_v28 = vpack.c.bf16 %v2782_v8, %v2781_v24  ;;  %v4944_v30 = vpack.c.bf16 %v2784_v45, %v2783_v23  ;;  %v4945_v56 = vpack.c.bf16 %v2786_v12, %v2785_v7  ;;  %v4946_v21 = vpack.c.bf16 %v2788_v22, %v2787_v19  ;;  %v2949_v19 = vld [vmem:[#allocation3] sm:$0xee] }
 0x563   :  { %v4947_v27 = vpack.c.bf16 %v2790_v6, %v2789_v18  ;;  %v4948_v31 = vpack.c.bf16 %v2792_v57, %v2791_v46  ;;  %v7159_v55 = vpack.c.bf16 %v2794_v4, %v2793_v38  ;;  %v7161_v43 = vpack.c.bf16 %v2796_v2, %v2795_v20 }
 0x564   :  { %v2820_v62 = vshrl.u32 %v4943_v28, 16  ;;  %v2823_v48 = vshll.u32 %v4943_v28, 16  ;;  %v2828_v50 = vshrl.u32 %v4944_v30, 16  ;;  %v2831_v61 = vshll.u32 %v4944_v30, 16 }
 0x565   :  { %v2837_v44 = vshrl.u32 %v4945_v56, 16  ;;  %v2840_v26 = vshll.u32 %v4945_v56, 16  ;;  %v2846_v53 = vshrl.u32 %v4946_v21, 16  ;;  %v2849_v51 = vshll.u32 %v4946_v21, 16 }
 0x566   :  { %v2822_v29 = vrot.slane %v2820_v62, 7  ;;  %v2830_v11 = vrot.slane %v2828_v50, 7  ;;  %v4951_v5 = vpack.c.bf16 %v2798_v35, %v2797_v3  ;;  %v2899_v14 = vshrl.u32 %v4947_v27, 16 }
 0x567   :  { %v2839_v17 = vrot.slane %v2837_v44, 7  ;;  %v2848_v9 = vrot.slane %v2846_v53, 7  ;;  %v2902_v36 = vshll.u32 %v4947_v27, 16  ;;  %v2907_v1 = vshrl.u32 %v4948_v31, 16 }
 0x568   :  { %v2825_v13 = vor.u32 %v2823_v48, %v2822_v29  ;;  %v2826_v10 = vrot.slane %v2822_v29, 4  ;;  %v2833_v0 = vor.u32 %v2831_v61, %v2830_v11  ;;  %v2835_v59 = vrot.slane %v2830_v11, 4  ;;  %v8504_v29 = vld [vmem:[#allocation121_spill] sm:$0xff] }
 0x569   :  { %v2842_v41 = vor.u32 %v2840_v26, %v2839_v17  ;;  %v2844_v54 = vrot.slane %v2839_v17, 4  ;;  %v2851_v63 = vor.u32 %v2849_v51, %v2848_v9  ;;  %v2853_v49 = vrot.slane %v2848_v9, 4  ;;  %v8503_v51 = vld [vmem:[#allocation122_spill] sm:$0xff] }
 0x56a   :  { %v2834_v37 = vsel %vm6314_vm7, %v2826_v10, %v2833_v0  ;;  %v2863_v52 = vsel %vm2861_vm11, %v2825_v13, %v2862_v32  ;;  %v2901_v42 = vrot.slane %v2899_v14, 7  ;;  %v2909_v33 = vrot.slane %v2907_v1, 7  ;;  %v8506_v14 = vld [vmem:[#allocation89_spill] sm:$0xff] }
 0x56b   :  { %v2843_v24 = vsel %vm6314_vm7, %v2835_v59, %v2842_v41  ;;  %v2852_v8 = vsel %vm6314_vm7, %v2844_v54, %v2851_v63  ;;  %2864 = vst [vmem:[#allocation3 + $0x28] sm:$0xff] %v2863_v52  ;;  %2865 = vst [vmem:[#allocation3 + $0x40] sm:$0xff] %v2834_v37  ;;  %v2869_v45 = vsel %vm6278_vm10, %v2853_v49, %v2868_v58  ;;  %v2910_v7 = vshll.u32 %v4948_v31, 16 }
 0x56c   :  { %2866 = vst [vmem:[#allocation3 + $0x10] sm:$0xff] %v2843_v24  ;;  %2867 = vst [vmem:[#allocation3 + $0x18] sm:$0xff] %v2852_v8  ;;  %v2904_v22 = vor.u32 %v2902_v36, %v2901_v42  ;;  %v2905_v18 = vrot.slane %v2901_v42, 4  ;;  %v2916_v6 = vshrl.u32 %v7159_v55, 16  ;;  %v2914_v57 = vrot.slane %v2909_v33, 4 }
 0x56d   :  { %2870 = vst [vmem:[#allocation3] sm:$0x11] %v2869_v45  ;;  %v2912_v46 = vor.u32 %v2910_v7, %v2909_v33  ;;  %v2925_v38 = vshrl.u32 %v7161_v43, 16  ;;  %v2919_v20 = vshll.u32 %v7159_v55, 16  ;;  %v2934_v2 = vshrl.u32 %v4951_v5, 16 }
 0x56e   :  { %v2918_v4 = vrot.slane %v2916_v6, 7  ;;  %v2950_v3 = vsel %vm2948_vm4, %v2904_v22, %v2949_v19  ;;  %v2928_v30 = vshll.u32 %v7161_v43, 16  ;;  %vm8499_vm10 = vsmask.f32 5376  ;;  %v2958_v43 = vld [vmem:[#allocation3 + $0x8] sm:$0x33] }
 0x56f   :  { %v2913_v35 = vsel %vm6314_vm7, %v2905_v18, %v2912_v46  ;;  %v2927_v28 = vrot.slane %v2925_v38, 7  ;;  %2951 = vst [vmem:[#allocation3] sm:$0xee] %v2950_v3  ;;  %vm7198_vm2 = vmand %vm2955_vm13, %vm8499_vm10  ;;  %v2936_v31 = vrot.slane %v2934_v2, 7  ;;  %v2937_v62 = vshll.u32 %v4951_v5, 16  ;;  %v8505_v5 = vld [vmem:[#allocation90_spill] sm:$0xff] }
 0x570   :  { %v2921_v21 = vor.u32 %v2919_v20, %v2918_v4  ;;  %v2923_v27 = vrot.slane %v2918_v4, 4  ;;  %2952 = vst [vmem:[#allocation3 + $0x38] sm:$0xff] %v2913_v35  ;;  %vm2957_vm14 = vmor %vm7198_vm2, %vm6394_vm9  ;;  %v4830_v11 = vcombine.high %v8504_v29, %v8503_v51  ;;  %v4864_v17 = vcombine.high %v8506_v14, %v8505_v5 }
 0x571   :  { %v2930_v55 = vor.u32 %v2928_v30, %v2927_v28  ;;  %v2932_v48 = vrot.slane %v2927_v28, 4  ;;  %v2939_v61 = vor.u32 %v2937_v62, %v2936_v31  ;;  %v4829_v9 = vcombine.low %v8504_v29, %v8503_v51 }
 0x572   :  { %v2922_v50 = vsel %vm6314_vm7, %v2914_v57, %v2921_v21  ;;  %v4863_v16 = vcombine.low %v8506_v14, %v8505_v5 }
 0x573   :  { %v2931_v44 = vsel %vm6314_vm7, %v2923_v27, %v2930_v55  ;;  %2953 = vst [vmem:[#allocation3 + $0x30] sm:$0xff] %v2922_v50  ;;  %v2940_v26 = vsel %vm6314_vm7, %v2932_v48, %v2939_v61 }
 0x574   :  { %2954 = vst [vmem:[#allocation3 + $0x20] sm:$0xff] %v2931_v44  ;;  %v2959_v53 = vsel %vm2957_vm14, %v2940_v26, %v2958_v43 }
 0x575   :  { %2960 = vst [vmem:[#allocation3 + $0x8] sm:$0x33] %v2959_v53 }
 0x576   :  { %5198 = dma.done.wait [#allocation6 + $0x1], 12288 }
 0x577   :  { %5199 = vsyncadd [#allocation6 + $0x1], 4294955008  ;;  %v8507_v32 = vld [vmem:[#allocation120_spill] sm:$0xff]  ;;  %v8508_v36 = vld [vmem:[#allocation119_spill] sm:$0xff]  ;;  %3326 = vmatprep.subr.bf16.mxu1 %v4830_v11  ;;  %3582 = vmatprep.subr.bf16.mxu0 %v4864_v17  ;;  %vm4577_vm7 = vcmask 1045504  }
 0x578   :  { %v4828_v1 = vcombine.high %v8508_v36, %v8507_v32  ;;  %v8509_v13 = vld [vmem:[#allocation88_spill] sm:$0xff]  ;;  %v8510_v10 = vld [vmem:[#allocation87_spill] sm:$0xff]  ;;  %3327 = vmatpush1.bf16.msra.mxu1 %v4829_v9  ;;  %3583 = vmatpush1.bf16.msra.mxu0 %v4863_v16  ;;  %v4827_v59 = vcombine.low %v8508_v36, %v8507_v32  ;;  %v8511_v15 = vld [vmem:[#allocation118_spill] sm:$0xff] }
 0x579   :  { %v4862_v0 = vcombine.high %v8510_v10, %v8509_v13  ;;  %v4861_v58 = vcombine.low %v8510_v10, %v8509_v13  ;;  %v8512_v41 = vld [vmem:[#allocation117_spill] sm:$0xff]  ;;  %v8513_v63 = vld [vmem:[#allocation86_spill] sm:$0xff]  ;;  %v8515_v42 = vld [vmem:[#allocation116_spill] sm:$0xff] }
 0x57a   :  { %3328 = vmatprep.subr.bf16.mxu1 %v4828_v1  ;;  %v4826_v54 = vcombine.high %v8512_v41, %v8511_v15  ;;  %v8514_v49 = vld [vmem:[#allocation85_spill] sm:$0xff]  ;;  %v4825_v37 = vcombine.low %v8512_v41, %v8511_v15  ;;  %v8516_v33 = vld [vmem:[#allocation115_spill] sm:$0xff]  ;;  %v8517_v8 = vld [vmem:[#allocation84_spill] sm:$0xff] }
 0x57b   :  { %3584 = vmatprep.subr.bf16.mxu0 %v4862_v0  ;;  %v4860_v39 = vcombine.high %v8514_v49, %v8513_v63  ;;  %v4859_v52 = vcombine.low %v8514_v49, %v8513_v63  ;;  %v4824_v24 = vcombine.high %v8516_v33, %v8515_v42  ;;  %v8518_v23 = vld [vmem:[#allocation83_spill] sm:$0xff]  ;;  %v4823_v7 = vcombine.low %v8516_v33, %v8515_v42  ;;  %v8519_v19 = vld [vmem:[#allocation114_spill] sm:$0xff]  ;;  %v8520_v22 = vld [vmem:[#allocation113_spill] sm:$0xff] }
 0x57c   :  { %3329 = vmatpush1.bf16.msra.mxu1 %v4827_v59  ;;  %3585 = vmatpush1.bf16.msra.mxu0 %v4861_v58  ;;  %v4858_v45 = vcombine.high %v8518_v23, %v8517_v8  ;;  %v4857_v12 = vcombine.low %v8518_v23, %v8517_v8  ;;  %v4822_v18 = vcombine.high %v8520_v22, %v8519_v19  ;;  %v8521_v6 = vld [vmem:[#allocation82_spill] sm:$0xff]  ;;  %v8522_v46 = vld [vmem:[#allocation81_spill] sm:$0xff]  ;;  %v7254_v2 = vld [vmem:[#allocation3 + $0x28] sm:$0xff] }
 0x57d   :  { %3330 = vmatprep.subr.bf16.mxu1 %v4826_v54  ;;  %3586 = vmatprep.subr.bf16.mxu0 %v4860_v39  ;;  %v4856_v57 = vcombine.high %v8522_v46, %v8521_v6  ;;  %v7248_v38 = vld [vmem:[#allocation3 + $0x14] ss:$8 sps:$4 sm:$0xff]   ;;  %v4821_v4 = vcombine.low %v8520_v22, %v8519_v19  ;;  %v4855_v20 = vcombine.low %v8522_v46, %v8521_v6  ;;  %v7256_v3 = vld [vmem:[#allocation3 + $0x40] sm:$0xff]  ;;  %v8524_v28 = vld [vmem:[#allocation111_spill] sm:$0xff] }
 0x57e   :  { %v8523_v35 = vld [vmem:[#allocation112_spill] sm:$0xff]  ;;  %v8526_v21 = vld [vmem:[#allocation79_spill] sm:$0xff]  ;;  %v4806_v31 = vcombine.high %v7254_v2, %v7256_v3  ;;  %v3098_v62 = vshll.u32 %v7248_v38, 16  ;;  %v8527_v50 = vld [vmem:[#allocation110_spill] sm:$0xff] }
 0x57f   :  { %v4820_v30 = vcombine.high %v8524_v28, %v8523_v35  ;;  %v8525_v56 = vld [vmem:[#allocation80_spill] sm:$0xff]  ;;  %v4819_v55 = vcombine.low %v8524_v28, %v8523_v35  ;;  %v8528_v61 = vld [vmem:[#allocation109_spill] sm:$0xff]  ;;  %v8529_v43 = vld [vmem:[#allocation78_spill] sm:$0xff] }
 0x580   :  { %3331 = vmatpush1.bf16.msra.mxu1 %v4825_v37  ;;  %3587 = vmatpush1.bf16.msra.mxu0 %v4859_v52  ;;  %v4854_v27 = vcombine.high %v8526_v21, %v8525_v56  ;;  %v4853_v48 = vcombine.low %v8526_v21, %v8525_v56  ;;  %v4818_v40 = vcombine.high %v8528_v61, %v8527_v50  ;;  %v8530_v44 = vld [vmem:[#allocation77_spill] sm:$0xff]  ;;  %v3091_v53 = vshrl.u32 %v4806_v31, 16  ;;  %v8531_v17 = vld [vmem:[#allocation108_spill] sm:$0xff]  ;;  %v8532_v9 = vld [vmem:[#allocation107_spill] sm:$0xff] }
 0x581   :  { %3332 = vmatprep.subr.bf16.mxu1 %v4824_v24  ;;  %3588 = vmatprep.subr.bf16.mxu0 %v4858_v45  ;;  %v4852_v26 = vcombine.high %v8530_v44, %v8529_v43  ;;  %v3093_v51 = vshll.u32 %v4806_v31, 16  ;;  %v7273_v11 = vrot.slane %v3098_v62, 1  ;;  %v4817_v5 = vcombine.low %v8528_v61, %v8527_v50  ;;  %v8533_v32 = vld [vmem:[#allocation76_spill] sm:$0xff]  ;;  %v8534_v36 = vld [vmem:[#allocation75_spill] sm:$0xff]  ;;  %v8535_v58 = vld [vmem:[#allocation138_spill] sm:$0xff] }
 0x582   :  { %3614 = vmatprep.mubr.bf16.mxu0 %v4806_v31  ;;  %v4851_v14 = vcombine.low %v8530_v44, %v8529_v43  ;;  %v4816_v16 = vcombine.high %v8532_v9, %v8531_v17  ;;  %v4850_v1 = vcombine.high %v8534_v36, %v8533_v32  ;;  %v4815_v0 = vcombine.low %v8532_v9, %v8531_v17  ;;  %v8536_v15 = vld [vmem:[#allocation137_spill] sm:$0xff]  ;;  %v8537_v54 = vld [vmem:[#allocation106_spill] sm:$0xff]  ;;  %v8539_v52 = vld [vmem:[#allocation136_spill] sm:$0xff] }
 0x583   :  { %v3095_v29 = vrot.slane %v3093_v51, 1  ;;  %v4849_v59 = vcombine.low %v8534_v36, %v8533_v32  ;;  %v4846_v41 = vcombine.high %v8536_v15, %v8535_v58  ;;  %v8538_v63 = vld [vmem:[#allocation105_spill] sm:$0xff]  ;;  %v4845_v39 = vcombine.low %v8536_v15, %v8535_v58  ;;  %v8540_v42 = vld [vmem:[#allocation135_spill] sm:$0xff]  ;;  %v8541_v24 = vld [vmem:[#allocation104_spill] sm:$0xff] }
 0x584   :  { %3333 = vmatpush1.bf16.msra.mxu1 %v4823_v7  ;;  %3589 = vmatpush1.bf16.msra.mxu0 %v4857_v12  ;;  %v4880_v49 = vcombine.high %v8538_v63, %v8537_v54  ;;  %v4879_v37 = vcombine.low %v8538_v63, %v8537_v54  ;;  %v4844_v33 = vcombine.high %v8540_v42, %v8539_v52  ;;  %v8542_v8 = vld [vmem:[#allocation103_spill] sm:$0xff]  ;;  %v8543_v19 = vld [vmem:[#allocation134_spill] sm:$0xff]  ;;  %v8544_v22 = vld [vmem:[#allocation133_spill] sm:$0xff] }
 0x585   :  { %3334 = vmatprep.subr.bf16.mxu1 %v4822_v18  ;;  %3590 = vmatprep.subr.bf16.mxu0 %v4856_v57  ;;  %v3096_v13 = vor.u32 %v3095_v29, %v3091_v53  ;;  %v4878_v23 = vcombine.high %v8542_v8, %v8541_v24  ;;  %v4843_v45 = vcombine.low %v8540_v42, %v8539_v52  ;;  %v3007_v12 = vld [vmem:[#allocation3 + $0x8] sm:$0x33]  ;;  %v8545_v6 = vld [vmem:[#allocation102_spill] sm:$0xff]  ;;  %v8546_v46 = vld [vmem:[#allocation101_spill] sm:$0xff]  ;;  %v3706_v53 = vrot.slane %v7248_v38, 1 }
 0x586   :  { %v4877_v7 = vcombine.low %v8542_v8, %v8541_v24  ;;  %v4842_v18 = vcombine.high %v8544_v22, %v8543_v19  ;;  %v4876_v57 = vcombine.high %v8546_v46, %v8545_v6  ;;  %v4875_v35 = vcombine.low %v8546_v46, %v8545_v6  ;;  %v8547_v28 = vld [vmem:[#allocation132_spill] sm:$0xff]  ;;  %v7323_v50 = vld [vmem:[#allocation3] ss:$56 sps:$4 sm:$0xff]  }
 0x587   :  { %v3101_v10 = vsel %vm1314_vm6, %v3096_v13, %v7273_v11  ;;  %v8549_v21 = vld [vmem:[#allocation100_spill] sm:$0xff]  ;;  %v7331_v44 = vcombine.high %v3007_v12, %v3007_v12  ;;  %v3708_v17 = vrot.slane %v7323_v50, 1  ;;  %v8553_v52 = vld [vmem:[#allocation98_spill] sm:$0xff]  ;;  %v8554_v42 = vld [vmem:[#allocation97_spill] sm:$0xff] }
 0x588   :  { %3335 = vmatpush1.bf16.msra.mxu1 %v4821_v4  ;;  %3591 = vmatpush1.bf16.msra.mxu0 %v4855_v20  ;;  %v4841_v4 = vcombine.low %v8544_v22, %v8543_v19  ;;  %v3663_v20 = vld [vmem:[#allocation3 + $0x28] sm:$0xee]  ;;  %v7329_v43 = vld [vmem:[#allocation3 + $0x30] ss:$-16 sps:$4 sm:$0xff]   ;;  %v4871_v8 = vcombine.low %v8554_v42, %v8553_v52 }
 0x589   :  { %3336 = vmatprep.subr.bf16.mxu1 %v4820_v30  ;;  %3592 = vmatprep.subr.bf16.mxu0 %v4854_v27  ;;  %v8548_v30 = vld [vmem:[#allocation131_spill] sm:$0xff]  ;;  %v4881_v51 = vcombine.low %v3663_v20, %v7256_v3  ;;  %v4882_v29 = vcombine.high %v3663_v20, %v7256_v3  ;;  %v3718_v32 = vrot.slane %v7331_v44, 1  ;;  %v8557_v19 = vld [vmem:[#allocation96_spill] sm:$0xff]  ;;  %v8561_v20 = vld [vmem:[#allocation94_spill] sm:$0xff] }
 0x58a   :  { %3358 = vmatprep.mubr.bf16.mxu1 %v3101_v10  ;;  %v4840_v56 = vcombine.high %v8548_v30, %v8547_v28  ;;  %v8550_v27 = vld [vmem:[#allocation99_spill] sm:$0xff]  ;;  %v4839_v62 = vcombine.low %v8548_v30, %v8547_v28 }
 0x58b   :  { %v4874_v31 = vcombine.high %v8550_v27, %v8549_v21  ;;  %v4873_v61 = vcombine.low %v8550_v27, %v8549_v21  ;;  %v3702_v36 = vrot.slane %v4881_v51, 1  ;;  %v8558_v22 = vld [vmem:[#allocation95_spill] sm:$0xff]  ;;  %v8565_v51 = vld [vmem:[#allocation92_spill] sm:$0xff] }
 0x58c   :  { %3337 = vmatpush1.bf16.msra.mxu1 %v4819_v55  ;;  %3593 = vmatpush1.bf16.msra.mxu0 %v4853_v48  ;;  %v7319_v55 = vld [vmem:[#allocation3 + $0x10] ss:$8 sps:$4 sm:$0xff]   ;;  %v7321_v48 = vld [vmem:[#allocation3 + $0x4] ss:$56 sps:$4 sm:$0xff]   ;;  %v4869_v46 = vcombine.low %v8558_v22, %v8557_v19 }
 0x58d   :  { %3338 = vmatprep.subr.bf16.mxu1 %v4818_v40  ;;  %3594 = vmatprep.subr.bf16.mxu0 %v4852_v26  ;;  %v7327_v40 = vld [vmem:[#allocation3 + $0x34] ss:$-16 sps:$4 sm:$0xff]   ;;  %v7333_v26 = vcombine.low %v3007_v12, %v3007_v12  ;;  %v3086_v30 = vshll.u32 %v7319_v55, 16 }
 0x58e   :  { %v3714_v9 = vrot.slane %v7327_v40, 1 }
 0x58f   :  { %v3716_v10 = vrot.slane %v7333_v26, 1 }
 0x590   :  { %3339 = vmatpush1.bf16.msra.mxu1 %v4817_v5  ;;  %3595 = vmatpush1.bf16.msra.mxu0 %v4851_v14  ;;  %v3703_v5 = vrot.slane %v7319_v55, 1  ;;  %v3710_v14 = vrot.slane %v7321_v48, 1  ;;  %v7360_v15 = vsel %vm1939_vm1, %v3714_v9, %v3718_v32 }
 0x591   :  { %3340 = vmatprep.subr.bf16.mxu1 %v4816_v16  ;;  %3596 = vmatprep.subr.bf16.mxu0 %v4850_v1  ;;  %v3712_v16 = vrot.slane %v7329_v43, 1  ;;  %v3705_v1 = vrot.slane %v4882_v29, 1  ;;  %v8566_v29 = vld [vmem:[#allocation91_spill] sm:$0xff] }
 0x592   :  { %v7345_v13 = vsel %vm1939_vm1, %v3706_v53, %v3710_v14  ;;  %v7366_v54 = vsel %vm1939_vm1, %v3702_v36, %v3703_v5 }
 0x593   :  { %v7355_v58 = vsel %vm1939_vm1, %v3708_v17, %v3712_v16  ;;  %v7371_v63 = vsel %vm1939_vm1, %v3712_v16, %v3716_v10  ;;  %v4865_v16 = vcombine.low %v8566_v29, %v8565_v51 }
 0x594   :  { %3341 = vmatpush1.bf16.msra.mxu1 %v4815_v0  ;;  %3597 = vmatpush1.bf16.msra.mxu0 %v4849_v59  ;;  %v7349_v0 = vsel %vm1939_vm1, %v3703_v5, %v3708_v17  ;;  %v7352_v59 = vsel %vm1939_vm1, %v3710_v14, %v3714_v9  ;;  %v4866_v5 = vcombine.high %v8566_v29, %v8565_v51  ;;  %v3110_v14 = vshrl.u32 %v7248_v38, 16 }
 0x595   :  { %3342 = vmatprep.subr.bf16.mxu1 %v4846_v41  ;;  %3598 = vmatprep.subr.bf16.mxu0 %v4880_v49  ;;  %v7363_v41 = vsel %vm1939_vm1, %v3705_v1, %v3706_v53  ;;  %v8551_v49 = vld [vmem:[#allocation130_spill] sm:$0xff]  ;;  %v3114_v17 = vshll.u32 %v7321_v48, 16  ;;  %v3088_v1 = vrot.slane %v3086_v30, 1  ;;  %v3118_v30 = vshrl.u32 %v7323_v50, 16 }
 0x598   :  { %3343 = vmatpush2.bf16.msra.mxu1 %v4845_v39  ;;  %3599 = vmatpush2.bf16.msra.mxu0 %v4879_v37  ;;  %v8552_v39 = vld [vmem:[#allocation129_spill] sm:$0xff] }
 0x599   :  { %3344 = vmatprep.subr.bf16.mxu1 %v4844_v33  ;;  %3600 = vmatprep.subr.bf16.mxu0 %v4878_v23  ;;  %v4838_v37 = vcombine.high %v8552_v39, %v8551_v49  ;;  %v4872_v33 = vcombine.high %v8554_v42, %v8553_v52  ;;  %v4837_v24 = vcombine.low %v8552_v39, %v8551_v49  ;;  %v8567_v49 = vld [vmem:[#allocation154_spill] sm:$0xff]  ;;  %v8568_v39 = vld [vmem:[#allocation153_spill] sm:$0xff]  ;;  %v3116_v42 = vrot.slane %v3114_v17, 1 }
 0x59a   :  { %v4805_v23 = vcombine.low %v7254_v2, %v7256_v3  ;;  %v8559_v2 = vld [vmem:[#allocation126_spill] sm:$0xff]  ;;  %v8560_v3 = vld [vmem:[#allocation125_spill] sm:$0xff]  ;;  %v3112_v52 = vor.u32 %v3110_v14, %v7273_v11  ;;  %v3126_v11 = vshrl.u32 %v7321_v48, 16 }
 0x59b   :  { %v8576_v14 = vld [vmem:[#allocation145_spill] sm:$0xff] }
 0x59c   :  { %3345 = vmatpush2.bf16.msra.mxu1 %v4843_v45  ;;  %3601 = vmatpush2.bf16.msra.mxu0 %v4877_v7  ;;  %v8555_v45 = vld [vmem:[#allocation128_spill] sm:$0xff]  ;;  %v8556_v7 = vld [vmem:[#allocation127_spill] sm:$0xff]  ;;  %v3079_v27 = vshrl.u32 %v4805_v23, 16 }
 0x59d   :  { %3346 = vmatprep.subr.bf16.mxu1 %v4842_v18  ;;  %3602 = vmatprep.subr.bf16.mxu0 %v4876_v57  ;;  %v4836_v12 = vcombine.high %v8556_v7, %v8555_v45  ;;  %v4870_v18 = vcombine.high %v8558_v22, %v8557_v19  ;;  %v4835_v6 = vcombine.low %v8556_v7, %v8555_v45  ;;  %v3081_v57 = vshll.u32 %v4805_v23, 16  ;;  %v8569_v7 = vld [vmem:[#allocation152_spill] sm:$0xff] }
 0x59e   :  { %v3106_v45 = vshll.u32 %v7323_v50, 16  ;;  %v3117_v22 = vsel %vm1314_vm6, %v3112_v52, %v3116_v42 }
 0x5a0   :  { %3347 = vmatpush2.bf16.msra.mxu1 %v4841_v4  ;;  %3603 = vmatpush2.bf16.msra.mxu0 %v4875_v35  ;;  %v4834_v4 = vcombine.high %v8560_v3, %v8559_v2  ;;  %v8562_v35 = vld [vmem:[#allocation93_spill] sm:$0xff] }
 0x5a1   :  { %3348 = vmatprep.subr.bf16.mxu1 %v4840_v56  ;;  %3604 = vmatprep.subr.bf16.mxu0 %v4874_v31  ;;  %v4868_v28 = vcombine.high %v8562_v35, %v8561_v20  ;;  %v4833_v56 = vcombine.low %v8560_v3, %v8559_v2  ;;  %v4867_v21 = vcombine.low %v8562_v35, %v8561_v20  ;;  %v3083_v31 = vrot.slane %v3081_v57, 1  ;;  %v8571_v2 = vld [vmem:[#allocation150_spill] sm:$0xff]  ;;  %v8572_v3 = vld [vmem:[#allocation149_spill] sm:$0xff] }
 0x5a2   :  { %v3108_v57 = vrot.slane %v3106_v45, 1  ;;  %v3128_v20 = vor.u32 %v3126_v11, %v3116_v42  ;;  %v8579_v45 = vld [vmem:[#allocation142_spill] sm:$0xff] }
 0x5a3   :  { %v3084_v36 = vor.u32 %v3083_v31, %v3079_v27  ;;  %v8574_v27 = vld [vmem:[#allocation147_spill] sm:$0xff] }
 0x5a4   :  { %3349 = vmatpush2.bf16.msra.mxu1 %v4839_v62  ;;  %3605 = vmatpush2.bf16.msra.mxu0 %v4873_v61  ;;  %v8563_v62 = vld [vmem:[#allocation124_spill] sm:$0xff]  ;;  %v8564_v61 = vld [vmem:[#allocation123_spill] sm:$0xff]  ;;  %v3120_v51 = vor.u32 %v3118_v30, %v3108_v57 }
 0x5a5   :  { %3350 = vmatprep.subr.bf16.mxu1 %v4838_v37  ;;  %3606 = vmatprep.subr.bf16.mxu0 %v4872_v33  ;;  %v4832_v53 = vcombine.high %v8564_v61, %v8563_v62  ;;  %v4831_v9 = vcombine.low %v8564_v61, %v8563_v62  ;;  %v4898_v37 = vcombine.high %v8568_v39, %v8567_v49  ;;  %v3146_v61 = vshll.u32 %v7331_v44, 16  ;;  %v8586_v30 = vld [vmem:[#allocation167_spill] sm:$0xff] }
 0x5a6   :  { %v3089_v33 = vsel %vm1314_vm6, %v3084_v36, %v3088_v1 }
 0x5a8   :  { %3351 = vmatpush2.bf16.msra.mxu1 %v4837_v24  ;;  %3607 = vmatpush2.bf16.msra.mxu0 %v4871_v8  ;;  %v4897_v24 = vcombine.low %v8568_v39, %v8567_v49  ;;  %v3102_v8 = vshrl.u32 %v7319_v55, 16  ;;  %v3138_v49 = vshll.u32 %v7333_v26, 16  ;;  %v8577_v39 = vld [vmem:[#allocation144_spill] sm:$0xff] }
 0x5a9   :  { %3352 = vmatprep.subr.bf16.mxu1 %v4836_v12  ;;  %3608 = vmatprep.subr.bf16.mxu0 %v4870_v18  ;;  %v8570_v12 = vld [vmem:[#allocation151_spill] sm:$0xff]  ;;  %v3130_v18 = vshll.u32 %v7327_v40, 16 }
 0x5aa   :  { %v4896_v19 = vcombine.high %v8570_v12, %v8569_v7 }
 0x5ab   :  { %v3132_v35 = vrot.slane %v3130_v18, 1  ;;  %v8581_v18 = vld [vmem:[#allocation140_spill] sm:$0xff] }
 0x5ac   :  { %3353 = vmatpush2.bf16.msra.mxu1 %v4835_v6  ;;  %3609 = vmatpush2.bf16.msra.mxu0 %v4869_v46  ;;  %v4895_v6 = vcombine.low %v8570_v12, %v8569_v7  ;;  %v3104_v46 = vor.u32 %v3102_v8, %v3088_v1  ;;  %v3134_v1 = vshrl.u32 %v7329_v43, 16  ;;  %v3153_v8 = vshrl.u32 %v7331_v44, 16  ;;  %v8580_v7 = vld [vmem:[#allocation141_spill] sm:$0xff]  ;;  %v7528_v44 = vld [vmem:[%s7990_s6 + $0xf0] sm:$0xff] }
 0x5ad   :  { %3354 = vmatprep.subr.bf16.mxu1 %v4834_v4  ;;  %3610 = vmatprep.subr.bf16.mxu0 %v4868_v28  ;;  %v4894_v4 = vcombine.high %v8572_v3, %v8571_v2  ;;  %v4893_v28 = vcombine.low %v8572_v3, %v8571_v2  ;;  %v3133_v62 = vsel %vm1314_vm6, %v3128_v20, %v3132_v35  ;;  %v3150_v2 = vshrl.u32 %v7333_v26, 16  ;;  %v8583_v3 = vld [vmem:[#allocation170_spill] sm:$0xff]  ;;  %v7534_v26 = vld [vmem:[%s7990_s6 + $0x70] sm:$0xff] }
 0x5ae   :  { %v4886_v12 = vcombine.high %v8580_v7, %v8579_v45 }
 0x5b0   :  { %3355 = vmatpush2.bf16.msra.mxu1 %v4833_v56  ;;  %3611 = vmatpush2.bf16.msra.mxu0 %v4867_v21  ;;  %v3122_v56 = vshll.u32 %v7329_v43, 16  ;;  %v8573_v21 = vld [vmem:[#allocation148_spill] sm:$0xff] }
 0x5b1   :  { %3356 = vmatprep.subr.bf16.mxu1 %v4832_v53  ;;  %3612 = vmatprep.subr.bf16.mxu0 %v4866_v5  ;;  %v4892_v31 = vcombine.high %v8574_v27, %v8573_v21  ;;  %v4891_v53 = vcombine.low %v8574_v27, %v8573_v21  ;;  %v8575_v5 = vld [vmem:[#allocation146_spill] sm:$0xff] }
 0x5b2   :  { %v3124_v29 = vrot.slane %v3122_v56, 1  ;;  %v4890_v17 = vcombine.high %v8576_v14, %v8575_v5  ;;  %v4889_v36 = vcombine.low %v8576_v14, %v8575_v5  ;;  %v8587_v27 = vld [vmem:[#allocation166_spill] sm:$0xff]  ;;  %v8592_v14 = vld [vmem:[#allocation161_spill] sm:$0xff] }
 0x5b3   :  { %v8591_v5 = vld [vmem:[#allocation162_spill] sm:$0xff] }
 0x5b4   :  { %3357 = vmatpush2.bf16.msra.mxu1 %v4831_v9  ;;  %3613 = vmatpush2.bf16.msra.mxu0 %v4865_v16  ;;  %v3148_v16 = vrot.slane %v3146_v61, 1  ;;  %v8589_v61 = vld [vmem:[#allocation164_spill] sm:$0xff] }
 0x5b5   :  { %3890 = vmatprep.subr.bf16.mxu1 %v4898_v37  ;;  %v8578_v37 = vld [vmem:[#allocation143_spill] sm:$0xff] }
 0x5b6   :  { %v4888_v52 = vcombine.high %v8578_v37, %v8577_v39  ;;  %v3155_v11 = vor.u32 %v3153_v8, %v3148_v16  ;;  %v7588_v8 = vld [vmem:[%s7990_s6 + $0xc8] sm:$0xff] }
 0x5b7   :  { %3359 = vmatmul.mubr.bf16.vlgmr.msra.gmra.mxu1 %v3089_v33  ;;  %3615 = vmatmul.mubr.bf16.vlgmr.msra.gmra.mxu0 %v4805_v23  ;;  %v3109_v23 = vsel %vm1314_vm6, %v3104_v46, %v3108_v57  ;;  %v3136_v33 = vor.u32 %v3134_v1, %v3124_v29  ;;  %v8595_v1 = vld [vmem:[#allocation158_spill] sm:$0xff] }
 0x5b8   :  { %3891 = vmatpush1.bf16.msra.mxu1 %v4897_v24  ;;  %3368 = vmatprep.mubr.bf16.mxu1 %v3117_v22  ;;  %v3140_v24 = vrot.slane %v3138_v49, 1  ;;  %v8596_v49 = vld [vmem:[#allocation157_spill] sm:$0xff] }
 0x5b9   :  { %3892 = vmatprep.subr.bf16.mxu1 %v4896_v19  ;;  %3624 = vmatprep.mubr.bf16.mxu0 %v7248_v38  ;;  %v3142_v38 = vshrl.u32 %v7327_v40, 16  ;;  %v2974_v19 = vld [vmem:[#allocation3 + $0x8] sm:$0x11] }
 0x5ba   :  { %v3141_v22 = vsel %vm1314_vm6, %v3136_v33, %v3140_v24  ;;  %v4848_v57 = vcombine.high %v2974_v19, %v2974_v19 }
 0x5bb   :  { %v3144_v9 = vor.u32 %v3142_v38, %v3132_v35  ;;  %v3152_v35 = vor.u32 %v3150_v2, %v3140_v24  ;;  %v7582_v24 = vld [vmem:[%s7990_s6 + $0x50] sm:$0xff]  ;;  %v7659_v2 = vld [vmem:[%s7990_s6 + $0x98] sm:$0xff] }
 0x5bc   :  { %3893 = vmatpush1.bf16.msra.mxu1 %v4895_v6  ;;  %v8582_v6 = vld [vmem:[#allocation139_spill] sm:$0xff]  ;;  %8601 = vst [vmem:[#allocation34_spill] sm:$0xff] %v7659_v2 }
 0x5bd   :  { %3894 = vmatprep.subr.bf16.mxu1 %v4894_v4  ;;  %v3149_v42 = vsel %vm1314_vm6, %v3144_v9, %v3148_v16  ;;  %v4884_v46 = vcombine.high %v8582_v6, %v8581_v18  ;;  %v8584_v4 = vld [vmem:[#allocation169_spill] sm:$0xff]  ;;  %v8593_v9 = vld [vmem:[#allocation160_spill] sm:$0xff]  ;;  %v8594_v16 = vld [vmem:[#allocation159_spill] sm:$0xff] }
 0x5be   :  { %v4914_v20 = vcombine.high %v8584_v4, %v8583_v3 }
 0x5bf   :  { %3369 = vmatmul.mubr.bf16.gmra.mxu1 %v3109_v23  ;;  %3625 = vmatmul.mubr.bf16.gmra.mxu0 %v7319_v55  ;;  %v3125_v55 = vsel %vm1314_vm6, %v3120_v51, %v3124_v29  ;;  %v4913_v23 = vcombine.low %v8584_v4, %v8583_v3  ;;  %v7670_v3 = vld [vmem:[%s7990_s6 + $0x90] sm:$0xff] }
 0x5c0   :  { %3895 = vmatpush1.bf16.msra.mxu1 %v4893_v28  ;;  %3378 = vmatprep.mubr.bf16.mxu1 %v3133_v62  ;;  %v4847_v28 = vcombine.low %v2974_v19, %v2974_v19  ;;  %v7612_v19 = vld [vmem:[%s7990_s6 + $0xb8] sm:$0xff]  ;;  %8603 = vst [vmem:[#allocation18_spill] sm:$0xff] %v7670_v3  ;;  %v7676_v4 = vld [vmem:[%s7990_s6 + $0x10] sm:$0xff] }
 0x5c1   :  { %3896 = vmatprep.subr.bf16.mxu1 %v4892_v31  ;;  %3634 = vmatprep.mubr.bf16.mxu0 %v7321_v48  ;;  %v4887_v48 = vcombine.low %v8578_v37, %v8577_v39  ;;  %v8588_v31 = vld [vmem:[#allocation165_spill] sm:$0xff]  ;;  %v4902_v39 = vcombine.high %v8596_v49, %v8595_v1  ;;  %v4901_v37 = vcombine.low %v8596_v49, %v8595_v1 }
 0x5c2   :  { %v4910_v62 = vcombine.high %v8588_v31, %v8587_v27  ;;  %v4909_v38 = vcombine.low %v8588_v31, %v8587_v27  ;;  %8604 = vst [vmem:[#allocation17_spill] sm:$0xff] %v7676_v4 }
 0x5c4   :  { %3897 = vmatpush1.bf16.msra.mxu1 %v4891_v53  ;;  %v8590_v53 = vld [vmem:[#allocation163_spill] sm:$0xff] }
 0x5c5   :  { %3898 = vmatprep.subr.bf16.mxu1 %v4890_v17  ;;  %v4908_v51 = vcombine.high %v8590_v53, %v8589_v61  ;;  %v4907_v29 = vcombine.low %v8590_v53, %v8589_v61  ;;  %v4905_v17 = vcombine.low %v8592_v14, %v8591_v5 }
 0x5c7   :  { %3379 = vmatmul.mubr.bf16.gmra.mxu1 %v3125_v55  ;;  %3635 = vmatmul.mubr.bf16.gmra.mxu0 %v7323_v50  ;;  %v4885_v50 = vcombine.low %v8580_v7, %v8579_v45  ;;  %v4903_v55 = vcombine.low %v8594_v16, %v8593_v9  ;;  %v7594_v45 = vld [vmem:[%s7990_s6 + $0x48] sm:$0xff]  ;;  %v7600_v7 = vld [vmem:[%s7990_s6 + $0xc0] sm:$0xff] }
 0x5c8   :  { %3899 = vmatpush1.bf16.msra.mxu1 %v4889_v36  ;;  %3388 = vmatprep.mubr.bf16.mxu1 %v3149_v42  ;;  %v4904_v36 = vcombine.high %v8594_v16, %v8593_v9  ;;  %v8598_v42 = vld [vmem:[#allocation155_spill] sm:$0xff] }
 0x5c9   :  { %3900 = vmatprep.subr.bf16.mxu1 %v4888_v52  ;;  %3644 = vmatprep.mubr.bf16.mxu0 %v7327_v40  ;;  %v4883_v40 = vcombine.low %v8582_v6, %v8581_v18  ;;  %v8597_v52 = vld [vmem:[#allocation156_spill] sm:$0xff]  ;;  %v7636_v18 = vld [vmem:[%s7990_s6 + $0xa8] sm:$0xff] }
 0x5ca   :  { %v4899_v33 = vcombine.low %v8598_v42, %v8597_v52  ;;  %v7642_v6 = vld [vmem:[%s7990_s6 + $0x28] sm:$0xff] }
 0x5cc   :  { %3901 = vmatpush1.bf16.msra.mxu1 %v4887_v48  ;;  %v4900_v48 = vcombine.high %v8598_v42, %v8597_v52 }
 0x5cd   :  { %3902 = vmatprep.subr.bf16.mxu1 %v4886_v12  ;;  %v7606_v12 = vld [vmem:[%s7990_s6 + $0x40] sm:$0xff] }
 0x5cf   :  { %3389 = vmatmul.mubr.bf16.gmra.mxu1 %v3141_v22  ;;  %3645 = vmatmul.mubr.bf16.gmra.mxu0 %v7329_v43  ;;  %v8585_v43 = vld [vmem:[#allocation168_spill] sm:$0xff]  ;;  %v7624_v22 = vld [vmem:[%s7990_s6 + $0xb0] sm:$0xff] }
 0x5d0   :  { %3903 = vmatpush1.bf16.msra.mxu1 %v4885_v50  ;;  %3398 = vmatprep.mubr.bf16.mxu1 %v3155_v11  ;;  %v4912_v56 = vcombine.high %v8586_v30, %v8585_v43  ;;  %v4911_v21 = vcombine.low %v8586_v30, %v8585_v43  ;;  %v7618_v50 = vld [vmem:[%s7990_s6 + $0x38] sm:$0xff]  ;;  %v7630_v11 = vld [vmem:[%s7990_s6 + $0x30] sm:$0xff] }
 0x5d1   :  { %3904 = vmatprep.subr.bf16.mxu1 %v4884_v46  ;;  %3654 = vmatprep.mubr.bf16.mxu0 %v4848_v57  ;;  %v7648_v46 = vld [vmem:[%s7990_s6 + $0xa0] sm:$0xff] }
 0x5d2   :  { %8599 = vst [vmem:[#allocation20_spill] sm:$0xff] %v7648_v46  ;;  %v7654_v57 = vld [vmem:[%s7990_s6 + $0x20] sm:$0xff] }
 0x5d3   :  { %8600 = vst [vmem:[#allocation19_spill] sm:$0xff] %v7654_v57 }
 0x5d4   :  { %3905 = vmatpush1.bf16.msra.mxu1 %v4883_v40  ;;  %v7664_v40 = vld [vmem:[%s7990_s6 + $0x18] sm:$0xff] }
 0x5d5   :  { %3906 = vmatprep.subr.bf16.mxu1 %v4914_v20  ;;  %8602 = vst [vmem:[#allocation33_spill] sm:$0xff] %v7664_v40  ;;  %v7682_v20 = vld [vmem:[%s7990_s6 + $0x88] sm:$0xff] }
 0x5d6   :  { %8605 = vst [vmem:[#allocation32_spill] sm:$0xff] %v7682_v20 }
 0x5d7   :  { %3399 = vmatmul.mubr.bf16.gmra.mxu1 %v3152_v35  ;;  %3655 = vmatmul.mubr.bf16.gmra.mxu0 %v4847_v28  ;;  %v7688_v35 = vld [vmem:[%s7990_s6 + $0x8] sm:$0xff]  ;;  %v7694_v28 = vld [vmem:[%s7990_s6 + $0x80] sm:$0xff] }
 0x5d8   :  { %3907 = vmatpush2.bf16.msra.mxu1 %v4913_v23  ;;  %3922 = vmatprep.mubr.bf16.mxu1 %v7363_v41  ;;  %v4906_v41 = vcombine.high %v8592_v14, %v8591_v5  ;;  %8606 = vst [vmem:[#allocation31_spill] sm:$0xff] %v7688_v35  ;;  %8607 = vst [vmem:[#allocation16_spill] sm:$0xff] %v7694_v28  ;;  %v7700_v23 = vld [vmem:[%s7990_s6] sm:$0xff] }
 0x5d9   :  { %3908 = vmatprep.subr.bf16.mxu1 %v4912_v56  ;;  %8608 = vst [vmem:[#allocation15_spill] sm:$0xff] %v7700_v23 }
 0x5dc   :  { %3909 = vmatpush2.bf16.msra.mxu1 %v4911_v21 }
 0x5dd   :  { %3910 = vmatprep.subr.bf16.mxu1 %v4910_v62 }
 0x5e0   :  { %3911 = vmatpush2.bf16.msra.mxu1 %v4909_v38 }
 0x5e1   :  { %3912 = vmatprep.subr.bf16.mxu1 %v4908_v51 }
 0x5e4   :  { %3913 = vmatpush2.bf16.msra.mxu1 %v4907_v29 }
 0x5e5   :  { %3914 = vmatprep.subr.bf16.mxu1 %v4906_v41 }
 0x5e8   :  { %3915 = vmatpush2.bf16.msra.mxu1 %v4905_v17 }
 0x5e9   :  { %3916 = vmatprep.subr.bf16.mxu1 %v4904_v36 }
 0x5ec   :  { %3917 = vmatpush2.bf16.msra.mxu1 %v4903_v55 }
 0x5ed   :  { %3918 = vmatprep.subr.bf16.mxu1 %v4902_v39 }
 0x5f0   :  { %3919 = vmatpush2.bf16.msra.mxu1 %v4901_v37 }
 0x5f1   :  { %3920 = vmatprep.subr.bf16.mxu1 %v4900_v48 }
 0x5f4   :  { %3921 = vmatpush2.bf16.msra.mxu1 %v4899_v33 }
 0x5f7   :  { %3923 = vmatmul.mubr.bf16.vlgmr.msra.gmra.mxu1 %v7366_v54  ;;  %v7570_v54 = vld [vmem:[%s7990_s6 + $0x58] sm:$0xff] }
 0x5f8   :  { %3932 = vmatprep.mubr.bf16.mxu1 %v7345_v13  ;;  %v7516_v13 = vld [vmem:[%s7990_s6 + $0xf8] sm:$0xff] }
 0x5f9   :  { %5040 = vmatprep.subr.mxu0 %v7516_v13 }
 0x5ff   :  { %3933 = vmatmul.mubr.bf16.gmra.mxu1 %v7349_v0  ;;  %v7522_v0 = vld [vmem:[%s7990_s6 + $0x78] sm:$0xff] }
 0x600   :  { %3942 = vmatprep.mubr.bf16.mxu1 %v7352_v59  ;;  %5041 = vmatpush3.msra.mxu0 %v7522_v0  ;;  %v7552_v59 = vld [vmem:[%s7990_s6 + $0xe0] sm:$0xff] }
 0x601   :  { %5042 = vmatprep.subr.mxu0 %v7528_v44 }
 0x602   :  { %5043 = vmatpush3.msra.mxu0 %v7534_v26 }
 0x607   :  { %3943 = vmatmul.mubr.bf16.gmra.mxu1 %v7355_v58  ;;  %v7558_v58 = vld [vmem:[%s7990_s6 + $0x60] sm:$0xff] }
 0x608   :  { %3952 = vmatprep.mubr.bf16.mxu1 %v7360_v15  ;;  %v7564_v15 = vld [vmem:[%s7990_s6 + $0xd8] sm:$0xff] }
 0x60f   :  { %3953 = vmatmul.mubr.bf16.gmra.mxu1 %v7371_v63  ;;  %v7576_v63 = vld [vmem:[%s7990_s6 + $0xd0] sm:$0xff] }
 0x610   :  { %3962 = vmatprep.mubr.bf16.mxu1 %v3718_v32  ;;  %v7540_v32 = vld [vmem:[%s7990_s6 + $0xe8] sm:$0xff] }
 0x611   :  { %5044 = vmatprep.subr.mxu0 %v7540_v32 }
 0x617   :  { %3963 = vmatmul.mubr.bf16.gmra.mxu1 %v3716_v10  ;;  %v7546_v10 = vld [vmem:[%s7990_s6 + $0x68] sm:$0xff] }
 0x618   :  { %4434 = vmatprep.mubr.f32.mxu1 %v8483_v60  ;;  %5045 = vmatpush3.msra.mxu0 %v7546_v10 }
 0x619   :  { %5046 = vmatprep.subr.mxu0 %v7552_v59 }
 0x61a   :  { %5047 = vmatpush3.msra.mxu0 %v7558_v58 }
 0x61b   :  { %5048 = vmatprep.subr.mxu0 %v7564_v15 }
 0x61c   :  { %5049 = vmatpush3.msra.mxu0 %v7570_v54 }
 0x61d   :  { %5050 = vmatprep.subr.mxu0 %v7576_v63 }
 0x61e   :  { %5051 = vmatpush3.msra.mxu0 %v7582_v24 }
 0x61f   :  { %5052 = vmatprep.subr.mxu0 %v7588_v8 }
 0x620   :  { %5053 = vmatpush3.msra.mxu0 %v7594_v45 }
 0x621   :  { %5054 = vmatprep.subr.mxu0 %v7600_v7 }
 0x622   :  { %5055 = vmatpush3.msra.mxu0 %v7606_v12 }
 0x623   :  { %5056 = vmatprep.subr.mxu0 %v7612_v19 }
 0x624   :  { %5057 = vmatpush3.msra.mxu0 %v7618_v50 }
 0x625   :  { %5058 = vmatprep.subr.mxu0 %v7624_v22 }
 0x626   :  { %5059 = vmatpush3.msra.mxu0 %v7630_v11 }
 0x627   :  { %5060 = vmatprep.subr.mxu0 %v7636_v18 }
 0x628   :  { %5061 = vmatpush3.msra.mxu0 %v7642_v6 }
 0x629   :  { %5062 = vmatprep.subr.mxu0 %v7648_v46 }
 0x62a   :  { %5063 = vmatpush3.msra.mxu0 %v7654_v57 }
 0x62b   :  { %5064 = vmatprep.subr.mxu0 %v7659_v2 }
 0x62c   :  { %5065 = vmatpush3.msra.mxu0 %v7664_v40 }
 0x62d   :  { %5066 = vmatprep.subr.mxu0 %v7670_v3 }
 0x62e   :  { %5067 = vmatpush3.msra.mxu0 %v7676_v4 }
 0x62f   :  { %5068 = vmatprep.subr.mxu0 %v7682_v20 }
 0x630   :  { %5069 = vmatpush3.msra.mxu0 %v7688_v35 }
 0x631   :  { %5070 = vmatprep.subr.mxu0 %v7694_v28 }
 0x632   :  { %5071 = vmatpush3.msra.mxu0 %v7700_v23 }
 0x633   :  { %5075 = vmatprep.subr.mxu0 %v7516_v13 }
 0x677   :  { %v3360_v43 = vpop.f32.mrf.mxu1  ;;  %v3616_v30 = vpop.f32.mrf.mxu0 }
 0x678   :  { %v7706_v56 = vadd.f32 %v3616_v30, %v3360_v43 }
 0x679   :  { %v3362_v21 = vpop.f32.mrf.mxu1  ;;  %v3618_v27 = vpop.f32.mrf.mxu0 }
 0x67a   :  { %v7708_v31 = vadd.f32 %v3618_v27, %v3362_v21 }
 0x67b   :  { %v3364_v62 = vpop.f32.mrf.mxu1  ;;  %v3620_v38 = vpop.f32.mrf.mxu0 }
 0x67c   :  { %v3621_v61 = vadd.f32 %v3620_v38, %v3364_v62 }
 0x67d   :  { %v3366_v53 = vpop.f32.mrf.mxu1  ;;  %v3622_v51 = vpop.f32.mrf.mxu0 }
 0x67e   :  { %v3623_v29 = vadd.f32 %v3622_v51, %v3366_v53 }
 0x67f   :  { %v3370_v5 = vpop.f32.mrf.mxu1  ;;  %v3626_v14 = vpop.f32.mrf.mxu0 }
 0x680   :  { %v3627_v41 = vadd.f32 %v3626_v14, %v3370_v5 }
 0x681   :  { %v3372_v17 = vpop.f32.mrf.mxu1  ;;  %v3628_v9 = vpop.f32.mrf.mxu0 }
 0x682   :  { %v3629_v16 = vadd.f32 %v3628_v9, %v3372_v17 }
 0x683   :  { %v3374_v36 = vpop.f32.mrf.mxu1  ;;  %v3630_v55 = vpop.f32.mrf.mxu0 }
 0x684   :  { %v7710_v1 = vadd.f32 %v3630_v55, %v3374_v36 }
 0x685   :  { %v3376_v49 = vpop.f32.mrf.mxu1  ;;  %v3632_v39 = vpop.f32.mrf.mxu0 }
 0x686   :  { %v3633_v37 = vadd.f32 %v3632_v39, %v3376_v49 }
 0x687   :  { %v3380_v52 = vpop.f32.mrf.mxu1  ;;  %v3636_v42 = vpop.f32.mrf.mxu0 }
 0x688   :  { %v3637_v48 = vadd.f32 %v3636_v42, %v3380_v52 }
 0x689   :  { %v3382_v33 = vpop.f32.mrf.mxu1  ;;  %v3638_v13 = vpop.f32.mrf.mxu0 }
 0x68a   :  { %v3639_v43 = vadd.f32 %v3638_v13, %v3382_v33 }
 0x68b   :  { %v3384_v30 = vpop.f32.mrf.mxu1  ;;  %v3640_v21 = vpop.f32.mrf.mxu0 }
 0x68c   :  { %v7712_v27 = vadd.f32 %v3640_v21, %v3384_v30 }
 0x68d   :  { %v3386_v62 = vpop.f32.mrf.mxu1  ;;  %v3642_v38 = vpop.f32.mrf.mxu0 }
 0x68e   :  { %v7714_v53 = vadd.f32 %v3642_v38, %v3386_v62 }
 0x68f   :  { %v3390_v51 = vpop.f32.mrf.mxu1  ;;  %v3646_v5 = vpop.f32.mrf.mxu0 }
 0x690   :  { %v7716_v14 = vadd.f32 %v3646_v5, %v3390_v51 }
 0x691   :  { %v3392_v17 = vpop.f32.mrf.mxu1  ;;  %v3648_v9 = vpop.f32.mrf.mxu0 }
 0x692   :  { %v7718_v36 = vadd.f32 %v3648_v9, %v3392_v17 }
 0x693   :  { %v3394_v55 = vpop.f32.mrf.mxu1  ;;  %v3650_v49 = vpop.f32.mrf.mxu0 }
 0x694   :  { %v7720_v39 = vadd.f32 %v3650_v49, %v3394_v55 }
 0x695   :  { %v3396_v52 = vpop.f32.mrf.mxu1  ;;  %v3652_v42 = vpop.f32.mrf.mxu0 }
 0x696   :  { %v7722_v33 = vadd.f32 %v3652_v42, %v3396_v52 }
 0x697   :  { %v3400_v13 = vpop.f32.mrf.mxu1  ;;  %v3656_v30 = vpop.f32.mrf.mxu0 }
 0x698   :  { %v7724_v21 = vadd.f32 %v3656_v30, %v3400_v13  ;;  %v2963_v13 = vld [vmem:[%s7995_s11] sm:$0x3] }
 0x699   :  { %v7726_v62 = vpop.f32.mrf.mxu1  ;;  %v7728_v38 = vpop.f32.mrf.mxu0  ;;  %v3993_v3 = vrot.slane %v2963_v13, %v6953_v47 }
 0x69b   :  { %v3404_v51 = vpop.f32.mrf.mxu1  ;;  %v3660_v5 = vpop.f32.mrf.mxu0 }
 0x69c   :  { %v7735_v51 = vrot.slane %v2963_v13, %v8486_v34 }
 0x69d   :  { %v3405_v17 = vpop.f32.mrf.mxu1  ;;  %v3661_v9 = vpop.f32.mrf.mxu0 }
 0x6b7   :  { %v3924_v25 = vpop.f32.mrf.mxu1 }
 0x6b8   :  { %v3971_v4 = vadd.f32 %v3924_v25, %v7706_v56 }
 0x6b9   :  { %v3926_v60 = vpop.f32.mrf.mxu1 }
 0x6ba   :  { %v3972_v20 = vadd.f32 %v3926_v60, %v7708_v31 }
 0x6bb   :  { %v3928_v55 = vpop.f32.mrf.mxu1 }
 0x6bc   :  { %v3973_v5 = vadd.f32 %v3928_v55, %v3621_v61  ;;  %v7743_v60 = vadd.f32 %v7735_v51, %v3972_v20 }
 0x6bd   :  { %v3930_v49 = vpop.f32.mrf.mxu1 }
 0x6be   :  { %v3974_v30 = vadd.f32 %v3930_v49, %v3623_v29  ;;  %v7745_v31 = vadd.f32 %v3993_v3, %v3973_v5 }
 0x6bf   :  { %v3934_v23 = vpop.f32.mrf.mxu1 }
 0x6c0   :  { %v3975_v40 = vadd.f32 %v3934_v23, %v3627_v41  ;;  %v7740_v57 = vadd.f32 %v7735_v51, %v3974_v30  ;;  %v7754_v23 = vadd.f32 %v3993_v3, %v3971_v4  ;;  %v8610_v4 = vld [vmem:[#allocation177_spill] sm:$0xff] }
 0x6c1   :  { %v3936_v28 = vpop.f32.mrf.mxu1 }
 0x6c2   :  { %v3976_v17 = vadd.f32 %v3936_v28, %v3629_v16  ;;  %8609 = vst [vmem:[#allocation30_spill] sm:$0xff] %v7740_v57  ;;  %v7756_v56 = vadd.f32 %v3993_v3, %v3975_v40  ;;  %v4069_v20 = vmul.f32 %v7740_v57, %v7740_v57  ;;  %v4051_v40 = vadd.f32 %v7740_v57, %v7743_v60 }
 0x6c3   :  { %v3938_v52 = vpop.f32.mrf.mxu1 }
 0x6c4   :  { %v3977_v28 = vadd.f32 %v3938_v52, %v7710_v1  ;;  %v7749_v61 = vadd.f32 %v7735_v51, %v3976_v17 }
 0x6c5   :  { %v3940_v42 = vpop.f32.mrf.mxu1 }
 0x6c6   :  { %v3978_v46 = vadd.f32 %v3940_v42, %v3633_v37  ;;  %v4067_v37 = vmul.f32 %v7743_v60, %v7743_v60  ;;  %v4052_v17 = vadd.f32 %v4051_v40, %v7749_v61 }
 0x6c7   :  { %v3944_v35 = vpop.f32.mrf.mxu1 }
 0x6c8   :  { %v3979_v2 = vadd.f32 %v3944_v35, %v3637_v48  ;;  %v7763_v16 = vadd.f32 %v7735_v51, %v3978_v46  ;;  %v4036_v48 = vadd.f32 %v7745_v31, %v7754_v23  ;;  %v4099_v5 = vadd.f32 %v4069_v20, %v4067_v37 }
 0x6c9   :  { %v3946_v9 = vpop.f32.mrf.mxu1 }
 0x6ca   :  { %v3980_v29 = vadd.f32 %v3946_v9, %v3639_v43  ;;  %v7758_v41 = vadd.f32 %v3993_v3, %v3979_v2  ;;  %v7769_v43 = vadd.f32 %v3993_v3, %v3977_v28  ;;  %v4071_v2 = vmul.f32 %v7749_v61, %v7749_v61 }
 0x6cb   :  { %v3948_v49 = vpop.f32.mrf.mxu1  ;;  %v4037_v42 = vadd.f32 %v4036_v48, %v7756_v56  ;;  %v4073_v9 = vmul.f32 %v7763_v16, %v7763_v16  ;;  %v4053_v57 = vadd.f32 %v4052_v17, %v7763_v16 }
 0x6cc   :  { %v7752_v25 = vadd.f32 %v7735_v51, %v3980_v29  ;;  %v7781_v13 = vmul.f32 %v8610_v4, %v7758_v41  ;;  %v3981_v30 = vadd.f32 %v3948_v49, %v7712_v27  ;;  %v4100_v48 = vadd.f32 %v4099_v5, %v4071_v2 }
 0x6cd   :  { %v3950_v35 = vpop.f32.mrf.mxu1  ;;  %v3659_v2 = vadd.f32 %v7728_v38, %v7726_v62 }
 0x6ce   :  { %v4027_v55 = vmul.f32 %v8610_v4, %v7752_v25  ;;  %v3982_v46 = vadd.f32 %v3950_v35, %v7714_v53  ;;  %v4038_v53 = vadd.f32 %v4037_v42, %v7769_v43  ;;  %v7795_v20 = vadd.f32 %v3993_v3, %v3981_v30 }
 0x6cf   :  { %v3954_v1 = vpop.f32.mrf.mxu1 }
 0x6d0   :  { %v3983_v35 = vadd.f32 %v3954_v1, %v7716_v14  ;;  %v4075_v4 = vmul.f32 %v4027_v55, %v7752_v25  ;;  %v7793_v27 = vadd.f32 %v7735_v51, %v3982_v46  ;;  %v4039_v37 = vadd.f32 %v4038_v53, %v7781_v13 }
 0x6d1   :  { %v3956_v52 = vpop.f32.mrf.mxu1  ;;  %v4054_v42 = vadd.f32 %v4053_v57, %v4027_v55 }
 0x6d2   :  { %v3984_v29 = vadd.f32 %v3956_v52, %v7718_v36  ;;  %v4101_v52 = vadd.f32 %v4100_v48, %v4073_v9  ;;  %v7805_v46 = vadd.f32 %v3993_v3, %v3983_v35  ;;  %v4077_v30 = vmul.f32 %v7793_v27, %v7793_v27 }
 0x6d3   :  { %v3958_v28 = vpop.f32.mrf.mxu1  ;;  %v4040_v57 = vadd.f32 %v4039_v37, %v7795_v20 }
 0x6d4   :  { %v3985_v36 = vadd.f32 %v3958_v28, %v7720_v39  ;;  %v7801_v14 = vadd.f32 %v7735_v51, %v3984_v29  ;;  %v4102_v5 = vadd.f32 %v4101_v52, %v4075_v4  ;;  %v4055_v29 = vadd.f32 %v4054_v42, %v7793_v27 }
 0x6d5   :  { %v3960_v49 = vpop.f32.mrf.mxu1  ;;  %v4041_v53 = vadd.f32 %v4040_v57, %v7805_v46 }
 0x6d6   :  { %v3986_v40 = vadd.f32 %v3960_v49, %v7722_v33  ;;  %v7814_v55 = vadd.f32 %v3993_v3, %v3985_v36  ;;  %v4079_v62 = vmul.f32 %v7801_v14, %v7801_v14  ;;  %v4056_v48 = vadd.f32 %v4055_v29, %v7801_v14  ;;  %v8613_v49 = vld [vmem:[#allocation178_spill] sm:$0xff] }
 0x6d7   :  { %v3964_v1 = vpop.f32.mrf.mxu1 }
 0x6d8   :  { %v7810_v17 = vadd.f32 %v7735_v51, %v3986_v40  ;;  %v3987_v39 = vadd.f32 %v3964_v1, %v7724_v21  ;;  %v4103_v21 = vadd.f32 %v4102_v5, %v4077_v30  ;;  %v4042_v40 = vadd.f32 %v4041_v53, %v7814_v55 }
 0x6d9   :  { %v3966_v33 = vpop.f32.mrf.mxu1  ;;  %v4070_v53 = vmul.f32 %v7756_v56, %v7756_v56 }
 0x6da   :  { %8611 = vst [vmem:[#allocation29_spill] sm:$0xff] %v7810_v17  ;;  %v3988_v9 = vadd.f32 %v3966_v33, %v3659_v2  ;;  %v7819_v38 = vadd.f32 %v3993_v3, %v3987_v39  ;;  %v4081_v4 = vmul.f32 %v7810_v17, %v7810_v17  ;;  %v4104_v52 = vadd.f32 %v4103_v21, %v4079_v62 }
 0x6db   :  { %v3968_v28 = vpop.f32.mrf.mxu1  ;;  %v4057_v42 = vadd.f32 %v4056_v48, %v7810_v17  ;;  %v4068_v33 = vmul.f32 %v7745_v31, %v7745_v31  ;;  %v4066_v62 = vmul.f32 %v7754_v23, %v7754_v23 }
 0x6dc   :  { %v7823_v35 = vadd.f32 %v7735_v51, %v3988_v9  ;;  %v4034_v37 = vmul.f32 %v8613_v49, %v7819_v38  ;;  %v4105_v30 = vadd.f32 %v4104_v52, %v4081_v4  ;;  %v4072_v4 = vmul.f32 %v7769_v43, %v7769_v43 }
 0x6dd   :  { %v3969_v36 = vpop.f32.mrf.mxu1 }
 0x6de   :  { %8612 = vst [vmem:[#allocation14_spill] sm:$0xff] %v7823_v35  ;;  %v4035_v3 = vmul.f32 %v8613_v49, %v7823_v35  ;;  %v4043_v51 = vsel %vm1033_vm8, %v4034_v37, 0.0  ;;  %v4084_v36 = vadd.f32 %v4068_v33, %v4066_v62  ;;  %v4076_v33 = vmul.f32 %v7795_v20, %v7795_v20 }
 0x6df   :  { %v4044_v1 = vadd.f32 %v4043_v51, %v4042_v40  ;;  %v4074_v51 = vmul.f32 %v7781_v13, %v7758_v41 }
 0x6e0   :  { %v4058_v2 = vsel %vm1033_vm8, %v4035_v3, 0.0  ;;  %v4083_v5 = vmul.f32 %v4035_v3, %v7823_v35 }
 0x6e1   :  { %v4059_v39 = vadd.f32 %v4058_v2, %v4057_v42  ;;  %v4045_v57 = vrot.slane %v4044_v1, 4  ;;  %v4085_v42 = vadd.f32 %v4084_v36, %v4070_v53  ;;  %v4082_v53 = vmul.f32 %v4034_v37, %v7819_v38 }
 0x6e2   :  { %v4106_v9 = vsel %vm1033_vm8, %v4083_v5, 0.0 }
 0x6e3   :  { %v4107_v29 = vadd.f32 %v4106_v9, %v4105_v30  ;;  %v4060_v28 = vrot.slane %v4059_v39, 4  ;;  %v4046_v21 = vadd.f32 %v4045_v57, %v4044_v1  ;;  %v4086_v9 = vadd.f32 %v4085_v42, %v4072_v4 }
 0x6e5   :  { %v4061_v48 = vadd.f32 %v4060_v28, %v4059_v39  ;;  %v4108_v49 = vrot.slane %v4107_v29, 4  ;;  %v4047_v40 = vrot.slane %v4046_v21, 2  ;;  %v4087_v39 = vadd.f32 %v4086_v9, %v4074_v51 }
 0x6e7   :  { %v4062_v3 = vrot.slane %v4061_v48, 2  ;;  %v4109_v52 = vadd.f32 %v4108_v49, %v4107_v29  ;;  %v4048_v2 = vadd.f32 %v4047_v40, %v4046_v21  ;;  %v4078_v29 = vmul.f32 %v7805_v46, %v7805_v46 }
 0x6e8   :  { %v4088_v21 = vadd.f32 %v4087_v39, %v4076_v33 }
 0x6e9   :  { %v4063_v5 = vadd.f32 %v4062_v3, %v4061_v48  ;;  %v4110_v30 = vrot.slane %v4109_v52, 2  ;;  %v4049_v35 = vrot.slane %v4048_v2, 1  ;;  %v4080_v48 = vmul.f32 %v7814_v55, %v7814_v55 }
 0x6ea   :  { %v4089_v49 = vadd.f32 %v4088_v21, %v4078_v29  ;;  %v8625_v29 = vld [vmem:[#allocation35_spill] sm:$0xff] }
 0x6eb   :  { %v4064_v17 = vrot.slane %v4063_v5, 1  ;;  %v4111_v1 = vadd.f32 %v4110_v30, %v4109_v52  ;;  %v4050_v62 = vadd.f32 %v4049_v35, %v4048_v2 }
 0x6ec   :  { %v4090_v35 = vadd.f32 %v4089_v49, %v4080_v48 }
 0x6ed   :  { %v4065_v57 = vadd.f32 %v4064_v17, %v4063_v5  ;;  %v4112_v28 = vrot.slane %v4111_v1, 1  ;;  %v4091_v17 = vsel %vm1033_vm8, %v4082_v53, 0.0  ;;  %v2964_v53 = vld [vmem:[%s7996_s12] sm:$0x3] }
 0x6ee   :  { %v4092_v37 = vadd.f32 %v4091_v17, %v4090_v35 }
 0x6ef   :  { %4210 = vmatprep.mubr.f32.mxu0 %v4065_v57  ;;  %v4113_v13 = vadd.f32 %v4112_v28, %v4111_v1 }
 0x6f0   :  { %4211 = vmatmul.mubr.f32.vlgmr.msra.gmra.mxu0 %v4050_v62 }
 0x6f1   :  { %5076 = vmatpush3.msra.mxu0 %v7522_v0  ;;  %4280 = vmatprep.mubr.f32.mxu0 %v4113_v13  ;;  %v4093_v0 = vrot.slane %v4092_v37, 4 }
 0x6f2   :  { %5077 = vmatprep.subr.mxu0 %v7528_v44 }
 0x6f3   :  { %5078 = vmatpush3.msra.mxu0 %v7534_v26  ;;  %v4094_v44 = vadd.f32 %v4093_v0, %v4092_v37 }
 0x6f4   :  { %5079 = vmatprep.subr.mxu0 %v7540_v32  ;;  %v8614_v32 = vld [vmem:[#allocation20_spill] sm:$0xff] }
 0x6f5   :  { %5080 = vmatpush3.msra.mxu0 %v7546_v10  ;;  %v4095_v26 = vrot.slane %v4094_v44, 2 }
 0x6f6   :  { %5081 = vmatprep.subr.mxu0 %v7552_v59  ;;  %v8615_v59 = vld [vmem:[#allocation19_spill] sm:$0xff] }
 0x6f7   :  { %5082 = vmatpush3.msra.mxu0 %v7558_v58  ;;  %v4096_v10 = vadd.f32 %v4095_v26, %v4094_v44  ;;  %v8616_v58 = vld [vmem:[#allocation34_spill] sm:$0xff] }
 0x6f8   :  { %5083 = vmatprep.subr.mxu0 %v7564_v15  ;;  %v8617_v15 = vld [vmem:[#allocation33_spill] sm:$0xff] }
 0x6f9   :  { %5084 = vmatpush3.msra.mxu0 %v7570_v54  ;;  %v8618_v54 = vld [vmem:[#allocation18_spill] sm:$0xff] }
 0x6fa   :  { %5085 = vmatprep.subr.mxu0 %v7576_v63  ;;  %v4097_v63 = vrot.slane %v4096_v10, 1 }
 0x6fb   :  { %5086 = vmatpush3.msra.mxu0 %v7582_v24  ;;  %v8619_v24 = vld [vmem:[#allocation17_spill] sm:$0xff] }
 0x6fc   :  { %5087 = vmatprep.subr.mxu0 %v7588_v8  ;;  %v8620_v8 = vld [vmem:[#allocation32_spill] sm:$0xff] }
 0x6fd   :  { %5088 = vmatpush3.msra.mxu0 %v7594_v45  ;;  %v8621_v45 = vld [vmem:[#allocation31_spill] sm:$0xff] }
 0x6fe   :  { %5089 = vmatprep.subr.mxu0 %v7600_v7  ;;  %v8622_v7 = vld [vmem:[#allocation16_spill] sm:$0xff] }
 0x6ff   :  { %5090 = vmatpush3.msra.mxu0 %v7606_v12  ;;  %v4098_v12 = vadd.f32 %v4097_v63, %v4096_v10 }
 0x700   :  { %5091 = vmatprep.subr.mxu0 %v7612_v19  ;;  %v8623_v19 = vld [vmem:[#allocation15_spill] sm:$0xff] }
 0x701   :  { %5092 = vmatpush3.msra.mxu0 %v7618_v50  ;;  %v8624_v50 = vmov 0.0  }
 0x702   :  { %5093 = vmatprep.subr.mxu0 %v7624_v22  ;;  %v4292_v22 = vld [vmem:[%s7991_s7 + $0x8] sm:$0xff] }
 0x703   :  { %5094 = vmatpush3.msra.mxu0 %v7630_v11  ;;  %4400 = vmatprep.subr.mxu1 %v4292_v22  ;;  %v4291_v11 = vld [vmem:[%s7991_s7] sm:$0xff] }
 0x704   :  { %5095 = vmatprep.subr.mxu0 %v7636_v18  ;;  %4401 = vmatpush1.msra.mxu1 %v4291_v11 }
 0x705   :  { %5096 = vmatpush3.msra.mxu0 %v7642_v6 }
 0x706   :  { %5097 = vmatprep.subr.mxu0 %v8614_v32  ;;  %v2965_v32 = vld [vmem:[%s7997_s13] sm:$0x3] }
 0x707   :  { %5098 = vmatpush3.msra.mxu0 %v8615_v59 }
 0x708   :  { %5099 = vmatprep.subr.mxu0 %v8616_v58 }
 0x709   :  { %5100 = vmatpush3.msra.mxu0 %v8617_v15 }
 0x70a   :  { %5101 = vmatprep.subr.mxu0 %v8618_v54  ;;  %v8626_v54 = vld [vmem:[#allocation30_spill] sm:$0xff] }
 0x70b   :  { %5102 = vmatpush3.msra.mxu0 %v8619_v24 }
 0x70c   :  { %5103 = vmatprep.subr.mxu0 %v8620_v8 }
 0x70d   :  { %5104 = vmatpush3.msra.mxu0 %v8621_v45 }
 0x70e   :  { %5105 = vmatprep.subr.mxu0 %v8622_v7 }
 0x70f   :  { %5106 = vmatpush3.msra.mxu0 %v8623_v19 }
 0x710   :  { %4281 = vmatmul.mubr.f32.vlgmr.msra.gmra.mxu0 %v4098_v12  ;;  %4326 = vmatprep.subr.mxu0 %v4292_v22 }
 0x711   :  { %4360 = vmatprep.mubr.f32.mxu0 %v8624_v50  ;;  %4327 = vmatpush1.msra.mxu0 %v4291_v11  ;;  %v8627_v11 = vld [vmem:[#allocation29_spill] sm:$0xff] }
 0x7b0   :  { %v5072_v18 = vpop.f32.mrf.mxu0 }
 0x7b2   :  { %v5073_v6 = vpop.f32.mrf.mxu0 }
 0x7b3   :  { %v5074_v36 = vadd.f32 %v5073_v6, %v5072_v18  ;;  %v8628_v18 = vld [vmem:[#allocation14_spill] sm:$0xff] }
 0x7b5   :  { %v4286_v4 = vmul.f32 0.00048828125, %v5074_v36 }
 0x7b7   :  { %4915 = vmatmul.mubr.msk.f32.vlgmr.msra.gmra.mxu0 %vm2532_vm12, %v4286_v4  ;;  %v4288_v42 = vmul.f32 %v4286_v4, %v4286_v4 }
 0x7d0   :  { %v5107_v40 = vpop.f32.mrf.mxu0 }
 0x7d2   :  { %v5108_v3 = vpop.f32.mrf.mxu0 }
 0x7d3   :  { %v5109_v52 = vadd.f32 %v5108_v3, %v5107_v40 }
 0x7d5   :  { %v4287_v51 = vmul.f32 0.00048828125, %v5109_v52 }
 0x7d7   :  { %v4289_v2 = vsub.f32 %v4287_v51, %v4288_v42 }
 0x7d9   :  { %v4290_v5 = vmax.f32 %v4289_v2, 0.0 }
 0x7db   :  { %4916 = vmatmul.mubr.msk.f32.vlgmr.msra.gmra.mxu1 %vm2532_vm12, %v4290_v5 }
 0x877   :  { %v4362_v21 = vpop.f32.mrf.mxu0 }
 0x879   :  { %v4364_v35 = vpop.f32.mrf.mxu0 }
 0x89b   :  { %v4436_v30 = vpop.f32.mrf.mxu1 }
 0x89c   :  { %v4437_v9 = vadd.f32 1e-05, %v4436_v30 }
 0x89d   :  { %v4438_v1 = vpop.f32.mrf.mxu1 }
 0x89e   :  { %v4439_v39 = vadd.f32 1e-05, %v4438_v1  ;;  %5192 = vrsqrt.f32 %v4437_v9 }
 0x8a0   :  { %5194 = vrsqrt.f32 %v4439_v39 }
 0x8ab   :  { %v5193_v33 = vpop.eup %5192 }
 0x8ad   :  { %v5195_v57 = vpop.eup %5194 }
 0x8ae   :  { %v4445_v28 = vcombine.low %v5193_v33, %v5195_v57 }
 0x8b0   :  { %v4452_v62 = vrot.slane %v4445_v28, %v8625_v29 }
 0x8b2   :  { %v4459_v13 = vrot.slane %v4452_v62, %v8625_v29 }
 0x8b4   :  { %v4461_v48 = vmul.f32 %v4459_v13, %v2964_v53 }
 0x8b6   :  { %v4466_v49 = vrot.slane %v4461_v48, %v6953_v47  ;;  %v4470_v17 = vrot.slane %v4461_v48, %v8486_v34 }
 0x8b8   :  { %v4473_v37 = vmul.f32 %v4466_v49, %v4362_v21  ;;  %v4474_v0 = vmul.f32 %v4470_v17, %v4364_v35  ;;  %v4494_v59 = vmul.f32 %v4466_v49, %v7754_v23  ;;  %v4495_v58 = vmul.f32 %v4470_v17, %v7743_v60 }
 0x8b9   :  { %v4496_v15 = vmul.f32 %v4466_v49, %v7745_v31  ;;  %v4497_v63 = vmul.f32 %v4470_v17, %v8626_v54  ;;  %v4498_v24 = vmul.f32 %v4466_v49, %v7756_v56  ;;  %v4499_v45 = vmul.f32 %v4470_v17, %v7749_v61 }
 0x8ba   :  { %v4477_v44 = vcombine.low %v4473_v37, %v4474_v0  ;;  %v4500_v7 = vmul.f32 %v4466_v49, %v7769_v43  ;;  %v4501_v12 = vmul.f32 %v4470_v17, %v7763_v16  ;;  %v4502_v19 = vmul.f32 %v4466_v49, %v7758_v41 }
 0x8bb   :  { %v4503_v50 = vmul.f32 %v4470_v17, %v7752_v25  ;;  %v4504_v23 = vmul.f32 %v4466_v49, %v7795_v20  ;;  %v4505_v60 = vmul.f32 %v4470_v17, %v7793_v27  ;;  %v4506_v31 = vmul.f32 %v4466_v49, %v7805_v46 }
 0x8bc   :  { %v4484_v26 = vrot.slane %v4477_v44, %v8625_v29  ;;  %v4507_v22 = vmul.f32 %v4470_v17, %v7801_v14  ;;  %v4508_v43 = vmul.f32 %v4466_v49, %v7814_v55  ;;  %v4509_v16 = vmul.f32 %v4470_v17, %v8627_v11 }
 0x8bd   :  { %v4510_v41 = vmul.f32 %v4466_v49, %v7819_v38  ;;  %v4511_v25 = vmul.f32 %v4470_v17, %v8628_v18 }
 0x8be   :  { %v4491_v10 = vrot.slane %v4484_v26, %v8625_v29 }
 0x8c0   :  { %v4493_v8 = vsub.f32 %v2965_v32, %v4491_v10 }
 0x8c2   :  { %v4516_v56 = vrot.slane %v4493_v8, %v6953_v47  ;;  %v4520_v61 = vrot.slane %v4493_v8, %v8486_v34 }
 0x8c4   :  { %v4523_v6 = vadd.f32 %v4516_v56, %v4494_v59  ;;  %v4524_v20 = vadd.f32 %v4520_v61, %v4495_v58  ;;  %v4525_v36 = vadd.f32 %v4516_v56, %v4496_v15  ;;  %v4526_v27 = vadd.f32 %v4520_v61, %v4497_v63 }
 0x8c5   :  { %v4527_v46 = vadd.f32 %v4516_v56, %v4498_v24  ;;  %v4528_v4 = vadd.f32 %v4520_v61, %v4499_v45  ;;  %v4529_v14 = vadd.f32 %v4516_v56, %v4500_v7  ;;  %v4530_v40 = vadd.f32 %v4520_v61, %v4501_v12 }
 0x8c6   :  { %v4531_v47 = vadd.f32 %v4516_v56, %v4502_v19  ;;  %v4532_v3 = vadd.f32 %v4520_v61, %v4503_v50  ;;  %v4533_v34 = vadd.f32 %v4516_v56, %v4504_v23  ;;  %v4534_v52 = vadd.f32 %v4520_v61, %v4505_v60 }
 0x8c7   :  { %v4535_v55 = vadd.f32 %v4516_v56, %v4506_v31  ;;  %v4536_v42 = vadd.f32 %v4520_v61, %v4507_v22  ;;  %v4537_v51 = vadd.f32 %v4516_v56, %v4508_v43  ;;  %v4538_v2 = vadd.f32 %v4520_v61, %v4509_v16 }
 0x8c8   :  { %v4539_v38 = vadd.f32 %v4516_v56, %v4510_v41  ;;  %v4540_v5 = vadd.f32 %v4520_v61, %v4511_v25  ;;  %v4541_v30 = vmax.f32 %v4523_v6, 0.0  ;;  %v4542_v9 = vmax.f32 %v4524_v20, 0.0 }
 0x8c9   :  { %v4543_v1 = vmax.f32 %v4525_v36, 0.0  ;;  %v4544_v39 = vmax.f32 %v4526_v27, 0.0  ;;  %v4545_v33 = vmax.f32 %v4527_v46, 0.0  ;;  %v4546_v57 = vmax.f32 %v4528_v4, 0.0 }
 0x8ca   :  { %v4547_v28 = vmax.f32 %v4529_v14, 0.0  ;;  %v4548_v29 = vmax.f32 %v4530_v40, 0.0  ;;  %v4549_v62 = vmax.f32 %v4531_v47, 0.0  ;;  %v4550_v53 = vmax.f32 %v4532_v3, 0.0  ;;  %4559 = vst [vmem:[%s7998_s14] sm:$0xff] %v4541_v30  ;;  %4560 = vst [vmem:[%s7998_s14 + $0x8] sm:$0xff] %v4542_v9 }
 0x8cb   :  { %v4551_v13 = vmax.f32 %v4533_v34, 0.0  ;;  %v4552_v21 = vmax.f32 %v4534_v52, 0.0  ;;  %v4553_v48 = vmax.f32 %v4535_v55, 0.0  ;;  %v4554_v49 = vmax.f32 %v4536_v42, 0.0  ;;  %4561 = vst [vmem:[%s7998_s14 + $0x10] sm:$0xff] %v4543_v1  ;;  %4562 = vst [vmem:[%s7998_s14 + $0x18] sm:$0xff] %v4544_v39 }
 0x8cc   :  { %4563 = vst [vmem:[%s7998_s14 + $0x20] sm:$0xff] %v4545_v33  ;;  %4564 = vst [vmem:[%s7998_s14 + $0x28] sm:$0xff] %v4546_v57  ;;  %v4555_v17 = vmax.f32 %v4537_v51, 0.0  ;;  %v4556_v35 = vmax.f32 %v4538_v2, 0.0  ;;  %v4557_v37 = vmax.f32 %v4539_v38, 0.0  ;;  %v4558_v0 = vmax.f32 %v4540_v5, 0.0 }
 0x8cd   :  { %4565 = vst [vmem:[%s7998_s14 + $0x30] sm:$0xff] %v4547_v28  ;;  %4566 = vst [vmem:[%s7998_s14 + $0x38] sm:$0xff] %v4548_v29  ;;  %v4578_v44 = vrot.slane %v4549_v62, 2  ;;  %v4579_v26 = vrot.slane %v4551_v13, 2  ;;  %v4581_v32 = vrot.slane %v4550_v53, 2  ;;  %v4582_v10 = vrot.slane %v4552_v21, 2 }
 0x8ce   :  { %v4584_v59 = vrot.slane %v4553_v48, 2  ;;  %v4586_v58 = vrot.slane %v4554_v49, 2  ;;  %v4588_v15 = vrot.slane %v4555_v17, 2  ;;  %v4590_v54 = vrot.slane %v4556_v35, 2 }
 0x8cf   :  { %v4580_v63 = vsel %vm4577_vm7, %v4578_v44, %v4579_v26  ;;  %v4583_v24 = vsel %vm4577_vm7, %v4581_v32, %v4582_v10  ;;  %v4592_v8 = vrot.slane %v4557_v37, 2  ;;  %v4594_v45 = vrot.slane %v4558_v0, 2 }
 0x8d0   :  { %v4585_v7 = vsel %vm4577_vm7, %v4579_v26, %v4584_v59  ;;  %v4587_v12 = vsel %vm4577_vm7, %v4582_v10, %v4586_v58  ;;  %v4589_v19 = vsel %vm4577_vm7, %v4584_v59, %v4588_v15  ;;  %v4591_v50 = vsel %vm4577_vm7, %v4586_v58, %v4590_v54  ;;  %4917 = vst [vmem:[%s7998_s14 + $0x40] sm:$0xff] %v4580_v63 }
 0x8d1   :  { %4918 = vst [vmem:[%s7998_s14 + $0x48] sm:$0xff] %v4583_v24  ;;  %v4593_v23 = vsel %vm4577_vm7, %v4588_v15, %v4592_v8  ;;  %v4595_v60 = vsel %vm4577_vm7, %v4590_v54, %v4594_v45  ;;  %4919 = vst [vmem:[%s7998_s14 + $0x50] sm:$0xff] %v4585_v7 }
 0x8d2   :  { %4920 = vst [vmem:[%s7998_s14 + $0x58] sm:$0xff] %v4587_v12  ;;  %4921 = vst [vmem:[%s7998_s14 + $0x60] sm:$0xff] %v4589_v19 }
 0x8d3   :  { %4922 = vst [vmem:[%s7998_s14 + $0x68] sm:$0xff] %v4591_v50  ;;  %4923 = vst [vmem:[%s7998_s14 + $0x70] sm:$0xff] %v4593_v23 }
 0x8d4   :  { %4924 = vst [vmem:[%s7998_s14 + $0x78] sm:$0xff] %v4595_v60 }
 0x8d5   :  { %4617 = vsyncmov [#allocation6] }
 0x8d8   :  { %s4618_s2 = vpop.sfrf %4617 }
 0x8d9   :  { %p4925_p0 = scmp.ne.s32.totalorder %s4618_s2, 0 }
 0x8db   :  { %4622 = shalt.err (%p4925_p0)  }
 0x8dc   :  { %4624 = vsyncmov [#allocation6 + $0x1] }
 0x8df   :  { %s4625_s16 = vpop.sfrf %4624 }
 0x8e0   :  { %p4926_p1 = scmp.ne.s32.totalorder %s4625_s16, 0 }
 0x8e2   :  { %4629 = shalt.err (%p4926_p1)  }

</bundles_post_ra>
